<compile_context>
chip_gen: v7x
topology: tpu7x:2x2x1
jax: 0.10.0
libtpu: 0.0.40
codegen_flags: <defaults>
</compile_context>

<pallas_src>
import functools

import jax
import jax.numpy as jnp
from jax import lax
from jax.experimental import pallas as pl
from jax.experimental.pallas import tpu as pltpu


def _vmem_limit_bytes():
    # Per-generation scoped-VMEM budget: ~75% of physical VMEM (v5e/v6e 128 MiB, v7x 64 MiB),
    # capped at 100 MiB.  Falls back to a conservative 48 MiB if the query is unavailable.
    try:
        cap = pltpu.get_tpu_info().vmem_capacity_bytes
        return int(min(cap * 3 // 4, 100 * 1024 * 1024))
    except Exception:
        return 48 * 1024 * 1024


VMEM_LIMIT_BYTES = _vmem_limit_bytes()

_M_TILES = (512, 256, 128, 64, 32, 16)     # >=16 so bf16 sublane tiling stays legal
_N_TILES = (512, 256, 128)
_K_TILES = (2048, 1024, 512, 256, 128)


def _pick_tile(dim, prefs):
    """Largest preferred tile that divides `dim`, else the full dimension (always legal)."""
    for p in prefs:
        if dim % p == 0:
            return p
    return dim


def _matmul_tiles(M, N, K):
    tm = _pick_tile(M, _M_TILES)
    tn = _pick_tile(N, _N_TILES)
    tk = _pick_tile(K, _K_TILES)

    def footprint(tk_):
        # double-buffered bf16 inputs + f32 output/acc/residual blocks
        return 2 * 2 * (tm * tk_ + tk_ * tn) + 4 * tm * tn * 3

    budget = VMEM_LIMIT_BYTES // 2
    if footprint(tk) > budget:
        for cand in _K_TILES:
            if cand < tk and K % cand == 0 and footprint(cand) <= budget:
                return tm, tn, cand
    return tm, tn, tk


def _bf16(x):
    return x if x.dtype == jnp.bfloat16 else x.astype(jnp.bfloat16)


def _gelu(x):
    # tanh-approximate GELU (lowers to EUP tanh; negligible difference vs. erf-GELU).
    return jax.nn.gelu(x, approximate=True)


# ----------------------------------------------------------------------------
# Tiled matmul: bf16 operands, f32 accumulation, fused bias/GELU/residual epilogue.
# When out_dtype is f32 the accumulator is the (resident) output block itself.
# ----------------------------------------------------------------------------
def _make_matmul_kernel(has_bias, has_res, activation, acc_in_out):
    def kernel(*refs):
        x_ref, w_ref = refs[0], refs[1]
        idx = 2
        b_ref = r_ref = None
        if has_bias:
            b_ref = refs[idx]
            idx += 1
        if has_res:
            r_ref = refs[idx]
            idx += 1
        o_ref = refs[idx]
        acc_ref = o_ref if acc_in_out else refs[idx + 1]

        @pl.when(pl.program_id(2) == 0)
        def _init():
            acc_ref[...] = jnp.zeros_like(acc_ref)

        acc_ref[...] += jnp.dot(x_ref[...], w_ref[...],
                                preferred_element_type=jnp.float32)

        @pl.when(pl.program_id(2) == pl.num_programs(2) - 1)
        def _finalize():
            r = acc_ref[...]
            if has_bias:
                r = r + b_ref[...]
            if activation == "gelu":
                r = _gelu(r)
            if has_res:
                r = r + r_ref[...]
            o_ref[...] = r.astype(o_ref.dtype)

    return kernel


def matmul(x, w, b=None, residual=None, activation=None, out_dtype=jnp.float32):
    """x: (M, K), w: (K, N).  Returns activation(x @ w + b) + residual, tiled + pipelined."""
    M, K = x.shape
    N = w.shape[1]
    tm, tn, tk = _matmul_tiles(M, N, K)

    in_specs = [pl.BlockSpec((tm, tk), lambda i, j, k: (i, k)),
                pl.BlockSpec((tk, tn), lambda i, j, k: (k, j))]
    args = [_bf16(x), _bf16(w)]
    if b is not None:
        in_specs.append(pl.BlockSpec((1, tn), lambda i, j, k: (0, j)))
        args.append(b.reshape(1, N).astype(jnp.float32))
    if residual is not None:
        in_specs.append(pl.BlockSpec((tm, tn), lambda i, j, k: (i, j)))
        args.append(residual.astype(jnp.float32))

    acc_in_out = out_dtype == jnp.float32
    kernel = _make_matmul_kernel(b is not None, residual is not None, activation, acc_in_out)
    return pl.pallas_call(
        kernel,
        out_shape=jax.ShapeDtypeStruct((M, N), out_dtype),
        grid=(M // tm, N // tn, K // tk),
        in_specs=in_specs,
        out_specs=pl.BlockSpec((tm, tn), lambda i, j, k: (i, j)),
        scratch_shapes=[] if acc_in_out else [pltpu.VMEM((tm, tn), jnp.float32)],
        compiler_params=pltpu.CompilerParams(
            dimension_semantics=("parallel", "parallel", "arbitrary"),
            vmem_limit_bytes=VMEM_LIMIT_BYTES),
    )(*args)


# ----------------------------------------------------------------------------
# Fused LayerNorm + matmul.  LN (f32 stats) + bf16 cast computed once per M-tile into a
# VMEM scratch under pl.when(j==0) and reused across all N-tiles.  K kept whole (LN needs
# full rows); grid tiles M and N only; the N axis is "arbitrary" so the scratch stays on
# one core for all j of a given i.
# ----------------------------------------------------------------------------
def _make_ln_matmul_kernel(has_bias, activation):
    def kernel(*refs):
        x_ref, g_ref, bln_ref, w_ref = refs[:4]
        idx = 4
        b_ref = None
        if has_bias:
            b_ref = refs[idx]
            idx += 1
        o_ref = refs[idx]
        xn_ref = refs[idx + 1]                       # (tm, K) bf16 LN cache

        @pl.when(pl.program_id(1) == 0)
        def _layer_norm():
            x = x_ref[...]                           # (tm, K) f32 (j-invariant, resident)
            mu = jnp.mean(x, axis=-1, keepdims=True)
            xc = x - mu
            var = jnp.mean(xc * xc, axis=-1, keepdims=True)
            xn_ref[...] = (xc * lax.rsqrt(var + 1e-5) * g_ref[...] +
                           bln_ref[...]).astype(jnp.bfloat16)

        r = jnp.dot(xn_ref[...], w_ref[...], preferred_element_type=jnp.float32)
        if has_bias:
            r = r + b_ref[...]
        if activation == "gelu":
            r = _gelu(r)
        o_ref[...] = r.astype(o_ref.dtype)

    return kernel


def ln_matmul(x, gamma, beta, w, b=None, activation=None, out_dtype=jnp.float32):
    """Fused LayerNorm(x) @ w (+ bias, + activation)."""
    M, K = x.shape
    N = w.shape[1]
    tm = _pick_tile(M, _M_TILES)
    tn = _pick_tile(N, _N_TILES)

    in_specs = [pl.BlockSpec((tm, K), lambda i, j: (i, 0)),
                pl.BlockSpec((1, K), lambda i, j: (0, 0)),
                pl.BlockSpec((1, K), lambda i, j: (0, 0)),
                pl.BlockSpec((K, tn), lambda i, j: (0, j))]
    args = [x.astype(jnp.float32),
            gamma.reshape(1, K).astype(jnp.float32),
            beta.reshape(1, K).astype(jnp.float32),
            _bf16(w)]
    if b is not None:
        in_specs.append(pl.BlockSpec((1, tn), lambda i, j: (0, j)))
        args.append(b.reshape(1, N).astype(jnp.float32))

    kernel = _make_ln_matmul_kernel(b is not None, activation)
    return pl.pallas_call(
        kernel,
        out_shape=jax.ShapeDtypeStruct((M, N), out_dtype),
        grid=(M // tm, N // tn),
        in_specs=in_specs,
        out_specs=pl.BlockSpec((tm, tn), lambda i, j: (i, j)),
        scratch_shapes=[pltpu.VMEM((tm, K), jnp.bfloat16)],
        compiler_params=pltpu.CompilerParams(
            dimension_semantics=("parallel", "arbitrary"),
            vmem_limit_bytes=VMEM_LIMIT_BYTES),
    )(*args)


# ----------------------------------------------------------------------------
# Causal multi-head attention.  Takes the fused (Bt, T, 3D) QKV tensor directly, query-tiled
# flash-style online softmax over KV tiles with an in-kernel iota causal mask (VMEM bounded
# to O(tq*T); no (T,T) bias), causal skipping of fully-masked KV tiles, scale pre-folded
# into Wq, deferred normalization via the EUP approximate reciprocal.
# ----------------------------------------------------------------------------
def _make_attn_kernel(heads, dh, D, tq, tkv):
    def kernel(qkv_q_ref, qkv_kv_ref, o_ref, m_sc, l_sc, acc_sc):
        qi = pl.program_id(1)
        n_kv = qi + 1                                    # only KV tiles that overlap causally
        rows = qi * tq + lax.broadcasted_iota(jnp.int32, (tq, tkv), 0)
        cols = lax.broadcasted_iota(jnp.int32, (tq, tkv), 1)

        for h in range(heads):                           # static unroll over heads
            q = qkv_q_ref[:, pl.ds(h * dh, dh)]          # (tq, dh) bf16 (scale folded in Wq)
            m_sc[...] = jnp.full_like(m_sc, -1e30)
            l_sc[...] = jnp.zeros_like(l_sc)
            acc_sc[...] = jnp.zeros_like(acc_sc)

            def body(kv, carry):
                start = pl.multiple_of(kv * tkv, tkv)
                k = qkv_kv_ref[pl.ds(start, tkv), pl.ds(D + h * dh, dh)]
                v = qkv_kv_ref[pl.ds(start, tkv), pl.ds(2 * D + h * dh, dh)]
                s = lax.dot_general(q, k, (((1,), (1,)), ((), ())),
                                    preferred_element_type=jnp.float32)     # (tq, tkv)
                s = jnp.where(rows >= kv * tkv + cols, s, -1e30)            # causal mask
                m_prev = m_sc[...]
                m_new = jnp.maximum(m_prev, jnp.max(s, axis=-1, keepdims=True))
                alpha = jnp.exp(m_prev - m_new)
                p = jnp.exp(s - m_new)
                l_sc[...] = alpha * l_sc[...] + jnp.sum(p, axis=-1, keepdims=True)
                acc_sc[...] = alpha * acc_sc[...] + jnp.dot(
                    p.astype(jnp.bfloat16), v, preferred_element_type=jnp.float32)
                m_sc[...] = m_new
                return carry

            lax.fori_loop(0, n_kv, body, 0)
            # deferred normalization: (p @ v) * 1/l
            o_ref[:, pl.ds(h * dh, dh)] = (
                acc_sc[...] * pl.reciprocal(l_sc[...], approx=True)).astype(o_ref.dtype)

    return kernel


def causal_attention(qkv, heads, D):
    """qkv: (Bt, T, 3D) bf16 fused [q|k|v]; returns attention output (Bt, T, D) bf16."""
    Bt, T, threeD = qkv.shape
    dh = D // heads
    tq = _pick_tile(T, (256, 128))
    kernel = _make_attn_kernel(heads, dh, D, tq, tq)
    return pl.pallas_call(
        kernel,
        out_shape=jax.ShapeDtypeStruct((Bt, T, D), jnp.bfloat16),
        grid=(Bt, T // tq),
        in_specs=[pl.BlockSpec((None, tq, threeD), lambda b, qi: (b, qi, 0)),
                  pl.BlockSpec((None, T, threeD), lambda b, qi: (b, 0, 0))],
        out_specs=pl.BlockSpec((None, tq, D), lambda b, qi: (b, qi, 0)),
        scratch_shapes=[pltpu.VMEM((tq, 1), jnp.float32),
                        pltpu.VMEM((tq, 1), jnp.float32),
                        pltpu.VMEM((tq, dh), jnp.float32)],
        compiler_params=pltpu.CompilerParams(
            dimension_semantics=("parallel", "parallel"),
            vmem_limit_bytes=VMEM_LIMIT_BYTES),
    )(qkv, qkv)


# ----------------------------------------------------------------------------
# Fused head: final LayerNorm + concatenated per-field logits matmul + 3-stream softmax
# gating (MusicTransformerWrapper self_attention_vector fusion), emitting only the gated
# (BT, sumN_pad) tensor.  The three streams are read from the same (3BT, D) hidden slab
# via row-offset index maps.
# ----------------------------------------------------------------------------
def _make_head_kernel():
    def kernel(x1_ref, x2_ref, x3_ref, g_ref, bln_ref, w_ref, b_ref,
               v1_ref, v2_ref, v3_ref, e_ref, out_ref):
        g = g_ref[...]
        bl = bln_ref[...]

        def ln_bf16(xr):
            x = xr[...]
            mu = jnp.mean(x, axis=-1, keepdims=True)
            xc = x - mu
            var = jnp.mean(xc * xc, axis=-1, keepdims=True)
            return (xc * lax.rsqrt(var + 1e-5) * g + bl).astype(jnp.bfloat16)

        w = w_ref[...]
        bias = b_ref[...]
        o1 = jnp.dot(ln_bf16(x1_ref), w, preferred_element_type=jnp.float32) + bias
        o2 = jnp.dot(ln_bf16(x2_ref), w, preferred_element_type=jnp.float32) + bias
        o3 = jnp.dot(ln_bf16(x3_ref), w, preferred_element_type=jnp.float32) + bias

        # per-field stream scores: a_s[:, f] == out_s[field f] @ v_s[field f] (V is 0/1 block)
        a1 = jnp.dot(o1.astype(jnp.bfloat16), v1_ref[...], preferred_element_type=jnp.float32)
        a2 = jnp.dot(o2.astype(jnp.bfloat16), v2_ref[...], preferred_element_type=jnp.float32)
        a3 = jnp.dot(o3.astype(jnp.bfloat16), v3_ref[...], preferred_element_type=jnp.float32)
        m = jnp.maximum(jnp.maximum(a1, a2), a3)
        e1, e2, e3 = jnp.exp(a1 - m), jnp.exp(a2 - m), jnp.exp(a3 - m)
        inv = pl.reciprocal(e1 + e2 + e3, approx=True)
        # broadcast each field's softmax weight back over that field's vocab columns
        # (== torch repeat_interleave) via the 0/1 indicator E (F, sumN_pad), bf16 operands.
        ew = e_ref[...]
        w1 = jnp.dot((e1 * inv).astype(jnp.bfloat16), ew, preferred_element_type=jnp.float32)
        w2 = jnp.dot((e2 * inv).astype(jnp.bfloat16), ew, preferred_element_type=jnp.float32)
        w3 = jnp.dot((e3 * inv).astype(jnp.bfloat16), ew, preferred_element_type=jnp.float32)
        out_ref[...] = o1 * w1 + o2 * w2 + o3 * w3

    return kernel


def fused_logits_gate(h, norm_g, norm_b, w_logits, b_logits, v_mats, e_mat, rows_per_stream):
    """h: (3*BT, D) f32 -> gated logits (BT, sumN_pad) f32."""
    _, D = h.shape
    n_pad = w_logits.shape[1]
    BT = rows_per_stream
    tm = _pick_tile(BT, _M_TILES)
    nb = BT // tm

    def xmap0(i):
        return (i, 0)

    def xmap1(i):
        return (i + nb, 0)

    def xmap2(i):
        return (i + 2 * nb, 0)

    def full(shape):
        return pl.BlockSpec(shape, lambda i: (0, 0))

    return pl.pallas_call(
        _make_head_kernel(),
        out_shape=jax.ShapeDtypeStruct((BT, n_pad), jnp.float32),
        grid=(nb,),
        in_specs=[pl.BlockSpec((tm, D), xmap0),
                  pl.BlockSpec((tm, D), xmap1),
                  pl.BlockSpec((tm, D), xmap2),
                  full((1, D)), full((1, D)),
                  full((D, n_pad)), full((1, n_pad)),
                  full(v_mats[0].shape), full(v_mats[1].shape), full(v_mats[2].shape),
                  full(e_mat.shape)],
        out_specs=pl.BlockSpec((tm, n_pad), lambda i: (i, 0)),
        compiler_params=pltpu.CompilerParams(
            dimension_semantics=("parallel",),
            vmem_limit_bytes=VMEM_LIMIT_BYTES),
    )(h, h, h,
      norm_g.reshape(1, D).astype(jnp.float32), norm_b.reshape(1, D).astype(jnp.float32),
      _bf16(w_logits), b_logits.reshape(1, n_pad).astype(jnp.float32),
      v_mats[0], v_mats[1], v_mats[2], e_mat)


# ----------------------------------------------------------------------------
# Model glue (parameter init, embedding lookup, loss)
# ----------------------------------------------------------------------------
def init_params(key, n_tokens, dim, depth, heads, max_seq_len):
    keys = iter(jax.random.split(key, 64 + 8 * depth))

    def nrm(shape, std):
        return std * jax.random.normal(next(keys), shape, jnp.float32)

    assert dim % heads == 0
    dh = dim // heads
    inner = dim
    ff_inner = 4 * dim
    sum_n = sum(n_tokens)
    n_pad = ((sum_n + 127) // 128) * 128      # lane-pad concatenated vocab to a 128 multiple
    nfields = len(n_tokens)

    params = {}
    # token embeddings: clones are re-initialized (kaiming) per stream -> 3 independent sets.
    params["tok_emb"] = [[nrm((n, dim), (2.0 / dim) ** 0.5) for n in n_tokens]
                         for _ in range(3)]
    # positional embedding: clones are deep copies -> shared across streams.
    params["pos_emb"] = nrm((max_seq_len, dim), 1.0)
    # attention layers: clones are deep copies -> shared weights across the 3 streams.
    layers = []
    for _ in range(depth):
        wqkv = nrm((dim, 3 * inner), dim ** -0.5)
        # fold the 1/sqrt(dh) attention scale into the Q columns (removes per-head VPU mults).
        wqkv = wqkv.at[:, :inner].multiply(dh ** -0.5)
        layers.append(dict(
            ln1_g=jnp.ones((dim,), jnp.float32), ln1_b=jnp.zeros((dim,), jnp.float32),
            wqkv=wqkv.astype(jnp.bfloat16),
            wo=nrm((inner, dim), inner ** -0.5).astype(jnp.bfloat16),
            bo=jnp.zeros((dim,), jnp.float32),
            ln2_g=jnp.ones((dim,), jnp.float32), ln2_b=jnp.zeros((dim,), jnp.float32),
            w1=nrm((dim, ff_inner), dim ** -0.5).astype(jnp.bfloat16),
            b1=jnp.zeros((ff_inner,), jnp.float32),
            w2=nrm((ff_inner, dim), ff_inner ** -0.5).astype(jnp.bfloat16),
            b2=jnp.zeros((dim,), jnp.float32),
        ))
    params["layers"] = layers
    params["norm_g"] = jnp.ones((dim,), jnp.float32)
    params["norm_b"] = jnp.zeros((dim,), jnp.float32)
    # per-field to_logits heads concatenated into one lane-dense (dim, n_pad) matmul.
    w_logits = jnp.zeros((dim, n_pad), jnp.float32)
    w_logits = w_logits.at[:, :sum_n].set(nrm((dim, sum_n), dim ** -0.5))
    params["w_logits"] = w_logits.astype(jnp.bfloat16)
    params["b_logits"] = jnp.zeros((n_pad,), jnp.float32)
    # self_attention_vectorK is ones(n, 1, 3): stored per stream as a 0/1 block matrix V_s
    # (n_pad, F) so per-field stream scores are one matmul; E (F, n_pad) broadcasts the
    # per-field softmax gate back over that field's vocab columns (== repeat_interleave).
    v_block = jnp.zeros((n_pad, nfields), jnp.float32)
    e_block = jnp.zeros((nfields, n_pad), jnp.float32)
    off = 0
    for f, n in enumerate(n_tokens):
        v_block = v_block.at[off:off + n, f].set(1.0)
        e_block = e_block.at[f, off:off + n].set(1.0)
        off += n
    params["fusion_V"] = [v_block.astype(jnp.bfloat16) for _ in range(3)]
    params["fusion_E"] = e_block.astype(jnp.bfloat16)
    return params


def decoder_forward(params, h, heads):
    Bt, T, D = h.shape
    M = Bt * T
    for lyr in params["layers"]:
        # --- pre-norm causal self-attention block ---------------------------------------
        h2d = h.reshape(M, D)
        # LN fused into the fused QKV projection; the fused (M, 3D) QKV goes straight into
        # the attention kernel (no XLA q/k/v slices / extra HBM round-trip).
        qkv = ln_matmul(h2d, lyr["ln1_g"], lyr["ln1_b"], lyr["wqkv"],
                        out_dtype=jnp.bfloat16)                             # (M, 3D) bf16
        a = causal_attention(qkv.reshape(Bt, T, 3 * D), heads, D)           # (Bt, T, D) bf16
        h = matmul(a.reshape(M, D), lyr["wo"], b=lyr["bo"],
                   residual=h2d).reshape(Bt, T, D)
        # --- pre-norm feed-forward block (LN fused into FFN1; GELU + residual fused) -----
        h2d = h.reshape(M, D)
        f1 = ln_matmul(h2d, lyr["ln2_g"], lyr["ln2_b"], lyr["w1"], b=lyr["b1"],
                       activation="gelu", out_dtype=jnp.bfloat16)           # (M, 4D) bf16
        h = matmul(f1, lyr["w2"], b=lyr["b2"], residual=h2d).reshape(Bt, T, D)
    return h


def cross_entropy(logits, targets, ignore_index=-100):
    """logits: (B,T,N) f32, targets: (B,T) int32. Mean NLL over non-ignored targets."""
    logz = jax.scipy.special.logsumexp(logits, axis=-1)
    tgt = jnp.clip(targets, 0, logits.shape[-1] - 1)
    picked = jnp.take_along_axis(logits, tgt[..., None], axis=-1)[..., 0]
    nll = logz - picked
    valid = (targets != ignore_index).astype(jnp.float32)
    return jnp.sum(nll * valid) / jnp.maximum(jnp.sum(valid), 1.0)


def music_x_transformer_loss(params, seq, seq1, seq2, heads, n_tokens):
    """MusicAutoregressiveWrapper.forward: teacher-forced sum of per-field CE losses."""
    B, Tfull, F = seq.shape
    T = Tfull - 1
    xo = seq[:, 1:]
    streams_in = [seq[:, :-1], seq1[:, :-1], seq2[:, :-1]]
    D = params["pos_emb"].shape[1]

    # embed each stream (per-stream token embeddings, shared scaled positional embedding),
    # then batch the three weight-sharing streams into ONE decoder pass (effective batch 3B).
    pos = (params["pos_emb"][:T] * (D ** -0.5))[None]
    hs = []
    for s in range(3):
        h = jnp.zeros((B, T, D), jnp.float32)
        for f in range(F):
            h = h + params["tok_emb"][s][f][streams_in[s][..., f]]
        hs.append(h + pos)
    h = jnp.concatenate(hs, axis=0)                                          # (3B, T, D)

    h = decoder_forward(params, h, heads)

    # fused: final LayerNorm + concatenated-vocab logits matmul + 3-stream softmax gating.
    BT = B * T
    fused = fused_logits_gate(h.reshape(3 * BT, D), params["norm_g"], params["norm_b"],
                              params["w_logits"], params["b_logits"],
                              params["fusion_V"], params["fusion_E"], BT)    # (BT, n_pad)
    fused = fused.reshape(B, T, -1)

    loss = jnp.float32(0.0)
    off = 0
    for f, n in enumerate(n_tokens):
        loss = loss + cross_entropy(fused[..., off:off + n], xo[..., f])
        off += n
    return loss


# ----------------------------------------------------------------------------
# Main
# ----------------------------------------------------------------------------
if __name__ == "__main__":
    B, Tfull, F = 2, 9, 6              # sequence length seen by the net is Tfull - 1 = 8
    dim, depth, heads = 32, 2, 4
    max_seq_len, max_beat = 16, 8
    # fields: type, beat, position, pitch, duration, instrument (small synthetic vocabs)
    n_tokens = [5, max_beat + 1, 13, 17, 9, 7]

    root = jax.random.PRNGKey(0)
    kp, k1, k2, k3 = jax.random.split(root, 4)
    params = init_params(kp, n_tokens, dim, depth, heads, max_seq_len)

    def rand_tokens(key):
        cols = []
        for n in n_tokens:
            key, sub = jax.random.split(key)
            cols.append(jax.random.randint(sub, (B, Tfull), 0, n))
        return jnp.stack(cols, axis=-1).astype(jnp.int32)

    seq = rand_tokens(k1)
    seq1 = rand_tokens(k2)
    seq2 = rand_tokens(k3)

    loss_fn = jax.jit(functools.partial(music_x_transformer_loss,
                                        heads=heads, n_tokens=tuple(n_tokens)))
    loss = loss_fn(params, seq, seq1, seq2)
    jax.block_until_ready(loss)
    assert jnp.isfinite(loss)
    print("KERNEL_OK")
</pallas_src>

<mosaic_0001>
module attributes {stable_mosaic.version = 11 : i64} {
  func.func @kernel(%arg0: i32, %arg1: i32, %arg2: memref<16x32xf32, #tpu.memory_space<vmem>>, %arg3: memref<1x32xf32, #tpu.memory_space<vmem>>, %arg4: memref<1x32xf32, #tpu.memory_space<vmem>>, %arg5: memref<32x96xbf16, #tpu.memory_space<vmem>>, %arg6: memref<16x96xbf16, #tpu.memory_space<vmem>>, %arg7: memref<16x32xbf16, #tpu.memory_space<vmem>>) attributes {dimension_semantics = [#tpu.dimension_semantics<parallel>, #tpu.dimension_semantics<arbitrary>], iteration_bounds = array<i64: 3, 1>, scalar_prefetch = 0 : i64, scratch_operands = 1 : i64, tpu.core_type = #tpu.core_type<tc>, window_params = [{transform_indices = @transform_0, window_bounds = array<i64: 16, 32>}, {pipeline_mode = #tpu.pipeline_mode<synchronous>, transform_indices = @transform_1, window_bounds = array<i64: 1, 32>}, {pipeline_mode = #tpu.pipeline_mode<synchronous>, transform_indices = @transform_2, window_bounds = array<i64: 1, 32>}, {transform_indices = @transform_3, window_bounds = array<i64: 32, 96>}, {transform_indices = @transform_4, window_bounds = array<i64: 16, 96>}]} {
    %c0_i32 = arith.constant 0 : i32
    %0 = arith.cmpi eq, %arg1, %c0_i32 : i32
    %1 = arith.extui %0 : i1 to i32
    %c0_i32_0 = arith.constant 0 : i32
    %2 = arith.cmpi ne, %1, %c0_i32_0 : i32
    scf.if %2 {
      %c0_6 = arith.constant 0 : index
      %c0_7 = arith.constant 0 : index
      %8 = vector.load %arg2[%c0_6, %c0_7] : memref<16x32xf32, #tpu.memory_space<vmem>>, vector<16x32xf32>
      %cst_8 = arith.constant dense<0.000000e+00> : vector<16xf32>
      %9 = vector.multi_reduction <add>, %8, %cst_8 [1] : vector<16x32xf32> to vector<16xf32>
      %10 = vector.shape_cast %9 : vector<16xf32> to vector<16x1xf32>
      %cst_9 = arith.constant 3.200000e+01 : f32
      %11 = vector.broadcast %cst_9 : f32 to vector<16x1xf32>
      %12 = arith.divf %10, %11 : vector<16x1xf32>
      %13 = vector.broadcast %12 : vector<16x1xf32> to vector<16x32xf32>
      %14 = arith.subf %8, %13 : vector<16x32xf32>
      %15 = arith.mulf %14, %14 : vector<16x32xf32>
      %cst_10 = arith.constant dense<0.000000e+00> : vector<16xf32>
      %16 = vector.multi_reduction <add>, %15, %cst_10 [1] : vector<16x32xf32> to vector<16xf32>
      %17 = vector.shape_cast %16 : vector<16xf32> to vector<16x1xf32>
      %cst_11 = arith.constant 3.200000e+01 : f32
      %18 = vector.broadcast %cst_11 : f32 to vector<16x1xf32>
      %19 = arith.divf %17, %18 : vector<16x1xf32>
      %cst_12 = arith.constant 9.99999974E-6 : f32
      %20 = vector.broadcast %cst_12 : f32 to vector<16x1xf32>
      %21 = arith.addf %19, %20 : vector<16x1xf32>
      %22 = math.rsqrt %21 : vector<16x1xf32>
      %23 = vector.broadcast %22 : vector<16x1xf32> to vector<16x32xf32>
      %24 = arith.mulf %14, %23 : vector<16x32xf32>
      %c0_13 = arith.constant 0 : index
      %c0_14 = arith.constant 0 : index
      %25 = vector.load %arg3[%c0_13, %c0_14] : memref<1x32xf32, #tpu.memory_space<vmem>>, vector<1x32xf32>
      %26 = vector.broadcast %25 : vector<1x32xf32> to vector<16x32xf32>
      %27 = arith.mulf %24, %26 : vector<16x32xf32>
      %c0_15 = arith.constant 0 : index
      %c0_16 = arith.constant 0 : index
      %28 = vector.load %arg4[%c0_15, %c0_16] : memref<1x32xf32, #tpu.memory_space<vmem>>, vector<1x32xf32>
      %29 = vector.broadcast %28 : vector<1x32xf32> to vector<16x32xf32>
      %30 = arith.addf %27, %29 : vector<16x32xf32>
      %31 = arith.truncf %30 : vector<16x32xf32> to vector<16x32xbf16>
      %c0_17 = arith.constant 0 : index
      %c0_18 = arith.constant 0 : index
      %32 = vector.load %arg7[%c0_17, %c0_18] : memref<16x32xbf16, #tpu.memory_space<vmem>>, vector<16x32xbf16>
      tpu.vector_store %arg7[%c0_17, %c0_18], %31 {strides = array<i32>} : memref<16x32xbf16, #tpu.memory_space<vmem>>, vector<16x32xbf16>,
    } else {
    }
    %c0 = arith.constant 0 : index
    %c0_1 = arith.constant 0 : index
    %3 = vector.load %arg7[%c0, %c0_1] : memref<16x32xbf16, #tpu.memory_space<vmem>>, vector<16x32xbf16>
    %c0_2 = arith.constant 0 : index
    %c0_3 = arith.constant 0 : index
    %4 = vector.load %arg5[%c0_2, %c0_3] : memref<32x96xbf16, #tpu.memory_space<vmem>>, vector<32x96xbf16>
    %cst = arith.constant dense<0.000000e+00> : vector<16x96xf32>
    %5 = tpu.matmul %3, %4, %cst {dimension_numbers = #tpu.dot_dimension_numbers<[1], [0], [0], [1], [0, 0, 1, 1], [], []>} : vector<16x32xbf16>, vector<32x96xbf16>, vector<16x96xf32> -> vector<16x96xf32>
    %6 = arith.truncf %5 : vector<16x96xf32> to vector<16x96xbf16>
    %c0_4 = arith.constant 0 : index
    %c0_5 = arith.constant 0 : index
    %7 = vector.load %arg6[%c0_4, %c0_5] : memref<16x96xbf16, #tpu.memory_space<vmem>>, vector<16x96xbf16>
    tpu.vector_store %arg6[%c0_4, %c0_5], %6 {strides = array<i32>} : memref<16x96xbf16, #tpu.memory_space<vmem>>, vector<16x96xbf16>,
    return
  }
  func.func @transform_0(%arg0: i32, %arg1: i32) -> (i32, i32) {
    %c0_i32 = arith.constant 0 : i32
    %c0_i32_0 = arith.constant 0 : i32
    return %arg0, %c0_i32 : i32, i32
  }
  func.func @transform_1(%arg0: i32, %arg1: i32) -> (i32, i32) {
    %c0_i32 = arith.constant 0 : i32
    %c0_i32_0 = arith.constant 0 : i32
    %c0_i32_1 = arith.constant 0 : i32
    return %c0_i32, %c0_i32_0 : i32, i32
  }
  func.func @transform_2(%arg0: i32, %arg1: i32) -> (i32, i32) {
    %c0_i32 = arith.constant 0 : i32
    %c0_i32_0 = arith.constant 0 : i32
    %c0_i32_1 = arith.constant 0 : i32
    return %c0_i32, %c0_i32_0 : i32, i32
  }
  func.func @transform_3(%arg0: i32, %arg1: i32) -> (i32, i32) {
    %c0_i32 = arith.constant 0 : i32
    %c0_i32_0 = arith.constant 0 : i32
    return %c0_i32, %arg1 : i32, i32
  }
  func.func @transform_4(%arg0: i32, %arg1: i32) -> (i32, i32) {
    %c0_i32 = arith.constant 0 : i32
    return %arg0, %arg1 : i32, i32
  }
}

module attributes {stable_mosaic.version = 11 : i64} {
  func.func @kernel(%arg0: i32, %arg1: i32, %arg2: i32, %arg3: memref<16x32xbf16, #tpu.memory_space<vmem>>, %arg4: memref<32x32xbf16, #tpu.memory_space<vmem>>, %arg5: memref<1x32xf32, #tpu.memory_space<vmem>>, %arg6: memref<16x32xf32, #tpu.memory_space<vmem>>, %arg7: memref<16x32xf32, #tpu.memory_space<vmem>>) attributes {dimension_semantics = [#tpu.dimension_semantics<parallel>, #tpu.dimension_semantics<parallel>, #tpu.dimension_semantics<arbitrary>], iteration_bounds = array<i64: 3, 1, 1>, scalar_prefetch = 0 : i64, scratch_operands = 0 : i64, tpu.core_type = #tpu.core_type<tc>, window_params = [{transform_indices = @transform_0, window_bounds = array<i64: 16, 32>}, {transform_indices = @transform_1, window_bounds = array<i64: 32, 32>}, {transform_indices = @transform_2, window_bounds = array<i64: 1, 32>}, {transform_indices = @transform_3, window_bounds = array<i64: 16, 32>}, {transform_indices = @transform_4, window_bounds = array<i64: 16, 32>}]} {
    %c0_i32 = arith.constant 0 : i32
    %0 = arith.cmpi eq, %arg2, %c0_i32 : i32
    %1 = arith.extui %0 : i1 to i32
    %c0_i32_0 = arith.constant 0 : i32
    %2 = arith.cmpi ne, %1, %c0_i32_0 : i32
    scf.if %2 {
      %cst_10 = arith.constant 0.000000e+00 : f32
      %12 = vector.broadcast %cst_10 : f32 to vector<16x32xf32>
      %c0_11 = arith.constant 0 : index
      %c0_12 = arith.constant 0 : index
      %13 = vector.load %arg7[%c0_11, %c0_12] : memref<16x32xf32, #tpu.memory_space<vmem>>, vector<16x32xf32>
      tpu.vector_store %arg7[%c0_11, %c0_12], %12 {strides = array<i32>} : memref<16x32xf32, #tpu.memory_space<vmem>>, vector<16x32xf32>,
    } else {
    }
    %c0 = arith.constant 0 : index
    %c0_1 = arith.constant 0 : index
    %3 = vector.load %arg7[%c0, %c0_1] : memref<16x32xf32, #tpu.memory_space<vmem>>, vector<16x32xf32>
    %c0_2 = arith.constant 0 : index
    %c0_3 = arith.constant 0 : index
    %4 = vector.load %arg3[%c0_2, %c0_3] : memref<16x32xbf16, #tpu.memory_space<vmem>>, vector<16x32xbf16>
    %c0_4 = arith.constant 0 : index
    %c0_5 = arith.constant 0 : index
    %5 = vector.load %arg4[%c0_4, %c0_5] : memref<32x32xbf16, #tpu.memory_space<vmem>>, vector<32x32xbf16>
    %cst = arith.constant dense<0.000000e+00> : vector<16x32xf32>
    %6 = tpu.matmul %4, %5, %cst {dimension_numbers = #tpu.dot_dimension_numbers<[1], [0], [0], [1], [0, 0, 1, 1], [], []>} : vector<16x32xbf16>, vector<32x32xbf16>, vector<16x32xf32> -> vector<16x32xf32>
    %7 = arith.addf %3, %6 : vector<16x32xf32>
    %c0_6 = arith.constant 0 : index
    %c0_7 = arith.constant 0 : index
    %8 = vector.load %arg7[%c0_6, %c0_7] : memref<16x32xf32, #tpu.memory_space<vmem>>, vector<16x32xf32>
    tpu.vector_store %arg7[%c0_6, %c0_7], %7 {strides = array<i32>} : memref<16x32xf32, #tpu.memory_space<vmem>>, vector<16x32xf32>,
    %c0_i32_8 = arith.constant 0 : i32
    %9 = arith.cmpi eq, %arg2, %c0_i32_8 : i32
    %10 = arith.extui %9 : i1 to i32
    %c0_i32_9 = arith.constant 0 : i32
    %11 = arith.cmpi ne, %10, %c0_i32_9 : i32
    scf.if %11 {
      %c0_10 = arith.constant 0 : index
      %c0_11 = arith.constant 0 : index
      %12 = vector.load %arg7[%c0_10, %c0_11] : memref<16x32xf32, #tpu.memory_space<vmem>>, vector<16x32xf32>
      %c0_12 = arith.constant 0 : index
      %c0_13 = arith.constant 0 : index
      %13 = vector.load %arg5[%c0_12, %c0_13] : memref<1x32xf32, #tpu.memory_space<vmem>>, vector<1x32xf32>
      %14 = vector.broadcast %13 : vector<1x32xf32> to vector<16x32xf32>
      %15 = arith.addf %12, %14 : vector<16x32xf32>
      %c0_14 = arith.constant 0 : index
      %c0_15 = arith.constant 0 : index
      %16 = vector.load %arg6[%c0_14, %c0_15] : memref<16x32xf32, #tpu.memory_space<vmem>>, vector<16x32xf32>
      %17 = arith.addf %15, %16 : vector<16x32xf32>
      %c0_16 = arith.constant 0 : index
      %c0_17 = arith.constant 0 : index
      %18 = vector.load %arg7[%c0_16, %c0_17] : memref<16x32xf32, #tpu.memory_space<vmem>>, vector<16x32xf32>
      tpu.vector_store %arg7[%c0_16, %c0_17], %17 {strides = array<i32>} : memref<16x32xf32, #tpu.memory_space<vmem>>, vector<16x32xf32>,
    } else {
    }
    return
  }
  func.func @transform_0(%arg0: i32, %arg1: i32, %arg2: i32) -> (i32, i32) {
    %c0_i32 = arith.constant 0 : i32
    return %arg0, %arg2 : i32, i32
  }
  func.func @transform_1(%arg0: i32, %arg1: i32, %arg2: i32) -> (i32, i32) {
    %c0_i32 = arith.constant 0 : i32
    return %arg2, %arg1 : i32, i32
  }
  func.func @transform_2(%arg0: i32, %arg1: i32, %arg2: i32) -> (i32, i32) {
    %c0_i32 = arith.constant 0 : i32
    %c0_i32_0 = arith.constant 0 : i32
    return %c0_i32, %arg1 : i32, i32
  }
  func.func @transform_3(%arg0: i32, %arg1: i32, %arg2: i32) -> (i32, i32) {
    %c0_i32 = arith.constant 0 : i32
    return %arg0, %arg1 : i32, i32
  }
  func.func @transform_4(%arg0: i32, %arg1: i32, %arg2: i32) -> (i32, i32) {
    %c0_i32 = arith.constant 0 : i32
    return %arg0, %arg1 : i32, i32
  }
}

module attributes {stable_mosaic.version = 11 : i64} {
  func.func @kernel(%arg0: i32, %arg1: i32, %arg2: memref<1x8x96xbf16, #tpu.memory_space<vmem>>, %arg3: memref<1x8x96xbf16, #tpu.memory_space<vmem>>, %arg4: memref<1x8x32xbf16, #tpu.memory_space<vmem>>, %arg5: memref<8x1xf32, #tpu.memory_space<vmem>>, %arg6: memref<8x1xf32, #tpu.memory_space<vmem>>, %arg7: memref<8x8xf32, #tpu.memory_space<vmem>>) attributes {dimension_semantics = [#tpu.dimension_semantics<parallel>, #tpu.dimension_semantics<parallel>], iteration_bounds = array<i64: 6, 1>, scalar_prefetch = 0 : i64, scratch_operands = 3 : i64, tpu.core_type = #tpu.core_type<tc>, window_params = [{transform_indices = @transform_0, window_bounds = array<i64: 1, 8, 96>}, {transform_indices = @transform_1, window_bounds = array<i64: 1, 8, 96>}, {transform_indices = @transform_2, window_bounds = array<i64: 1, 8, 32>}]} {
    %c1_i32 = arith.constant 1 : i32
    %0 = arith.addi %arg1, %c1_i32 : i32
    %c8_i32 = arith.constant 8 : i32
    %1 = arith.muli %arg1, %c8_i32 : i32
    %2 = tpu.iota {dimensions = array<i32: 0>} : vector<8x8xi32>
    %3 = vector.broadcast %1 : i32 to vector<8x8xi32>
    %4 = arith.addi %3, %2 : vector<8x8xi32>
    %5 = tpu.iota {dimensions = array<i32: 1>} : vector<8x8xi32>
    %c0 = arith.constant 0 : index
    %c0_0 = arith.constant 0 : index
    %c0_1 = arith.constant 0 : index
    %6 = vector.load %arg2[%c0, %c0_0, %c0_1] : memref<1x8x96xbf16, #tpu.memory_space<vmem>>, vector<1x8x8xbf16>
    %7 = vector.shape_cast %6 : vector<1x8x8xbf16> to vector<8x8xbf16>
    %cst = arith.constant -1.000000e+30 : f32
    %8 = vector.broadcast %cst : f32 to vector<8x1xf32>
    %c0_2 = arith.constant 0 : index
    %c0_3 = arith.constant 0 : index
    %9 = vector.load %arg5[%c0_2, %c0_3] : memref<8x1xf32, #tpu.memory_space<vmem>>, vector<8x1xf32>
    tpu.vector_store %arg5[%c0_2, %c0_3], %8 {strides = array<i32>} : memref<8x1xf32, #tpu.memory_space<vmem>>, vector<8x1xf32>,
    %cst_4 = arith.constant 0.000000e+00 : f32
    %10 = vector.broadcast %cst_4 : f32 to vector<8x1xf32>
    %c0_5 = arith.constant 0 : index
    %c0_6 = arith.constant 0 : index
    %11 = vector.load %arg6[%c0_5, %c0_6] : memref<8x1xf32, #tpu.memory_space<vmem>>, vector<8x1xf32>
    tpu.vector_store %arg6[%c0_5, %c0_6], %10 {strides = array<i32>} : memref<8x1xf32, #tpu.memory_space<vmem>>, vector<8x1xf32>,
    %cst_7 = arith.constant 0.000000e+00 : f32
    %12 = vector.broadcast %cst_7 : f32 to vector<8x8xf32>
    %c0_8 = arith.constant 0 : index
    %c0_9 = arith.constant 0 : index
    %13 = vector.load %arg7[%c0_8, %c0_9] : memref<8x8xf32, #tpu.memory_space<vmem>>, vector<8x8xf32>
    tpu.vector_store %arg7[%c0_8, %c0_9], %12 {strides = array<i32>} : memref<8x8xf32, #tpu.memory_space<vmem>>, vector<8x8xf32>,
    %c0_i32 = arith.constant 0 : i32
    %c0_i32_10 = arith.constant 0 : i32
    %14 = arith.subi %0, %c0_i32_10 : i32
    %15 = arith.addi %c0_i32_10, %14 : i32
    %c1_i32_11 = arith.constant 1 : i32
    scf.for %arg8 = %c0_i32_10 to %15 step %c1_i32_11  : i32 {
      %c8_i32_82 = arith.constant 8 : i32
      %82 = arith.muli %arg8, %c8_i32_82 : i32
      %83 = tpu.assume_multiple %82, 8 : i32
      %c0_83 = arith.constant 0 : index
      %84 = arith.index_cast %83 : i32 to index
      %c32 = arith.constant 32 : index
      %85 = vector.load %arg3[%c0_83, %84, %c32] : memref<1x8x96xbf16, #tpu.memory_space<vmem>>, vector<1x8x8xbf16>
      %86 = vector.shape_cast %85 : vector<1x8x8xbf16> to vector<8x8xbf16>
      %c0_84 = arith.constant 0 : index
      %87 = arith.index_cast %83 : i32 to index
      %c64 = arith.constant 64 : index
      %88 = vector.load %arg3[%c0_84, %87, %c64] : memref<1x8x96xbf16, #tpu.memory_space<vmem>>, vector<1x8x8xbf16>
      %89 = vector.shape_cast %88 : vector<1x8x8xbf16> to vector<8x8xbf16>
      %cst_85 = arith.constant dense<0.000000e+00> : vector<8x8xf32>
      %90 = tpu.matmul %7, %86, %cst_85 {dimension_numbers = #tpu.dot_dimension_numbers<[1], [1], [0], [0], [0, 0, 1, 0], [], []>} : vector<8x8xbf16>, vector<8x8xbf16>, vector<8x8xf32> -> vector<8x8xf32>
      %c8_i32_86 = arith.constant 8 : i32
      %91 = arith.muli %arg8, %c8_i32_86 : i32
      %92 = vector.broadcast %91 : i32 to vector<8x8xi32>
      %93 = arith.addi %92, %5 : vector<8x8xi32>
      %94 = arith.cmpi sge, %4, %93 : vector<8x8xi32>
      %cst_87 = arith.constant -1.000000e+30 : f32
      %95 = vector.broadcast %cst_87 : f32 to vector<8x8xf32>
      %96 = arith.select %94, %90, %95 : vector<8x8xi1>, vector<8x8xf32>
      %c0_88 = arith.constant 0 : index
      %c0_89 = arith.constant 0 : index
      %97 = vector.load %arg5[%c0_88, %c0_89] : memref<8x1xf32, #tpu.memory_space<vmem>>, vector<8x1xf32>
      %cst_90 = arith.constant dense<0xFF800000> : vector<8xf32>
      %98 = vector.multi_reduction <maximumf>, %96, %cst_90 [1] : vector<8x8xf32> to vector<8xf32>
      %99 = vector.shape_cast %98 : vector<8xf32> to vector<8x1xf32>
      %100 = arith.maximumf %97, %99 : vector<8x1xf32>
      %101 = arith.subf %97, %100 : vector<8x1xf32>
      %102 = math.exp %101 : vector<8x1xf32>
      %103 = vector.broadcast %100 : vector<8x1xf32> to vector<8x8xf32>
      %104 = arith.subf %96, %103 : vector<8x8xf32>
      %105 = math.exp %104 : vector<8x8xf32>
      %c0_91 = arith.constant 0 : index
      %c0_92 = arith.constant 0 : index
      %106 = vector.load %arg6[%c0_91, %c0_92] : memref<8x1xf32, #tpu.memory_space<vmem>>, vector<8x1xf32>
      %107 = arith.mulf %102, %106 : vector<8x1xf32>
      %cst_93 = arith.constant dense<0.000000e+00> : vector<8xf32>
      %108 = vector.multi_reduction <add>, %105, %cst_93 [1] : vector<8x8xf32> to vector<8xf32>
      %109 = vector.shape_cast %108 : vector<8xf32> to vector<8x1xf32>
      %110 = arith.addf %107, %109 : vector<8x1xf32>
      %c0_94 = arith.constant 0 : index
      %c0_95 = arith.constant 0 : index
      %111 = vector.load %arg6[%c0_94, %c0_95] : memref<8x1xf32, #tpu.memory_space<vmem>>, vector<8x1xf32>
      tpu.vector_store %arg6[%c0_94, %c0_95], %110 {strides = array<i32>} : memref<8x1xf32, #tpu.memory_space<vmem>>, vector<8x1xf32>,
      %c0_96 = arith.constant 0 : index
      %c0_97 = arith.constant 0 : index
      %112 = vector.load %arg7[%c0_96, %c0_97] : memref<8x8xf32, #tpu.memory_space<vmem>>, vector<8x8xf32>
      %113 = vector.broadcast %102 : vector<8x1xf32> to vector<8x8xf32>
      %114 = arith.mulf %113, %112 : vector<8x8xf32>
      %115 = arith.truncf %105 : vector<8x8xf32> to vector<8x8xbf16>
      %cst_98 = arith.constant dense<0.000000e+00> : vector<8x8xf32>
      %116 = tpu.matmul %115, %89, %cst_98 {dimension_numbers = #tpu.dot_dimension_numbers<[1], [0], [0], [1], [0, 0, 1, 1], [], []>} : vector<8x8xbf16>, vector<8x8xbf16>, vector<8x8xf32> -> vector<8x8xf32>
      %117 = arith.addf %114, %116 : vector<8x8xf32>
      %c0_99 = arith.constant 0 : index
      %c0_100 = arith.constant 0 : index
      %118 = vector.load %arg7[%c0_99, %c0_100] : memref<8x8xf32, #tpu.memory_space<vmem>>, vector<8x8xf32>
      tpu.vector_store %arg7[%c0_99, %c0_100], %117 {strides = array<i32>} : memref<8x8xf32, #tpu.memory_space<vmem>>, vector<8x8xf32>,
      %c0_101 = arith.constant 0 : index
      %c0_102 = arith.constant 0 : index
      %119 = vector.load %arg5[%c0_101, %c0_102] : memref<8x1xf32, #tpu.memory_space<vmem>>, vector<8x1xf32>
      tpu.vector_store %arg5[%c0_101, %c0_102], %100 {strides = array<i32>} : memref<8x1xf32, #tpu.memory_space<vmem>>, vector<8x1xf32>,
    }
    %c0_12 = arith.constant 0 : index
    %c0_13 = arith.constant 0 : index
    %16 = vector.load %arg7[%c0_12, %c0_13] : memref<8x8xf32, #tpu.memory_space<vmem>>, vector<8x8xf32>
    %c0_14 = arith.constant 0 : index
    %c0_15 = arith.constant 0 : index
    %17 = vector.load %arg6[%c0_14, %c0_15] : memref<8x1xf32, #tpu.memory_space<vmem>>, vector<8x1xf32>
    %18 = tpu.reciprocal %17 {approx = true} : vector<8x1xf32> -> vector<8x1xf32>
    %19 = vector.broadcast %18 : vector<8x1xf32> to vector<8x8xf32>
    %20 = arith.mulf %16, %19 : vector<8x8xf32>
    %21 = arith.truncf %20 : vector<8x8xf32> to vector<8x8xbf16>
    %c0_16 = arith.constant 0 : index
    %c0_17 = arith.constant 0 : index
    %c0_18 = arith.constant 0 : index
    %22 = vector.load %arg4[%c0_16, %c0_17, %c0_18] : memref<1x8x32xbf16, #tpu.memory_space<vmem>>, vector<1x8x8xbf16>
    %23 = vector.shape_cast %22 : vector<1x8x8xbf16> to vector<8x8xbf16>
    %24 = vector.shape_cast %21 : vector<8x8xbf16> to vector<1x8x8xbf16>
    tpu.vector_store %arg4[%c0_16, %c0_17, %c0_18], %24 {strides = array<i32>} : memref<1x8x32xbf16, #tpu.memory_space<vmem>>, vector<1x8x8xbf16>,
    %c0_19 = arith.constant 0 : index
    %c0_20 = arith.constant 0 : index
    %c8 = arith.constant 8 : index
    %25 = vector.load %arg2[%c0_19, %c0_20, %c8] : memref<1x8x96xbf16, #tpu.memory_space<vmem>>, vector<1x8x8xbf16>
    %26 = vector.shape_cast %25 : vector<1x8x8xbf16> to vector<8x8xbf16>
    %cst_21 = arith.constant -1.000000e+30 : f32
    %27 = vector.broadcast %cst_21 : f32 to vector<8x1xf32>
    %c0_22 = arith.constant 0 : index
    %c0_23 = arith.constant 0 : index
    %28 = vector.load %arg5[%c0_22, %c0_23] : memref<8x1xf32, #tpu.memory_space<vmem>>, vector<8x1xf32>
    tpu.vector_store %arg5[%c0_22, %c0_23], %27 {strides = array<i32>} : memref<8x1xf32, #tpu.memory_space<vmem>>, vector<8x1xf32>,
    %cst_24 = arith.constant 0.000000e+00 : f32
    %29 = vector.broadcast %cst_24 : f32 to vector<8x1xf32>
    %c0_25 = arith.constant 0 : index
    %c0_26 = arith.constant 0 : index
    %30 = vector.load %arg6[%c0_25, %c0_26] : memref<8x1xf32, #tpu.memory_space<vmem>>, vector<8x1xf32>
    tpu.vector_store %arg6[%c0_25, %c0_26], %29 {strides = array<i32>} : memref<8x1xf32, #tpu.memory_space<vmem>>, vector<8x1xf32>,
    %cst_27 = arith.constant 0.000000e+00 : f32
    %31 = vector.broadcast %cst_27 : f32 to vector<8x8xf32>
    %c0_28 = arith.constant 0 : index
    %c0_29 = arith.constant 0 : index
    %32 = vector.load %arg7[%c0_28, %c0_29] : memref<8x8xf32, #tpu.memory_space<vmem>>, vector<8x8xf32>
    tpu.vector_store %arg7[%c0_28, %c0_29], %31 {strides = array<i32>} : memref<8x8xf32, #tpu.memory_space<vmem>>, vector<8x8xf32>,
    %c0_i32_30 = arith.constant 0 : i32
    %c0_i32_31 = arith.constant 0 : i32
    %33 = arith.subi %0, %c0_i32_31 : i32
    %34 = arith.addi %c0_i32_31, %33 : i32
    %c1_i32_32 = arith.constant 1 : i32
    scf.for %arg8 = %c0_i32_31 to %34 step %c1_i32_32  : i32 {
      %c8_i32_82 = arith.constant 8 : i32
      %82 = arith.muli %arg8, %c8_i32_82 : i32
      %83 = tpu.assume_multiple %82, 8 : i32
      %c0_83 = arith.constant 0 : index
      %84 = arith.index_cast %83 : i32 to index
      %c40 = arith.constant 40 : index
      %85 = vector.load %arg3[%c0_83, %84, %c40] : memref<1x8x96xbf16, #tpu.memory_space<vmem>>, vector<1x8x8xbf16>
      %86 = vector.shape_cast %85 : vector<1x8x8xbf16> to vector<8x8xbf16>
      %c0_84 = arith.constant 0 : index
      %87 = arith.index_cast %83 : i32 to index
      %c72 = arith.constant 72 : index
      %88 = vector.load %arg3[%c0_84, %87, %c72] : memref<1x8x96xbf16, #tpu.memory_space<vmem>>, vector<1x8x8xbf16>
      %89 = vector.shape_cast %88 : vector<1x8x8xbf16> to vector<8x8xbf16>
      %cst_85 = arith.constant dense<0.000000e+00> : vector<8x8xf32>
      %90 = tpu.matmul %26, %86, %cst_85 {dimension_numbers = #tpu.dot_dimension_numbers<[1], [1], [0], [0], [0, 0, 1, 0], [], []>} : vector<8x8xbf16>, vector<8x8xbf16>, vector<8x8xf32> -> vector<8x8xf32>
      %c8_i32_86 = arith.constant 8 : i32
      %91 = arith.muli %arg8, %c8_i32_86 : i32
      %92 = vector.broadcast %91 : i32 to vector<8x8xi32>
      %93 = arith.addi %92, %5 : vector<8x8xi32>
      %94 = arith.cmpi sge, %4, %93 : vector<8x8xi32>
      %cst_87 = arith.constant -1.000000e+30 : f32
      %95 = vector.broadcast %cst_87 : f32 to vector<8x8xf32>
      %96 = arith.select %94, %90, %95 : vector<8x8xi1>, vector<8x8xf32>
      %c0_88 = arith.constant 0 : index
      %c0_89 = arith.constant 0 : index
      %97 = vector.load %arg5[%c0_88, %c0_89] : memref<8x1xf32, #tpu.memory_space<vmem>>, vector<8x1xf32>
      %cst_90 = arith.constant dense<0xFF800000> : vector<8xf32>
      %98 = vector.multi_reduction <maximumf>, %96, %cst_90 [1] : vector<8x8xf32> to vector<8xf32>
      %99 = vector.shape_cast %98 : vector<8xf32> to vector<8x1xf32>
      %100 = arith.maximumf %97, %99 : vector<8x1xf32>
      %101 = arith.subf %97, %100 : vector<8x1xf32>
      %102 = math.exp %101 : vector<8x1xf32>
      %103 = vector.broadcast %100 : vector<8x1xf32> to vector<8x8xf32>
      %104 = arith.subf %96, %103 : vector<8x8xf32>
      %105 = math.exp %104 : vector<8x8xf32>
      %c0_91 = arith.constant 0 : index
      %c0_92 = arith.constant 0 : index
      %106 = vector.load %arg6[%c0_91, %c0_92] : memref<8x1xf32, #tpu.memory_space<vmem>>, vector<8x1xf32>
      %107 = arith.mulf %102, %106 : vector<8x1xf32>
      %cst_93 = arith.constant dense<0.000000e+00> : vector<8xf32>
      %108 = vector.multi_reduction <add>, %105, %cst_93 [1] : vector<8x8xf32> to vector<8xf32>
      %109 = vector.shape_cast %108 : vector<8xf32> to vector<8x1xf32>
      %110 = arith.addf %107, %109 : vector<8x1xf32>
      %c0_94 = arith.constant 0 : index
      %c0_95 = arith.constant 0 : index
      %111 = vector.load %arg6[%c0_94, %c0_95] : memref<8x1xf32, #tpu.memory_space<vmem>>, vector<8x1xf32>
      tpu.vector_store %arg6[%c0_94, %c0_95], %110 {strides = array<i32>} : memref<8x1xf32, #tpu.memory_space<vmem>>, vector<8x1xf32>,
      %c0_96 = arith.constant 0 : index
      %c0_97 = arith.constant 0 : index
      %112 = vector.load %arg7[%c0_96, %c0_97] : memref<8x8xf32, #tpu.memory_space<vmem>>, vector<8x8xf32>
      %113 = vector.broadcast %102 : vector<8x1xf32> to vector<8x8xf32>
      %114 = arith.mulf %113, %112 : vector<8x8xf32>
      %115 = arith.truncf %105 : vector<8x8xf32> to vector<8x8xbf16>
      %cst_98 = arith.constant dense<0.000000e+00> : vector<8x8xf32>
      %116 = tpu.matmul %115, %89, %cst_98 {dimension_numbers = #tpu.dot_dimension_numbers<[1], [0], [0], [1], [0, 0, 1, 1], [], []>} : vector<8x8xbf16>, vector<8x8xbf16>, vector<8x8xf32> -> vector<8x8xf32>
      %117 = arith.addf %114, %116 : vector<8x8xf32>
      %c0_99 = arith.constant 0 : index
      %c0_100 = arith.constant 0 : index
      %118 = vector.load %arg7[%c0_99, %c0_100] : memref<8x8xf32, #tpu.memory_space<vmem>>, vector<8x8xf32>
      tpu.vector_store %arg7[%c0_99, %c0_100], %117 {strides = array<i32>} : memref<8x8xf32, #tpu.memory_space<vmem>>, vector<8x8xf32>,
      %c0_101 = arith.constant 0 : index
      %c0_102 = arith.constant 0 : index
      %119 = vector.load %arg5[%c0_101, %c0_102] : memref<8x1xf32, #tpu.memory_space<vmem>>, vector<8x1xf32>
      tpu.vector_store %arg5[%c0_101, %c0_102], %100 {strides = array<i32>} : memref<8x1xf32, #tpu.memory_space<vmem>>, vector<8x1xf32>,
    }
    %c0_33 = arith.constant 0 : index
    %c0_34 = arith.constant 0 : index
    %35 = vector.load %arg7[%c0_33, %c0_34] : memref<8x8xf32, #tpu.memory_space<vmem>>, vector<8x8xf32>
    %c0_35 = arith.constant 0 : index
    %c0_36 = arith.constant 0 : index
    %36 = vector.load %arg6[%c0_35, %c0_36] : memref<8x1xf32, #tpu.memory_space<vmem>>, vector<8x1xf32>
    %37 = tpu.reciprocal %36 {approx = true} : vector<8x1xf32> -> vector<8x1xf32>
    %38 = vector.broadcast %37 : vector<8x1xf32> to vector<8x8xf32>
    %39 = arith.mulf %35, %38 : vector<8x8xf32>
    %40 = arith.truncf %39 : vector<8x8xf32> to vector<8x8xbf16>
    %c0_37 = arith.constant 0 : index
    %c0_38 = arith.constant 0 : index
    %c8_39 = arith.constant 8 : index
    %41 = vector.load %arg4[%c0_37, %c0_38, %c8_39] : memref<1x8x32xbf16, #tpu.memory_space<vmem>>, vector<1x8x8xbf16>
    %42 = vector.shape_cast %41 : vector<1x8x8xbf16> to vector<8x8xbf16>
    %43 = vector.shape_cast %40 : vector<8x8xbf16> to vector<1x8x8xbf16>
    tpu.vector_store %arg4[%c0_37, %c0_38, %c8_39], %43 {strides = array<i32>} : memref<1x8x32xbf16, #tpu.memory_space<vmem>>, vector<1x8x8xbf16>,
    %c0_40 = arith.constant 0 : index
    %c0_41 = arith.constant 0 : index
    %c16 = arith.constant 16 : index
    %44 = vector.load %arg2[%c0_40, %c0_41, %c16] : memref<1x8x96xbf16, #tpu.memory_space<vmem>>, vector<1x8x8xbf16>
    %45 = vector.shape_cast %44 : vector<1x8x8xbf16> to vector<8x8xbf16>
    %cst_42 = arith.constant -1.000000e+30 : f32
    %46 = vector.broadcast %cst_42 : f32 to vector<8x1xf32>
    %c0_43 = arith.constant 0 : index
    %c0_44 = arith.constant 0 : index
    %47 = vector.load %arg5[%c0_43, %c0_44] : memref<8x1xf32, #tpu.memory_space<vmem>>, vector<8x1xf32>
    tpu.vector_store %arg5[%c0_43, %c0_44], %46 {strides = array<i32>} : memref<8x1xf32, #tpu.memory_space<vmem>>, vector<8x1xf32>,
    %cst_45 = arith.constant 0.000000e+00 : f32
    %48 = vector.broadcast %cst_45 : f32 to vector<8x1xf32>
    %c0_46 = arith.constant 0 : index
    %c0_47 = arith.constant 0 : index
    %49 = vector.load %arg6[%c0_46, %c0_47] : memref<8x1xf32, #tpu.memory_space<vmem>>, vector<8x1xf32>
    tpu.vector_store %arg6[%c0_46, %c0_47], %48 {strides = array<i32>} : memref<8x1xf32, #tpu.memory_space<vmem>>, vector<8x1xf32>,
    %cst_48 = arith.constant 0.000000e+00 : f32
    %50 = vector.broadcast %cst_48 : f32 to vector<8x8xf32>
    %c0_49 = arith.constant 0 : index
    %c0_50 = arith.constant 0 : index
    %51 = vector.load %arg7[%c0_49, %c0_50] : memref<8x8xf32, #tpu.memory_space<vmem>>, vector<8x8xf32>
    tpu.vector_store %arg7[%c0_49, %c0_50], %50 {strides = array<i32>} : memref<8x8xf32, #tpu.memory_space<vmem>>, vector<8x8xf32>,
    %c0_i32_51 = arith.constant 0 : i32
    %c0_i32_52 = arith.constant 0 : i32
    %52 = arith.subi %0, %c0_i32_52 : i32
    %53 = arith.addi %c0_i32_52, %52 : i32
    %c1_i32_53 = arith.constant 1 : i32
    scf.for %arg8 = %c0_i32_52 to %53 step %c1_i32_53  : i32 {
      %c8_i32_82 = arith.constant 8 : i32
      %82 = arith.muli %arg8, %c8_i32_82 : i32
      %83 = tpu.assume_multiple %82, 8 : i32
      %c0_83 = arith.constant 0 : index
      %84 = arith.index_cast %83 : i32 to index
      %c48 = arith.constant 48 : index
      %85 = vector.load %arg3[%c0_83, %84, %c48] : memref<1x8x96xbf16, #tpu.memory_space<vmem>>, vector<1x8x8xbf16>
      %86 = vector.shape_cast %85 : vector<1x8x8xbf16> to vector<8x8xbf16>
      %c0_84 = arith.constant 0 : index
      %87 = arith.index_cast %83 : i32 to index
      %c80 = arith.constant 80 : index
      %88 = vector.load %arg3[%c0_84, %87, %c80] : memref<1x8x96xbf16, #tpu.memory_space<vmem>>, vector<1x8x8xbf16>
      %89 = vector.shape_cast %88 : vector<1x8x8xbf16> to vector<8x8xbf16>
      %cst_85 = arith.constant dense<0.000000e+00> : vector<8x8xf32>
      %90 = tpu.matmul %45, %86, %cst_85 {dimension_numbers = #tpu.dot_dimension_numbers<[1], [1], [0], [0], [0, 0, 1, 0], [], []>} : vector<8x8xbf16>, vector<8x8xbf16>, vector<8x8xf32> -> vector<8x8xf32>
      %c8_i32_86 = arith.constant 8 : i32
      %91 = arith.muli %arg8, %c8_i32_86 : i32
      %92 = vector.broadcast %91 : i32 to vector<8x8xi32>
      %93 = arith.addi %92, %5 : vector<8x8xi32>
      %94 = arith.cmpi sge, %4, %93 : vector<8x8xi32>
      %cst_87 = arith.constant -1.000000e+30 : f32
      %95 = vector.broadcast %cst_87 : f32 to vector<8x8xf32>
      %96 = arith.select %94, %90, %95 : vector<8x8xi1>, vector<8x8xf32>
      %c0_88 = arith.constant 0 : index
      %c0_89 = arith.constant 0 : index
      %97 = vector.load %arg5[%c0_88, %c0_89] : memref<8x1xf32, #tpu.memory_space<vmem>>, vector<8x1xf32>
      %cst_90 = arith.constant dense<0xFF800000> : vector<8xf32>
      %98 = vector.multi_reduction <maximumf>, %96, %cst_90 [1] : vector<8x8xf32> to vector<8xf32>
      %99 = vector.shape_cast %98 : vector<8xf32> to vector<8x1xf32>
      %100 = arith.maximumf %97, %99 : vector<8x1xf32>
      %101 = arith.subf %97, %100 : vector<8x1xf32>
      %102 = math.exp %101 : vector<8x1xf32>
      %103 = vector.broadcast %100 : vector<8x1xf32> to vector<8x8xf32>
      %104 = arith.subf %96, %103 : vector<8x8xf32>
      %105 = math.exp %104 : vector<8x8xf32>
      %c0_91 = arith.constant 0 : index
      %c0_92 = arith.constant 0 : index
      %106 = vector.load %arg6[%c0_91, %c0_92] : memref<8x1xf32, #tpu.memory_space<vmem>>, vector<8x1xf32>
      %107 = arith.mulf %102, %106 : vector<8x1xf32>
      %cst_93 = arith.constant dense<0.000000e+00> : vector<8xf32>
      %108 = vector.multi_reduction <add>, %105, %cst_93 [1] : vector<8x8xf32> to vector<8xf32>
      %109 = vector.shape_cast %108 : vector<8xf32> to vector<8x1xf32>
      %110 = arith.addf %107, %109 : vector<8x1xf32>
      %c0_94 = arith.constant 0 : index
      %c0_95 = arith.constant 0 : index
      %111 = vector.load %arg6[%c0_94, %c0_95] : memref<8x1xf32, #tpu.memory_space<vmem>>, vector<8x1xf32>
      tpu.vector_store %arg6[%c0_94, %c0_95], %110 {strides = array<i32>} : memref<8x1xf32, #tpu.memory_space<vmem>>, vector<8x1xf32>,
      %c0_96 = arith.constant 0 : index
      %c0_97 = arith.constant 0 : index
      %112 = vector.load %arg7[%c0_96, %c0_97] : memref<8x8xf32, #tpu.memory_space<vmem>>, vector<8x8xf32>
      %113 = vector.broadcast %102 : vector<8x1xf32> to vector<8x8xf32>
      %114 = arith.mulf %113, %112 : vector<8x8xf32>
      %115 = arith.truncf %105 : vector<8x8xf32> to vector<8x8xbf16>
      %cst_98 = arith.constant dense<0.000000e+00> : vector<8x8xf32>
      %116 = tpu.matmul %115, %89, %cst_98 {dimension_numbers = #tpu.dot_dimension_numbers<[1], [0], [0], [1], [0, 0, 1, 1], [], []>} : vector<8x8xbf16>, vector<8x8xbf16>, vector<8x8xf32> -> vector<8x8xf32>
      %117 = arith.addf %114, %116 : vector<8x8xf32>
      %c0_99 = arith.constant 0 : index
      %c0_100 = arith.constant 0 : index
      %118 = vector.load %arg7[%c0_99, %c0_100] : memref<8x8xf32, #tpu.memory_space<vmem>>, vector<8x8xf32>
      tpu.vector_store %arg7[%c0_99, %c0_100], %117 {strides = array<i32>} : memref<8x8xf32, #tpu.memory_space<vmem>>, vector<8x8xf32>,
      %c0_101 = arith.constant 0 : index
      %c0_102 = arith.constant 0 : index
      %119 = vector.load %arg5[%c0_101, %c0_102] : memref<8x1xf32, #tpu.memory_space<vmem>>, vector<8x1xf32>
      tpu.vector_store %arg5[%c0_101, %c0_102], %100 {strides = array<i32>} : memref<8x1xf32, #tpu.memory_space<vmem>>, vector<8x1xf32>,
    }
    %c0_54 = arith.constant 0 : index
    %c0_55 = arith.constant 0 : index
    %54 = vector.load %arg7[%c0_54, %c0_55] : memref<8x8xf32, #tpu.memory_space<vmem>>, vector<8x8xf32>
    %c0_56 = arith.constant 0 : index
    %c0_57 = arith.constant 0 : index
    %55 = vector.load %arg6[%c0_56, %c0_57] : memref<8x1xf32, #tpu.memory_space<vmem>>, vector<8x1xf32>
    %56 = tpu.reciprocal %55 {approx = true} : vector<8x1xf32> -> vector<8x1xf32>
    %57 = vector.broadcast %56 : vector<8x1xf32> to vector<8x8xf32>
    %58 = arith.mulf %54, %57 : vector<8x8xf32>
    %59 = arith.truncf %58 : vector<8x8xf32> to vector<8x8xbf16>
    %c0_58 = arith.constant 0 : index
    %c0_59 = arith.constant 0 : index
    %c16_60 = arith.constant 16 : index
    %60 = vector.load %arg4[%c0_58, %c0_59, %c16_60] : memref<1x8x32xbf16, #tpu.memory_space<vmem>>, vector<1x8x8xbf16>
    %61 = vector.shape_cast %60 : vector<1x8x8xbf16> to vector<8x8xbf16>
    %62 = vector.shape_cast %59 : vector<8x8xbf16> to vector<1x8x8xbf16>
    tpu.vector_store %arg4[%c0_58, %c0_59, %c16_60], %62 {strides = array<i32>} : memref<1x8x32xbf16, #tpu.memory_space<vmem>>, vector<1x8x8xbf16>,
    %c0_61 = arith.constant 0 : index
    %c0_62 = arith.constant 0 : index
    %c24 = arith.constant 24 : index
    %63 = vector.load %arg2[%c0_61, %c0_62, %c24] : memref<1x8x96xbf16, #tpu.memory_space<vmem>>, vector<1x8x8xbf16>
    %64 = vector.shape_cast %63 : vector<1x8x8xbf16> to vector<8x8xbf16>
    %cst_63 = arith.constant -1.000000e+30 : f32
    %65 = vector.broadcast %cst_63 : f32 to vector<8x1xf32>
    %c0_64 = arith.constant 0 : index
    %c0_65 = arith.constant 0 : index
    %66 = vector.load %arg5[%c0_64, %c0_65] : memref<8x1xf32, #tpu.memory_space<vmem>>, vector<8x1xf32>
    tpu.vector_store %arg5[%c0_64, %c0_65], %65 {strides = array<i32>} : memref<8x1xf32, #tpu.memory_space<vmem>>, vector<8x1xf32>,
    %cst_66 = arith.constant 0.000000e+00 : f32
    %67 = vector.broadcast %cst_66 : f32 to vector<8x1xf32>
    %c0_67 = arith.constant 0 : index
    %c0_68 = arith.constant 0 : index
    %68 = vector.load %arg6[%c0_67, %c0_68] : memref<8x1xf32, #tpu.memory_space<vmem>>, vector<8x1xf32>
    tpu.vector_store %arg6[%c0_67, %c0_68], %67 {strides = array<i32>} : memref<8x1xf32, #tpu.memory_space<vmem>>, vector<8x1xf32>,
    %cst_69 = arith.constant 0.000000e+00 : f32
    %69 = vector.broadcast %cst_69 : f32 to vector<8x8xf32>
    %c0_70 = arith.constant 0 : index
    %c0_71 = arith.constant 0 : index
    %70 = vector.load %arg7[%c0_70, %c0_71] : memref<8x8xf32, #tpu.memory_space<vmem>>, vector<8x8xf32>
    tpu.vector_store %arg7[%c0_70, %c0_71], %69 {strides = array<i32>} : memref<8x8xf32, #tpu.memory_space<vmem>>, vector<8x8xf32>,
    %c0_i32_72 = arith.constant 0 : i32
    %c0_i32_73 = arith.constant 0 : i32
    %71 = arith.subi %0, %c0_i32_73 : i32
    %72 = arith.addi %c0_i32_73, %71 : i32
    %c1_i32_74 = arith.constant 1 : i32
    scf.for %arg8 = %c0_i32_73 to %72 step %c1_i32_74  : i32 {
      %c8_i32_82 = arith.constant 8 : i32
      %82 = arith.muli %arg8, %c8_i32_82 : i32
      %83 = tpu.assume_multiple %82, 8 : i32
      %c0_83 = arith.constant 0 : index
      %84 = arith.index_cast %83 : i32 to index
      %c56 = arith.constant 56 : index
      %85 = vector.load %arg3[%c0_83, %84, %c56] : memref<1x8x96xbf16, #tpu.memory_space<vmem>>, vector<1x8x8xbf16>
      %86 = vector.shape_cast %85 : vector<1x8x8xbf16> to vector<8x8xbf16>
      %c0_84 = arith.constant 0 : index
      %87 = arith.index_cast %83 : i32 to index
      %c88 = arith.constant 88 : index
      %88 = vector.load %arg3[%c0_84, %87, %c88] : memref<1x8x96xbf16, #tpu.memory_space<vmem>>, vector<1x8x8xbf16>
      %89 = vector.shape_cast %88 : vector<1x8x8xbf16> to vector<8x8xbf16>
      %cst_85 = arith.constant dense<0.000000e+00> : vector<8x8xf32>
      %90 = tpu.matmul %64, %86, %cst_85 {dimension_numbers = #tpu.dot_dimension_numbers<[1], [1], [0], [0], [0, 0, 1, 0], [], []>} : vector<8x8xbf16>, vector<8x8xbf16>, vector<8x8xf32> -> vector<8x8xf32>
      %c8_i32_86 = arith.constant 8 : i32
      %91 = arith.muli %arg8, %c8_i32_86 : i32
      %92 = vector.broadcast %91 : i32 to vector<8x8xi32>
      %93 = arith.addi %92, %5 : vector<8x8xi32>
      %94 = arith.cmpi sge, %4, %93 : vector<8x8xi32>
      %cst_87 = arith.constant -1.000000e+30 : f32
      %95 = vector.broadcast %cst_87 : f32 to vector<8x8xf32>
      %96 = arith.select %94, %90, %95 : vector<8x8xi1>, vector<8x8xf32>
      %c0_88 = arith.constant 0 : index
      %c0_89 = arith.constant 0 : index
      %97 = vector.load %arg5[%c0_88, %c0_89] : memref<8x1xf32, #tpu.memory_space<vmem>>, vector<8x1xf32>
      %cst_90 = arith.constant dense<0xFF800000> : vector<8xf32>
      %98 = vector.multi_reduction <maximumf>, %96, %cst_90 [1] : vector<8x8xf32> to vector<8xf32>
      %99 = vector.shape_cast %98 : vector<8xf32> to vector<8x1xf32>
      %100 = arith.maximumf %97, %99 : vector<8x1xf32>
      %101 = arith.subf %97, %100 : vector<8x1xf32>
      %102 = math.exp %101 : vector<8x1xf32>
      %103 = vector.broadcast %100 : vector<8x1xf32> to vector<8x8xf32>
      %104 = arith.subf %96, %103 : vector<8x8xf32>
      %105 = math.exp %104 : vector<8x8xf32>
      %c0_91 = arith.constant 0 : index
      %c0_92 = arith.constant 0 : index
      %106 = vector.load %arg6[%c0_91, %c0_92] : memref<8x1xf32, #tpu.memory_space<vmem>>, vector<8x1xf32>
      %107 = arith.mulf %102, %106 : vector<8x1xf32>
      %cst_93 = arith.constant dense<0.000000e+00> : vector<8xf32>
      %108 = vector.multi_reduction <add>, %105, %cst_93 [1] : vector<8x8xf32> to vector<8xf32>
      %109 = vector.shape_cast %108 : vector<8xf32> to vector<8x1xf32>
      %110 = arith.addf %107, %109 : vector<8x1xf32>
      %c0_94 = arith.constant 0 : index
      %c0_95 = arith.constant 0 : index
      %111 = vector.load %arg6[%c0_94, %c0_95] : memref<8x1xf32, #tpu.memory_space<vmem>>, vector<8x1xf32>
      tpu.vector_store %arg6[%c0_94, %c0_95], %110 {strides = array<i32>} : memref<8x1xf32, #tpu.memory_space<vmem>>, vector<8x1xf32>,
      %c0_96 = arith.constant 0 : index
      %c0_97 = arith.constant 0 : index
      %112 = vector.load %arg7[%c0_96, %c0_97] : memref<8x8xf32, #tpu.memory_space<vmem>>, vector<8x8xf32>
      %113 = vector.broadcast %102 : vector<8x1xf32> to vector<8x8xf32>
      %114 = arith.mulf %113, %112 : vector<8x8xf32>
      %115 = arith.truncf %105 : vector<8x8xf32> to vector<8x8xbf16>
      %cst_98 = arith.constant dense<0.000000e+00> : vector<8x8xf32>
      %116 = tpu.matmul %115, %89, %cst_98 {dimension_numbers = #tpu.dot_dimension_numbers<[1], [0], [0], [1], [0, 0, 1, 1], [], []>} : vector<8x8xbf16>, vector<8x8xbf16>, vector<8x8xf32> -> vector<8x8xf32>
      %117 = arith.addf %114, %116 : vector<8x8xf32>
      %c0_99 = arith.constant 0 : index
      %c0_100 = arith.constant 0 : index
      %118 = vector.load %arg7[%c0_99, %c0_100] : memref<8x8xf32, #tpu.memory_space<vmem>>, vector<8x8xf32>
      tpu.vector_store %arg7[%c0_99, %c0_100], %117 {strides = array<i32>} : memref<8x8xf32, #tpu.memory_space<vmem>>, vector<8x8xf32>,
      %c0_101 = arith.constant 0 : index
      %c0_102 = arith.constant 0 : index
      %119 = vector.load %arg5[%c0_101, %c0_102] : memref<8x1xf32, #tpu.memory_space<vmem>>, vector<8x1xf32>
      tpu.vector_store %arg5[%c0_101, %c0_102], %100 {strides = array<i32>} : memref<8x1xf32, #tpu.memory_space<vmem>>, vector<8x1xf32>,
    }
    %c0_75 = arith.constant 0 : index
    %c0_76 = arith.constant 0 : index
    %73 = vector.load %arg7[%c0_75, %c0_76] : memref<8x8xf32, #tpu.memory_space<vmem>>, vector<8x8xf32>
    %c0_77 = arith.constant 0 : index
    %c0_78 = arith.constant 0 : index
    %74 = vector.load %arg6[%c0_77, %c0_78] : memref<8x1xf32, #tpu.memory_space<vmem>>, vector<8x1xf32>
    %75 = tpu.reciprocal %74 {approx = true} : vector<8x1xf32> -> vector<8x1xf32>
    %76 = vector.broadcast %75 : vector<8x1xf32> to vector<8x8xf32>
    %77 = arith.mulf %73, %76 : vector<8x8xf32>
    %78 = arith.truncf %77 : vector<8x8xf32> to vector<8x8xbf16>
    %c0_79 = arith.constant 0 : index
    %c0_80 = arith.constant 0 : index
    %c24_81 = arith.constant 24 : index
    %79 = vector.load %arg4[%c0_79, %c0_80, %c24_81] : memref<1x8x32xbf16, #tpu.memory_space<vmem>>, vector<1x8x8xbf16>
    %80 = vector.shape_cast %79 : vector<1x8x8xbf16> to vector<8x8xbf16>
    %81 = vector.shape_cast %78 : vector<8x8xbf16> to vector<1x8x8xbf16>
    tpu.vector_store %arg4[%c0_79, %c0_80, %c24_81], %81 {strides = array<i32>} : memref<1x8x32xbf16, #tpu.memory_space<vmem>>, vector<1x8x8xbf16>,
    return
  }
  func.func @transform_0(%arg0: i32, %arg1: i32) -> (i32, i32, i32) {
    %c0_i32 = arith.constant 0 : i32
    %c0_i32_0 = arith.constant 0 : i32
    return %arg0, %arg1, %c0_i32 : i32, i32, i32
  }
  func.func @transform_1(%arg0: i32, %arg1: i32) -> (i32, i32, i32) {
    %c0_i32 = arith.constant 0 : i32
    %c0_i32_0 = arith.constant 0 : i32
    %c0_i32_1 = arith.constant 0 : i32
    return %arg0, %c0_i32, %c0_i32_0 : i32, i32, i32
  }
  func.func @transform_2(%arg0: i32, %arg1: i32) -> (i32, i32, i32) {
    %c0_i32 = arith.constant 0 : i32
    %c0_i32_0 = arith.constant 0 : i32
    return %arg0, %arg1, %c0_i32 : i32, i32, i32
  }
}

module attributes {stable_mosaic.version = 11 : i64} {
  func.func @kernel(%arg0: i32, %arg1: i32, %arg2: memref<16x32xf32, #tpu.memory_space<vmem>>, %arg3: memref<1x32xf32, #tpu.memory_space<vmem>>, %arg4: memref<1x32xf32, #tpu.memory_space<vmem>>, %arg5: memref<32x128xbf16, #tpu.memory_space<vmem>>, %arg6: memref<1x128xf32, #tpu.memory_space<vmem>>, %arg7: memref<16x128xbf16, #tpu.memory_space<vmem>>, %arg8: memref<16x32xbf16, #tpu.memory_space<vmem>>) attributes {dimension_semantics = [#tpu.dimension_semantics<parallel>, #tpu.dimension_semantics<arbitrary>], iteration_bounds = array<i64: 3, 1>, scalar_prefetch = 0 : i64, scratch_operands = 1 : i64, tpu.core_type = #tpu.core_type<tc>, window_params = [{transform_indices = @transform_0, window_bounds = array<i64: 16, 32>}, {pipeline_mode = #tpu.pipeline_mode<synchronous>, transform_indices = @transform_1, window_bounds = array<i64: 1, 32>}, {pipeline_mode = #tpu.pipeline_mode<synchronous>, transform_indices = @transform_2, window_bounds = array<i64: 1, 32>}, {transform_indices = @transform_3, window_bounds = array<i64: 32, 128>}, {transform_indices = @transform_4, window_bounds = array<i64: 1, 128>}, {transform_indices = @transform_5, window_bounds = array<i64: 16, 128>}]} {
    %c0_i32 = arith.constant 0 : i32
    %0 = arith.cmpi eq, %arg1, %c0_i32 : i32
    %1 = arith.extui %0 : i1 to i32
    %c0_i32_0 = arith.constant 0 : i32
    %2 = arith.cmpi ne, %1, %c0_i32_0 : i32
    scf.if %2 {
      %c0_12 = arith.constant 0 : index
      %c0_13 = arith.constant 0 : index
      %24 = vector.load %arg2[%c0_12, %c0_13] : memref<16x32xf32, #tpu.memory_space<vmem>>, vector<16x32xf32>
      %cst_14 = arith.constant dense<0.000000e+00> : vector<16xf32>
      %25 = vector.multi_reduction <add>, %24, %cst_14 [1] : vector<16x32xf32> to vector<16xf32>
      %26 = vector.shape_cast %25 : vector<16xf32> to vector<16x1xf32>
      %cst_15 = arith.constant 3.200000e+01 : f32
      %27 = vector.broadcast %cst_15 : f32 to vector<16x1xf32>
      %28 = arith.divf %26, %27 : vector<16x1xf32>
      %29 = vector.broadcast %28 : vector<16x1xf32> to vector<16x32xf32>
      %30 = arith.subf %24, %29 : vector<16x32xf32>
      %31 = arith.mulf %30, %30 : vector<16x32xf32>
      %cst_16 = arith.constant dense<0.000000e+00> : vector<16xf32>
      %32 = vector.multi_reduction <add>, %31, %cst_16 [1] : vector<16x32xf32> to vector<16xf32>
      %33 = vector.shape_cast %32 : vector<16xf32> to vector<16x1xf32>
      %cst_17 = arith.constant 3.200000e+01 : f32
      %34 = vector.broadcast %cst_17 : f32 to vector<16x1xf32>
      %35 = arith.divf %33, %34 : vector<16x1xf32>
      %cst_18 = arith.constant 9.99999974E-6 : f32
      %36 = vector.broadcast %cst_18 : f32 to vector<16x1xf32>
      %37 = arith.addf %35, %36 : vector<16x1xf32>
      %38 = math.rsqrt %37 : vector<16x1xf32>
      %39 = vector.broadcast %38 : vector<16x1xf32> to vector<16x32xf32>
      %40 = arith.mulf %30, %39 : vector<16x32xf32>
      %c0_19 = arith.constant 0 : index
      %c0_20 = arith.constant 0 : index
      %41 = vector.load %arg3[%c0_19, %c0_20] : memref<1x32xf32, #tpu.memory_space<vmem>>, vector<1x32xf32>
      %42 = vector.broadcast %41 : vector<1x32xf32> to vector<16x32xf32>
      %43 = arith.mulf %40, %42 : vector<16x32xf32>
      %c0_21 = arith.constant 0 : index
      %c0_22 = arith.constant 0 : index
      %44 = vector.load %arg4[%c0_21, %c0_22] : memref<1x32xf32, #tpu.memory_space<vmem>>, vector<1x32xf32>
      %45 = vector.broadcast %44 : vector<1x32xf32> to vector<16x32xf32>
      %46 = arith.addf %43, %45 : vector<16x32xf32>
      %47 = arith.truncf %46 : vector<16x32xf32> to vector<16x32xbf16>
      %c0_23 = arith.constant 0 : index
      %c0_24 = arith.constant 0 : index
      %48 = vector.load %arg8[%c0_23, %c0_24] : memref<16x32xbf16, #tpu.memory_space<vmem>>, vector<16x32xbf16>
      tpu.vector_store %arg8[%c0_23, %c0_24], %47 {strides = array<i32>} : memref<16x32xbf16, #tpu.memory_space<vmem>>, vector<16x32xbf16>,
    } else {
    }
    %c0 = arith.constant 0 : index
    %c0_1 = arith.constant 0 : index
    %3 = vector.load %arg8[%c0, %c0_1] : memref<16x32xbf16, #tpu.memory_space<vmem>>, vector<16x32xbf16>
    %c0_2 = arith.constant 0 : index
    %c0_3 = arith.constant 0 : index
    %4 = vector.load %arg5[%c0_2, %c0_3] : memref<32x128xbf16, #tpu.memory_space<vmem>>, vector<32x128xbf16>
    %cst = arith.constant dense<0.000000e+00> : vector<16x128xf32>
    %5 = tpu.matmul %3, %4, %cst {dimension_numbers = #tpu.dot_dimension_numbers<[1], [0], [0], [1], [0, 0, 1, 1], [], []>} : vector<16x32xbf16>, vector<32x128xbf16>, vector<16x128xf32> -> vector<16x128xf32>
    %c0_4 = arith.constant 0 : index
    %c0_5 = arith.constant 0 : index
    %6 = vector.load %arg6[%c0_4, %c0_5] : memref<1x128xf32, #tpu.memory_space<vmem>>, vector<1x128xf32>
    %7 = vector.broadcast %6 : vector<1x128xf32> to vector<16x128xf32>
    %8 = arith.addf %5, %7 : vector<16x128xf32>
    %9 = arith.mulf %8, %8 : vector<16x128xf32>
    %10 = arith.mulf %8, %9 : vector<16x128xf32>
    %cst_6 = arith.constant 4.471500e-02 : f32
    %11 = vector.broadcast %cst_6 : f32 to vector<16x128xf32>
    %12 = arith.mulf %11, %10 : vector<16x128xf32>
    %13 = arith.addf %8, %12 : vector<16x128xf32>
    %cst_7 = arith.constant 0.797884583 : f32
    %14 = vector.broadcast %cst_7 : f32 to vector<16x128xf32>
    %15 = arith.mulf %14, %13 : vector<16x128xf32>
    %16 = math.tanh %15 : vector<16x128xf32>
    %cst_8 = arith.constant 1.000000e+00 : f32
    %17 = vector.broadcast %cst_8 : f32 to vector<16x128xf32>
    %18 = arith.addf %17, %16 : vector<16x128xf32>
    %cst_9 = arith.constant 5.000000e-01 : f32
    %19 = vector.broadcast %cst_9 : f32 to vector<16x128xf32>
    %20 = arith.mulf %19, %18 : vector<16x128xf32>
    %21 = arith.mulf %8, %20 : vector<16x128xf32>
    %22 = arith.truncf %21 : vector<16x128xf32> to vector<16x128xbf16>
    %c0_10 = arith.constant 0 : index
    %c0_11 = arith.constant 0 : index
    %23 = vector.load %arg7[%c0_10, %c0_11] : memref<16x128xbf16, #tpu.memory_space<vmem>>, vector<16x128xbf16>
    tpu.vector_store %arg7[%c0_10, %c0_11], %22 {strides = array<i32>} : memref<16x128xbf16, #tpu.memory_space<vmem>>, vector<16x128xbf16>,
    return
  }
  func.func @transform_0(%arg0: i32, %arg1: i32) -> (i32, i32) {
    %c0_i32 = arith.constant 0 : i32
    %c0_i32_0 = arith.constant 0 : i32
    return %arg0, %c0_i32 : i32, i32
  }
  func.func @transform_1(%arg0: i32, %arg1: i32) -> (i32, i32) {
    %c0_i32 = arith.constant 0 : i32
    %c0_i32_0 = arith.constant 0 : i32
    %c0_i32_1 = arith.constant 0 : i32
    return %c0_i32, %c0_i32_0 : i32, i32
  }
  func.func @transform_2(%arg0: i32, %arg1: i32) -> (i32, i32) {
    %c0_i32 = arith.constant 0 : i32
    %c0_i32_0 = arith.constant 0 : i32
    %c0_i32_1 = arith.constant 0 : i32
    return %c0_i32, %c0_i32_0 : i32, i32
  }
  func.func @transform_3(%arg0: i32, %arg1: i32) -> (i32, i32) {
    %c0_i32 = arith.constant 0 : i32
    %c0_i32_0 = arith.constant 0 : i32
    return %c0_i32, %arg1 : i32, i32
  }
  func.func @transform_4(%arg0: i32, %arg1: i32) -> (i32, i32) {
    %c0_i32 = arith.constant 0 : i32
    %c0_i32_0 = arith.constant 0 : i32
    return %c0_i32, %arg1 : i32, i32
  }
  func.func @transform_5(%arg0: i32, %arg1: i32) -> (i32, i32) {
    %c0_i32 = arith.constant 0 : i32
    return %arg0, %arg1 : i32, i32
  }
}

module attributes {stable_mosaic.version = 11 : i64} {
  func.func @kernel(%arg0: i32, %arg1: i32, %arg2: i32, %arg3: memref<16x128xbf16, #tpu.memory_space<vmem>>, %arg4: memref<128x32xbf16, #tpu.memory_space<vmem>>, %arg5: memref<1x32xf32, #tpu.memory_space<vmem>>, %arg6: memref<16x32xf32, #tpu.memory_space<vmem>>, %arg7: memref<16x32xf32, #tpu.memory_space<vmem>>) attributes {dimension_semantics = [#tpu.dimension_semantics<parallel>, #tpu.dimension_semantics<parallel>, #tpu.dimension_semantics<arbitrary>], iteration_bounds = array<i64: 3, 1, 1>, scalar_prefetch = 0 : i64, scratch_operands = 0 : i64, tpu.core_type = #tpu.core_type<tc>, window_params = [{transform_indices = @transform_0, window_bounds = array<i64: 16, 128>}, {transform_indices = @transform_1, window_bounds = array<i64: 128, 32>}, {transform_indices = @transform_2, window_bounds = array<i64: 1, 32>}, {transform_indices = @transform_3, window_bounds = array<i64: 16, 32>}, {transform_indices = @transform_4, window_bounds = array<i64: 16, 32>}]} {
    %c0_i32 = arith.constant 0 : i32
    %0 = arith.cmpi eq, %arg2, %c0_i32 : i32
    %1 = arith.extui %0 : i1 to i32
    %c0_i32_0 = arith.constant 0 : i32
    %2 = arith.cmpi ne, %1, %c0_i32_0 : i32
    scf.if %2 {
      %cst_10 = arith.constant 0.000000e+00 : f32
      %12 = vector.broadcast %cst_10 : f32 to vector<16x32xf32>
      %c0_11 = arith.constant 0 : index
      %c0_12 = arith.constant 0 : index
      %13 = vector.load %arg7[%c0_11, %c0_12] : memref<16x32xf32, #tpu.memory_space<vmem>>, vector<16x32xf32>
      tpu.vector_store %arg7[%c0_11, %c0_12], %12 {strides = array<i32>} : memref<16x32xf32, #tpu.memory_space<vmem>>, vector<16x32xf32>,
    } else {
    }
    %c0 = arith.constant 0 : index
    %c0_1 = arith.constant 0 : index
    %3 = vector.load %arg7[%c0, %c0_1] : memref<16x32xf32, #tpu.memory_space<vmem>>, vector<16x32xf32>
    %c0_2 = arith.constant 0 : index
    %c0_3 = arith.constant 0 : index
    %4 = vector.load %arg3[%c0_2, %c0_3] : memref<16x128xbf16, #tpu.memory_space<vmem>>, vector<16x128xbf16>
    %c0_4 = arith.constant 0 : index
    %c0_5 = arith.constant 0 : index
    %5 = vector.load %arg4[%c0_4, %c0_5] : memref<128x32xbf16, #tpu.memory_space<vmem>>, vector<128x32xbf16>
    %cst = arith.constant dense<0.000000e+00> : vector<16x32xf32>
    %6 = tpu.matmul %4, %5, %cst {dimension_numbers = #tpu.dot_dimension_numbers<[1], [0], [0], [1], [0, 0, 1, 1], [], []>} : vector<16x128xbf16>, vector<128x32xbf16>, vector<16x32xf32> -> vector<16x32xf32>
    %7 = arith.addf %3, %6 : vector<16x32xf32>
    %c0_6 = arith.constant 0 : index
    %c0_7 = arith.constant 0 : index
    %8 = vector.load %arg7[%c0_6, %c0_7] : memref<16x32xf32, #tpu.memory_space<vmem>>, vector<16x32xf32>
    tpu.vector_store %arg7[%c0_6, %c0_7], %7 {strides = array<i32>} : memref<16x32xf32, #tpu.memory_space<vmem>>, vector<16x32xf32>,
    %c0_i32_8 = arith.constant 0 : i32
    %9 = arith.cmpi eq, %arg2, %c0_i32_8 : i32
    %10 = arith.extui %9 : i1 to i32
    %c0_i32_9 = arith.constant 0 : i32
    %11 = arith.cmpi ne, %10, %c0_i32_9 : i32
    scf.if %11 {
      %c0_10 = arith.constant 0 : index
      %c0_11 = arith.constant 0 : index
      %12 = vector.load %arg7[%c0_10, %c0_11] : memref<16x32xf32, #tpu.memory_space<vmem>>, vector<16x32xf32>
      %c0_12 = arith.constant 0 : index
      %c0_13 = arith.constant 0 : index
      %13 = vector.load %arg5[%c0_12, %c0_13] : memref<1x32xf32, #tpu.memory_space<vmem>>, vector<1x32xf32>
      %14 = vector.broadcast %13 : vector<1x32xf32> to vector<16x32xf32>
      %15 = arith.addf %12, %14 : vector<16x32xf32>
      %c0_14 = arith.constant 0 : index
      %c0_15 = arith.constant 0 : index
      %16 = vector.load %arg6[%c0_14, %c0_15] : memref<16x32xf32, #tpu.memory_space<vmem>>, vector<16x32xf32>
      %17 = arith.addf %15, %16 : vector<16x32xf32>
      %c0_16 = arith.constant 0 : index
      %c0_17 = arith.constant 0 : index
      %18 = vector.load %arg7[%c0_16, %c0_17] : memref<16x32xf32, #tpu.memory_space<vmem>>, vector<16x32xf32>
      tpu.vector_store %arg7[%c0_16, %c0_17], %17 {strides = array<i32>} : memref<16x32xf32, #tpu.memory_space<vmem>>, vector<16x32xf32>,
    } else {
    }
    return
  }
  func.func @transform_0(%arg0: i32, %arg1: i32, %arg2: i32) -> (i32, i32) {
    %c0_i32 = arith.constant 0 : i32
    return %arg0, %arg2 : i32, i32
  }
  func.func @transform_1(%arg0: i32, %arg1: i32, %arg2: i32) -> (i32, i32) {
    %c0_i32 = arith.constant 0 : i32
    return %arg2, %arg1 : i32, i32
  }
  func.func @transform_2(%arg0: i32, %arg1: i32, %arg2: i32) -> (i32, i32) {
    %c0_i32 = arith.constant 0 : i32
    %c0_i32_0 = arith.constant 0 : i32
    return %c0_i32, %arg1 : i32, i32
  }
  func.func @transform_3(%arg0: i32, %arg1: i32, %arg2: i32) -> (i32, i32) {
    %c0_i32 = arith.constant 0 : i32
    return %arg0, %arg1 : i32, i32
  }
  func.func @transform_4(%arg0: i32, %arg1: i32, %arg2: i32) -> (i32, i32) {
    %c0_i32 = arith.constant 0 : i32
    return %arg0, %arg1 : i32, i32
  }
}

module attributes {stable_mosaic.version = 11 : i64} {
  func.func @kernel(%arg0: i32, %arg1: memref<16x32xf32, #tpu.memory_space<vmem>>, %arg2: memref<16x32xf32, #tpu.memory_space<vmem>>, %arg3: memref<16x32xf32, #tpu.memory_space<vmem>>, %arg4: memref<1x32xf32, #tpu.memory_space<vmem>>, %arg5: memref<1x32xf32, #tpu.memory_space<vmem>>, %arg6: memref<32x128xbf16, #tpu.memory_space<vmem>>, %arg7: memref<1x128xf32, #tpu.memory_space<vmem>>, %arg8: memref<128x6xbf16, #tpu.memory_space<vmem>>, %arg9: memref<128x6xbf16, #tpu.memory_space<vmem>>, %arg10: memref<128x6xbf16, #tpu.memory_space<vmem>>, %arg11: memref<6x128xbf16, #tpu.memory_space<vmem>>, %arg12: memref<16x128xf32, #tpu.memory_space<vmem>>) attributes {dimension_semantics = [#tpu.dimension_semantics<parallel>], iteration_bounds = array<i64: 1>, scalar_prefetch = 0 : i64, scratch_operands = 0 : i64, tpu.core_type = #tpu.core_type<tc>, window_params = [{transform_indices = @transform_0, window_bounds = array<i64: 16, 32>}, {transform_indices = @transform_1, window_bounds = array<i64: 16, 32>}, {transform_indices = @transform_2, window_bounds = array<i64: 16, 32>}, {pipeline_mode = #tpu.pipeline_mode<synchronous>, transform_indices = @transform_3, window_bounds = array<i64: 1, 32>}, {pipeline_mode = #tpu.pipeline_mode<synchronous>, transform_indices = @transform_4, window_bounds = array<i64: 1, 32>}, {pipeline_mode = #tpu.pipeline_mode<synchronous>, transform_indices = @transform_5, window_bounds = array<i64: 32, 128>}, {pipeline_mode = #tpu.pipeline_mode<synchronous>, transform_indices = @transform_6, window_bounds = array<i64: 1, 128>}, {pipeline_mode = #tpu.pipeline_mode<synchronous>, transform_indices = @transform_7, window_bounds = array<i64: 128, 6>}, {pipeline_mode = #tpu.pipeline_mode<synchronous>, transform_indices = @transform_8, window_bounds = array<i64: 128, 6>}, {pipeline_mode = #tpu.pipeline_mode<synchronous>, transform_indices = @transform_9, window_bounds = array<i64: 128, 6>}, {pipeline_mode = #tpu.pipeline_mode<synchronous>, transform_indices = @transform_10, window_bounds = array<i64: 6, 128>}, {transform_indices = @transform_11, window_bounds = array<i64: 16, 128>}]} {
    %c0 = arith.constant 0 : index
    %c0_0 = arith.constant 0 : index
    %0 = vector.load %arg4[%c0, %c0_0] : memref<1x32xf32, #tpu.memory_space<vmem>>, vector<1x32xf32>
    %c0_1 = arith.constant 0 : index
    %c0_2 = arith.constant 0 : index
    %1 = vector.load %arg5[%c0_1, %c0_2] : memref<1x32xf32, #tpu.memory_space<vmem>>, vector<1x32xf32>
    %c0_3 = arith.constant 0 : index
    %c0_4 = arith.constant 0 : index
    %2 = vector.load %arg6[%c0_3, %c0_4] : memref<32x128xbf16, #tpu.memory_space<vmem>>, vector<32x128xbf16>
    %c0_5 = arith.constant 0 : index
    %c0_6 = arith.constant 0 : index
    %3 = vector.load %arg7[%c0_5, %c0_6] : memref<1x128xf32, #tpu.memory_space<vmem>>, vector<1x128xf32>
    %c0_7 = arith.constant 0 : index
    %c0_8 = arith.constant 0 : index
    %4 = vector.load %arg1[%c0_7, %c0_8] : memref<16x32xf32, #tpu.memory_space<vmem>>, vector<16x32xf32>
    %cst = arith.constant dense<0.000000e+00> : vector<16xf32>
    %5 = vector.multi_reduction <add>, %4, %cst [1] : vector<16x32xf32> to vector<16xf32>
    %6 = vector.shape_cast %5 : vector<16xf32> to vector<16x1xf32>
    %cst_9 = arith.constant 3.200000e+01 : f32
    %7 = vector.broadcast %cst_9 : f32 to vector<16x1xf32>
    %8 = arith.divf %6, %7 : vector<16x1xf32>
    %9 = vector.broadcast %8 : vector<16x1xf32> to vector<16x32xf32>
    %10 = arith.subf %4, %9 : vector<16x32xf32>
    %11 = arith.mulf %10, %10 : vector<16x32xf32>
    %cst_10 = arith.constant dense<0.000000e+00> : vector<16xf32>
    %12 = vector.multi_reduction <add>, %11, %cst_10 [1] : vector<16x32xf32> to vector<16xf32>
    %13 = vector.shape_cast %12 : vector<16xf32> to vector<16x1xf32>
    %cst_11 = arith.constant 3.200000e+01 : f32
    %14 = vector.broadcast %cst_11 : f32 to vector<16x1xf32>
    %15 = arith.divf %13, %14 : vector<16x1xf32>
    %cst_12 = arith.constant 9.99999974E-6 : f32
    %16 = vector.broadcast %cst_12 : f32 to vector<16x1xf32>
    %17 = arith.addf %15, %16 : vector<16x1xf32>
    %18 = math.rsqrt %17 : vector<16x1xf32>
    %19 = vector.broadcast %18 : vector<16x1xf32> to vector<16x32xf32>
    %20 = arith.mulf %10, %19 : vector<16x32xf32>
    %21 = vector.broadcast %0 : vector<1x32xf32> to vector<16x32xf32>
    %22 = arith.mulf %20, %21 : vector<16x32xf32>
    %23 = vector.broadcast %1 : vector<1x32xf32> to vector<16x32xf32>
    %24 = arith.addf %22, %23 : vector<16x32xf32>
    %25 = arith.truncf %24 : vector<16x32xf32> to vector<16x32xbf16>
    %cst_13 = arith.constant dense<0.000000e+00> : vector<16x128xf32>
    %26 = tpu.matmul %25, %2, %cst_13 {dimension_numbers = #tpu.dot_dimension_numbers<[1], [0], [0], [1], [0, 0, 1, 1], [], []>} : vector<16x32xbf16>, vector<32x128xbf16>, vector<16x128xf32> -> vector<16x128xf32>
    %27 = vector.broadcast %3 : vector<1x128xf32> to vector<16x128xf32>
    %28 = arith.addf %26, %27 : vector<16x128xf32>
    %c0_14 = arith.constant 0 : index
    %c0_15 = arith.constant 0 : index
    %29 = vector.load %arg2[%c0_14, %c0_15] : memref<16x32xf32, #tpu.memory_space<vmem>>, vector<16x32xf32>
    %cst_16 = arith.constant dense<0.000000e+00> : vector<16xf32>
    %30 = vector.multi_reduction <add>, %29, %cst_16 [1] : vector<16x32xf32> to vector<16xf32>
    %31 = vector.shape_cast %30 : vector<16xf32> to vector<16x1xf32>
    %cst_17 = arith.constant 3.200000e+01 : f32
    %32 = vector.broadcast %cst_17 : f32 to vector<16x1xf32>
    %33 = arith.divf %31, %32 : vector<16x1xf32>
    %34 = vector.broadcast %33 : vector<16x1xf32> to vector<16x32xf32>
    %35 = arith.subf %29, %34 : vector<16x32xf32>
    %36 = arith.mulf %35, %35 : vector<16x32xf32>
    %cst_18 = arith.constant dense<0.000000e+00> : vector<16xf32>
    %37 = vector.multi_reduction <add>, %36, %cst_18 [1] : vector<16x32xf32> to vector<16xf32>
    %38 = vector.shape_cast %37 : vector<16xf32> to vector<16x1xf32>
    %cst_19 = arith.constant 3.200000e+01 : f32
    %39 = vector.broadcast %cst_19 : f32 to vector<16x1xf32>
    %40 = arith.divf %38, %39 : vector<16x1xf32>
    %cst_20 = arith.constant 9.99999974E-6 : f32
    %41 = vector.broadcast %cst_20 : f32 to vector<16x1xf32>
    %42 = arith.addf %40, %41 : vector<16x1xf32>
    %43 = math.rsqrt %42 : vector<16x1xf32>
    %44 = vector.broadcast %43 : vector<16x1xf32> to vector<16x32xf32>
    %45 = arith.mulf %35, %44 : vector<16x32xf32>
    %46 = vector.broadcast %0 : vector<1x32xf32> to vector<16x32xf32>
    %47 = arith.mulf %45, %46 : vector<16x32xf32>
    %48 = vector.broadcast %1 : vector<1x32xf32> to vector<16x32xf32>
    %49 = arith.addf %47, %48 : vector<16x32xf32>
    %50 = arith.truncf %49 : vector<16x32xf32> to vector<16x32xbf16>
    %cst_21 = arith.constant dense<0.000000e+00> : vector<16x128xf32>
    %51 = tpu.matmul %50, %2, %cst_21 {dimension_numbers = #tpu.dot_dimension_numbers<[1], [0], [0], [1], [0, 0, 1, 1], [], []>} : vector<16x32xbf16>, vector<32x128xbf16>, vector<16x128xf32> -> vector<16x128xf32>
    %52 = vector.broadcast %3 : vector<1x128xf32> to vector<16x128xf32>
    %53 = arith.addf %51, %52 : vector<16x128xf32>
    %c0_22 = arith.constant 0 : index
    %c0_23 = arith.constant 0 : index
    %54 = vector.load %arg3[%c0_22, %c0_23] : memref<16x32xf32, #tpu.memory_space<vmem>>, vector<16x32xf32>
    %cst_24 = arith.constant dense<0.000000e+00> : vector<16xf32>
    %55 = vector.multi_reduction <add>, %54, %cst_24 [1] : vector<16x32xf32> to vector<16xf32>
    %56 = vector.shape_cast %55 : vector<16xf32> to vector<16x1xf32>
    %cst_25 = arith.constant 3.200000e+01 : f32
    %57 = vector.broadcast %cst_25 : f32 to vector<16x1xf32>
    %58 = arith.divf %56, %57 : vector<16x1xf32>
    %59 = vector.broadcast %58 : vector<16x1xf32> to vector<16x32xf32>
    %60 = arith.subf %54, %59 : vector<16x32xf32>
    %61 = arith.mulf %60, %60 : vector<16x32xf32>
    %cst_26 = arith.constant dense<0.000000e+00> : vector<16xf32>
    %62 = vector.multi_reduction <add>, %61, %cst_26 [1] : vector<16x32xf32> to vector<16xf32>
    %63 = vector.shape_cast %62 : vector<16xf32> to vector<16x1xf32>
    %cst_27 = arith.constant 3.200000e+01 : f32
    %64 = vector.broadcast %cst_27 : f32 to vector<16x1xf32>
    %65 = arith.divf %63, %64 : vector<16x1xf32>
    %cst_28 = arith.constant 9.99999974E-6 : f32
    %66 = vector.broadcast %cst_28 : f32 to vector<16x1xf32>
    %67 = arith.addf %65, %66 : vector<16x1xf32>
    %68 = math.rsqrt %67 : vector<16x1xf32>
    %69 = vector.broadcast %68 : vector<16x1xf32> to vector<16x32xf32>
    %70 = arith.mulf %60, %69 : vector<16x32xf32>
    %71 = vector.broadcast %0 : vector<1x32xf32> to vector<16x32xf32>
    %72 = arith.mulf %70, %71 : vector<16x32xf32>
    %73 = vector.broadcast %1 : vector<1x32xf32> to vector<16x32xf32>
    %74 = arith.addf %72, %73 : vector<16x32xf32>
    %75 = arith.truncf %74 : vector<16x32xf32> to vector<16x32xbf16>
    %cst_29 = arith.constant dense<0.000000e+00> : vector<16x128xf32>
    %76 = tpu.matmul %75, %2, %cst_29 {dimension_numbers = #tpu.dot_dimension_numbers<[1], [0], [0], [1], [0, 0, 1, 1], [], []>} : vector<16x32xbf16>, vector<32x128xbf16>, vector<16x128xf32> -> vector<16x128xf32>
    %77 = vector.broadcast %3 : vector<1x128xf32> to vector<16x128xf32>
    %78 = arith.addf %76, %77 : vector<16x128xf32>
    %79 = arith.truncf %28 : vector<16x128xf32> to vector<16x128xbf16>
    %c0_30 = arith.constant 0 : index
    %c0_31 = arith.constant 0 : index
    %80 = vector.load %arg8[%c0_30, %c0_31] : memref<128x6xbf16, #tpu.memory_space<vmem>>, vector<128x6xbf16>
    %cst_32 = arith.constant dense<0.000000e+00> : vector<16x6xf32>
    %81 = tpu.matmul %79, %80, %cst_32 {dimension_numbers = #tpu.dot_dimension_numbers<[1], [0], [0], [1], [0, 0, 1, 1], [], []>} : vector<16x128xbf16>, vector<128x6xbf16>, vector<16x6xf32> -> vector<16x6xf32>
    %82 = arith.truncf %53 : vector<16x128xf32> to vector<16x128xbf16>
    %c0_33 = arith.constant 0 : index
    %c0_34 = arith.constant 0 : index
    %83 = vector.load %arg9[%c0_33, %c0_34] : memref<128x6xbf16, #tpu.memory_space<vmem>>, vector<128x6xbf16>
    %cst_35 = arith.constant dense<0.000000e+00> : vector<16x6xf32>
    %84 = tpu.matmul %82, %83, %cst_35 {dimension_numbers = #tpu.dot_dimension_numbers<[1], [0], [0], [1], [0, 0, 1, 1], [], []>} : vector<16x128xbf16>, vector<128x6xbf16>, vector<16x6xf32> -> vector<16x6xf32>
    %85 = arith.truncf %78 : vector<16x128xf32> to vector<16x128xbf16>
    %c0_36 = arith.constant 0 : index
    %c0_37 = arith.constant 0 : index
    %86 = vector.load %arg10[%c0_36, %c0_37] : memref<128x6xbf16, #tpu.memory_space<vmem>>, vector<128x6xbf16>
    %cst_38 = arith.constant dense<0.000000e+00> : vector<16x6xf32>
    %87 = tpu.matmul %85, %86, %cst_38 {dimension_numbers = #tpu.dot_dimension_numbers<[1], [0], [0], [1], [0, 0, 1, 1], [], []>} : vector<16x128xbf16>, vector<128x6xbf16>, vector<16x6xf32> -> vector<16x6xf32>
    %88 = arith.maximumf %81, %84 : vector<16x6xf32>
    %89 = arith.maximumf %88, %87 : vector<16x6xf32>
    %90 = arith.subf %81, %89 : vector<16x6xf32>
    %91 = math.exp %90 : vector<16x6xf32>
    %92 = arith.subf %84, %89 : vector<16x6xf32>
    %93 = math.exp %92 : vector<16x6xf32>
    %94 = arith.subf %87, %89 : vector<16x6xf32>
    %95 = math.exp %94 : vector<16x6xf32>
    %96 = arith.addf %91, %93 : vector<16x6xf32>
    %97 = arith.addf %96, %95 : vector<16x6xf32>
    %98 = tpu.reciprocal %97 {approx = true} : vector<16x6xf32> -> vector<16x6xf32>
    %c0_39 = arith.constant 0 : index
    %c0_40 = arith.constant 0 : index
    %99 = vector.load %arg11[%c0_39, %c0_40] : memref<6x128xbf16, #tpu.memory_space<vmem>>, vector<6x128xbf16>
    %100 = arith.mulf %91, %98 : vector<16x6xf32>
    %101 = arith.truncf %100 : vector<16x6xf32> to vector<16x6xbf16>
    %cst_41 = arith.constant dense<0.000000e+00> : vector<16x128xf32>
    %102 = tpu.matmul %101, %99, %cst_41 {dimension_numbers = #tpu.dot_dimension_numbers<[1], [0], [0], [1], [0, 0, 1, 1], [], []>} : vector<16x6xbf16>, vector<6x128xbf16>, vector<16x128xf32> -> vector<16x128xf32>
    %103 = arith.mulf %93, %98 : vector<16x6xf32>
    %104 = arith.truncf %103 : vector<16x6xf32> to vector<16x6xbf16>
    %cst_42 = arith.constant dense<0.000000e+00> : vector<16x128xf32>
    %105 = tpu.matmul %104, %99, %cst_42 {dimension_numbers = #tpu.dot_dimension_numbers<[1], [0], [0], [1], [0, 0, 1, 1], [], []>} : vector<16x6xbf16>, vector<6x128xbf16>, vector<16x128xf32> -> vector<16x128xf32>
    %106 = arith.mulf %95, %98 : vector<16x6xf32>
    %107 = arith.truncf %106 : vector<16x6xf32> to vector<16x6xbf16>
    %cst_43 = arith.constant dense<0.000000e+00> : vector<16x128xf32>
    %108 = tpu.matmul %107, %99, %cst_43 {dimension_numbers = #tpu.dot_dimension_numbers<[1], [0], [0], [1], [0, 0, 1, 1], [], []>} : vector<16x6xbf16>, vector<6x128xbf16>, vector<16x128xf32> -> vector<16x128xf32>
    %109 = arith.mulf %28, %102 : vector<16x128xf32>
    %110 = arith.mulf %53, %105 : vector<16x128xf32>
    %111 = arith.addf %109, %110 : vector<16x128xf32>
    %112 = arith.mulf %78, %108 : vector<16x128xf32>
    %113 = arith.addf %111, %112 : vector<16x128xf32>
    %c0_44 = arith.constant 0 : index
    %c0_45 = arith.constant 0 : index
    %114 = vector.load %arg12[%c0_44, %c0_45] : memref<16x128xf32, #tpu.memory_space<vmem>>, vector<16x128xf32>
    tpu.vector_store %arg12[%c0_44, %c0_45], %113 {strides = array<i32>} : memref<16x128xf32, #tpu.memory_space<vmem>>, vector<16x128xf32>,
    return
  }
  func.func @transform_0(%arg0: i32) -> (i32, i32) {
    %c0_i32 = arith.constant 0 : i32
    %c0_i32_0 = arith.constant 0 : i32
    return %arg0, %c0_i32 : i32, i32
  }
  func.func @transform_1(%arg0: i32) -> (i32, i32) {
    %c1_i32 = arith.constant 1 : i32
    %0 = arith.addi %arg0, %c1_i32 : i32
    %c0_i32 = arith.constant 0 : i32
    %c0_i32_0 = arith.constant 0 : i32
    return %0, %c0_i32 : i32, i32
  }
  func.func @transform_2(%arg0: i32) -> (i32, i32) {
    %c2_i32 = arith.constant 2 : i32
    %0 = arith.addi %arg0, %c2_i32 : i32
    %c0_i32 = arith.constant 0 : i32
    %c0_i32_0 = arith.constant 0 : i32
    return %0, %c0_i32 : i32, i32
  }
  func.func @transform_3(%arg0: i32) -> (i32, i32) {
    %c0_i32 = arith.constant 0 : i32
    %c0_i32_0 = arith.constant 0 : i32
    %c0_i32_1 = arith.constant 0 : i32
    return %c0_i32, %c0_i32_0 : i32, i32
  }
  func.func @transform_4(%arg0: i32) -> (i32, i32) {
    %c0_i32 = arith.constant 0 : i32
    %c0_i32_0 = arith.constant 0 : i32
    %c0_i32_1 = arith.constant 0 : i32
    return %c0_i32, %c0_i32_0 : i32, i32
  }
  func.func @transform_5(%arg0: i32) -> (i32, i32) {
    %c0_i32 = arith.constant 0 : i32
    %c0_i32_0 = arith.constant 0 : i32
    %c0_i32_1 = arith.constant 0 : i32
    return %c0_i32, %c0_i32_0 : i32, i32
  }
  func.func @transform_6(%arg0: i32) -> (i32, i32) {
    %c0_i32 = arith.constant 0 : i32
    %c0_i32_0 = arith.constant 0 : i32
    %c0_i32_1 = arith.constant 0 : i32
    return %c0_i32, %c0_i32_0 : i32, i32
  }
  func.func @transform_7(%arg0: i32) -> (i32, i32) {
    %c0_i32 = arith.constant 0 : i32
    %c0_i32_0 = arith.constant 0 : i32
    %c0_i32_1 = arith.constant 0 : i32
    return %c0_i32, %c0_i32_0 : i32, i32
  }
  func.func @transform_8(%arg0: i32) -> (i32, i32) {
    %c0_i32 = arith.constant 0 : i32
    %c0_i32_0 = arith.constant 0 : i32
    %c0_i32_1 = arith.constant 0 : i32
    return %c0_i32, %c0_i32_0 : i32, i32
  }
  func.func @transform_9(%arg0: i32) -> (i32, i32) {
    %c0_i32 = arith.constant 0 : i32
    %c0_i32_0 = arith.constant 0 : i32
    %c0_i32_1 = arith.constant 0 : i32
    return %c0_i32, %c0_i32_0 : i32, i32
  }
  func.func @transform_10(%arg0: i32) -> (i32, i32) {
    %c0_i32 = arith.constant 0 : i32
    %c0_i32_0 = arith.constant 0 : i32
    %c0_i32_1 = arith.constant 0 : i32
    return %c0_i32, %c0_i32_0 : i32, i32
  }
  func.func @transform_11(%arg0: i32) -> (i32, i32) {
    %c0_i32 = arith.constant 0 : i32
    %c0_i32_0 = arith.constant 0 : i32
    return %arg0, %c0_i32 : i32, i32
  }
}

</mosaic_0001>

<bundles_post_ra>
// kernel: music_x_transformer_loss.13
= control target key start
LH: loop header
LB: loop body
LE: loop exit
PB: predicated region body
PF: predicated region fallthrough
CT: control target
= control target key end

     0   :  { %s658_s15 = smov 0   ;;  %s660_s16 = smov 0   ;;  %s710_s0 = inlined_call_operand.vmem [shape: bf16[48,32], index: 0, kind: input, shape index: {}]   ;;  %s711_s1 = inlined_call_operand.vmem [shape: bf16[32,32], index: 1, kind: input, shape index: {}]   ;;  %s712_s2 = inlined_call_operand.vmem [shape: f32[1,32], index: 2, kind: input, shape index: {}]   ;;  %s713_s3 = inlined_call_operand.vmem [shape: f32[48,32], index: 3, kind: input, shape index: {}]   ;;  %s714_s4 = inlined_call_operand.vmem [shape: f32[48,32], index: 4, kind: output, shape index: {}]  }
   0x1   :  { %s662_s17 = smov 0  }
   0x2 LB: > { %s33_s18 = sadd.s32 1, %s625_s16  ;;  %p553_p0 = scmp.ge.s32.totalorder %s629_s17, 1  ;;  %s629_s17 = sphi %s662_s17, %s14_s17   ;;  %s625_s16 = sphi %s660_s16, %s716_s16   ;;  %s621_s15 = sphi %s658_s15, %s715_s15  }
   0x3   : > { %p35_p1 = scmp.ge.s32.totalorder %s33_s18, 3  ;;  %p229_p2 = scmp.lt.s32.totalorder %s629_s17, 4 }
   0x5   : > { %s718_s18 = smov (%p35_p1, %s33_s18), 0  ;;  %p230_p3 = pnand %p553_p0, %p229_p2 }
   0x6   : > { %v604_v0 = vld [vmem:[%s711_s1] sm:$0xff] (!%p230_p3)   ;;  %v631_v1 = vmov (!%p230_p3), 0.0   ;;  %v605_v2 = vld [vmem:[%s711_s1 + $0x8] sm:$0xff] (!%p230_p3)   ;;  %vm632_vm0 = vmmov (!%p230_p3), 0   ;;  %s554_s23 = sshll.u32 (!%p230_p3), %s621_s15, 1  ;;  %vm324_vm1 = vcmask (!%p230_p3), 261120  }
   0x7   : > { %233 = sbr.rel (%p230_p3) target bundleno = 247 (0xf7), region = 36  ;;  %570 = vmatprep.subr.bf16.mxu0 (!%p230_p3), %v631_v1  ;;  %574 = vmatprep.mubr.msk.bf16.mxu0 (!%p230_p3), %vm632_vm0, %v631_v1  ;;  %p281_p4 = scmp.lt.s32.totalorder (!%p230_p3), %s554_s23, 5  ;;  %v564_v12 = vld [vmem:[%s712_s2] ss:$0 sm:$0xff] (!%p230_p3) }
   0x8   : > { %571 = vmatpush3.bf16.msra.mxu0 (!%p230_p3), %v604_v0 }
   0x9   : > { %572 = vmatprep.subr.bf16.mxu0 (!%p230_p3), %v631_v1 }
   0xc   : > { %573 = vmatpush3.bf16.msra.mxu0 (!%p230_p3), %v605_v2 }
   0xe   : > { %s720_s23 = smov (!%p281_p4, %s554_s23), 5 }
   0xf   : > { %s555_s24 = sshll.u32 %s720_s23, 2  ;;  %s557_s25 = sshll.u32 %s720_s23, 3 }
  0x10   : > { %s287_s28 = scalar_lea.vmem %s710_s0, %s555_s24  ;;  %s317_s5 = scalar_lea.vmem %s714_s4, %s557_s25 }
  0x11   : > { %v606_v3 = vld [vmem:[%s287_s28] sm:$0xff]   ;;  %325 = vst.msk [vmem:[%s317_s5] sm:$0xff] %vm324_vm1, %v631_v1  ;;  %326 = vst.msk [vmem:[%s317_s5 + $0x8] sm:$0xff] %vm324_vm1, %v631_v1  ;;  %s308_s8 = scalar_lea.vmem %s713_s3, %s557_s25 }
  0x12   : > { %575 = vmatmul.mubr.msk.bf16.vlgmr.msra.gmra.mrb[0].mxu0 %vm324_vm1, %v606_v3  ;;  %v415_v13 = vld [vmem:[%s308_s8] sm:$0xff]  ;;  %v416_v14 = vld [vmem:[%s308_s8 + $0x8] sm:$0xff] }
  0x18   : > { %v327_v4 = vld [vmem:[%s317_s5] sm:$0xff]  ;;  %v328_v6 = vld [vmem:[%s317_s5 + $0x8] sm:$0xff] }
  0xe5   : > { %v390_v5 = vpop.f32.mrb[0].mxu0 }
  0xe6   : > { %v397_v7 = vadd.f32 %v390_v5, %v327_v4  ;;  %v576_v8 = vpop.f32.mrb[1].mxu0 }
  0xe7   : > { %v393_v9 = vpop.f32.mrb[2].mxu0 }
  0xe8   : > { %v398_v10 = vadd.f32 %v393_v9, %v328_v6  ;;  %399 = vst.msk [vmem:[%s317_s5] sm:$0xff] %vm324_vm1, %v397_v7  ;;  %v577_v11 = vpop.f32.mrb[3].mxu0 }
  0xea   : > { %400 = vst.msk [vmem:[%s317_s5 + $0x8] sm:$0xff] %vm324_vm1, %v398_v10 }
  0xef   : > { %v404_v15 = vld [vmem:[%s317_s5] sm:$0xff] }
  0xf0   : > { %v413_v17 = vadd.f32 %v564_v12, %v404_v15 }
  0xf1   : > { %v405_v16 = vld [vmem:[%s317_s5 + $0x8] sm:$0xff] }
  0xf2   : > { %v414_v18 = vadd.f32 %v564_v12, %v405_v16  ;;  %v417_v19 = vadd.f32 %v415_v13, %v413_v17 }
  0xf4   : > { %v418_v20 = vadd.f32 %v416_v14, %v414_v18  ;;  %419 = vst.msk [vmem:[%s317_s5] sm:$0xff] %vm324_vm1, %v417_v19 }
  0xf6   : > { %420 = vst.msk [vmem:[%s317_s5 + $0x8] sm:$0xff] %vm324_vm1, %v418_v20 }
  0xf7 PF: > { %s14_s17 = sadd.s32 1, %s629_s17   ;;  %s715_s15 = smov %s625_s16 }
  0xf8   : > { %p11_p5 = scmp.ge.s32.totalorder %s14_s17, 5   ;;  %s716_s16 = smov %s718_s18 }
  0xfa   :  { %13 = sbr.rel (!%p11_p5) target bundleno = 2 (0x2), region = 83 }

// kernel: music_x_transformer_loss.11
= control target key start
LH: loop header
LB: loop body
LE: loop exit
PB: predicated region body
PF: predicated region fallthrough
CT: control target
= control target key end

     0   :  { %s571_s15 = smov 0   ;;  %s573_s16 = smov 0   ;;  %s626_s0 = inlined_call_operand.vmem [shape: f32[48,32], index: 0, kind: input, shape index: {}]   ;;  %s627_s1 = inlined_call_operand.vmem [shape: f32[1,32], index: 1, kind: input, shape index: {}]   ;;  %s628_s2 = inlined_call_operand.vmem [shape: f32[1,32], index: 2, kind: input, shape index: {}]   ;;  %s629_s3 = inlined_call_operand.vmem [shape: bf16[32,96], index: 3, kind: input, shape index: {}]   ;;  %s630_s4 = inlined_call_operand.vmem [shape: bf16[48,96], index: 4, kind: output, shape index: {}]  }
   0x1   :  { %s575_s17 = smov 0  }
   0x2 LB: > { %s26_s18 = sadd.s32 1, %s538_s16  ;;  %p461_p0 = scmp.ge.s32.totalorder %s542_s17, 1  ;;  %s542_s17 = sphi %s575_s17, %s14_s17   ;;  %s538_s16 = sphi %s573_s16, %s632_s16   ;;  %s534_s15 = sphi %s571_s15, %s631_s15  }
   0x3   : > { %p28_p1 = scmp.ge.s32.totalorder %s26_s18, 3  ;;  %p186_p2 = scmp.lt.s32.totalorder %s542_s17, 4 }
   0x5   : > { %s634_s18 = smov (%p28_p1, %s26_s18), 0  ;;  %p187_p3 = pnand %p461_p0, %p186_p2 }
   0x6   : > { %s462_s19 = sshll.u32 (!%p187_p3), %s534_s15, 1  ;;  %vm245_vm0 = vcmask (!%p187_p3), 261120   ;;  %v514_v14 = vld [vmem:[%s629_s3] sm:$0xff] (!%p187_p3)   ;;  %v544_v15 = vmov (!%p187_p3), 0.0   ;;  %v515_v16 = vld [vmem:[%s629_s3 + $0x8] sm:$0xff] (!%p187_p3)   ;;  %vm545_vm1 = vmmov (!%p187_p3), 0  }
   0x7   : > { %190 = sbr.rel (%p187_p3) target bundleno = 562 (0x232), region = 36  ;;  %p220_p4 = scmp.lt.s32.totalorder (!%p187_p3), %s462_s19, 5  ;;  %480 = vmatprep.subr.bf16.mxu0 (!%p187_p3), %v544_v15  ;;  %484 = vmatprep.mubr.msk.bf16.mxu0 (!%p187_p3), %vm545_vm1, %v544_v15  ;;  %v466_v25 = vld [vmem:[%s627_s1] ss:$0 sm:$0xff] (!%p187_p3)  ;;  %vm363_vm2 = vcmask (!%p187_p3), 781312  }
   0x8   : > { %481 = vmatpush3.bf16.msra.mxu0 (!%p187_p3), %v514_v14  ;;  %v467_v29 = vld [vmem:[%s628_s2] ss:$0 sm:$0xff] (!%p187_p3) }
   0x9   : > { %482 = vmatprep.subr.bf16.mxu0 (!%p187_p3), %v544_v15 }
   0xc   : > { %483 = vmatpush3.bf16.msra.mxu0 (!%p187_p3), %v515_v16 }
   0xe   : > { %s636_s19 = smov (!%p220_p4, %s462_s19), 5 }
   0xf   : > { %s463_s20 = sshll.u32 %s636_s19, 3  ;;  %s465_s6 = sshll.u32 %s636_s19, 2 }
  0x10   : > { %s223_s23 = scalar_lea.vmem %s626_s0, %s463_s20  ;;  %s236_s9 = scalar_lea.vmem %s630_s4, %s465_s6 }
  0x11   : > { %v243_v0 = vld [vmem:[%s223_s23] sm:$0xff]  ;;  %v244_v1 = vld [vmem:[%s223_s23 + $0x8] sm:$0xff] }
  0x12   : > { %v246_v2 = vsel %vm245_vm0, %v243_v0, 0.0  ;;  %v249_v3 = vsel %vm245_vm0, %v244_v1, 0.0 }
  0x13   : > { %247 = vadd.xlane.f32.xlu0 %v246_v2 }
  0x17   : > { %250 = vadd.xlane.f32.xlu0 %v249_v3 }
  0xa0   : > { %v248_v4 = vpop.xlane.xlu0 %247 }
  0xa1   : > { %v253_v5 = vmul.f32 0.03125, %v248_v4 }
  0xa3   : > { %v255_v6 = vsub.f32 %v243_v0, %v253_v5 }
  0xa4   : > { %v251_v7 = vpop.xlane.xlu0 %250 }
  0xa5   : > { %v254_v8 = vmul.f32 0.03125, %v251_v7  ;;  %v257_v9 = vmul.f32 %v255_v6, %v255_v6 }
  0xa7   : > { %v256_v10 = vsub.f32 %v244_v1, %v254_v8  ;;  %v259_v11 = vsel %vm245_vm0, %v257_v9, 0.0 }
  0xa8   : > { %260 = vadd.xlane.f32.xlu1 %v259_v11 }
  0xa9   : > { %v258_v12 = vmul.f32 %v256_v10, %v256_v10 }
  0xab   : > { %v262_v13 = vsel %vm245_vm0, %v258_v12, 0.0 }
  0xac   : > { %263 = vadd.xlane.f32.xlu1 %v262_v13 }
 0x135   : > { %v261_v17 = vpop.xlane.xlu1 %260 }
 0x136   : > { %v265_v18 = vmul.f32 0.03125, %v261_v17 }
 0x138   : > { %v267_v19 = vadd.f32 1e-05, %v265_v18 }
 0x139   : > { %v264_v20 = vpop.xlane.xlu1 %263 }
 0x13a   : > { %516 = vrsqrt.f32 %v267_v19  ;;  %v266_v21 = vmul.f32 0.03125, %v264_v20 }
 0x13c   : > { %v268_v22 = vadd.f32 1e-05, %v266_v21 }
 0x13e   : > { %518 = vrsqrt.f32 %v268_v22 }
 0x144   : > { %v517_v23 = vpop.eup %516 }
 0x145   : > { %v271_v24 = vmul.f32 %v517_v23, %v255_v6 }
 0x147   : > { %v280_v27 = vmul.f32 %v466_v25, %v271_v24 }
 0x148   : > { %v519_v26 = vpop.eup %518 }
 0x149   : > { %v272_v28 = vmul.f32 %v519_v26, %v256_v10  ;;  %v289_v31 = vadd.f32 %v467_v29, %v280_v27 }
 0x14b   : > { %v281_v30 = vmul.f32 %v466_v25, %v272_v28 }
 0x14d   : > { %v290_v32 = vadd.f32 %v467_v29, %v281_v30 }
 0x14f   : > { %v291_v33 = vpack.c.bf16 %v290_v32, %v289_v31 }
 0x151   : > { %292 = vst.msk [vmem:[#allocation2] sm:$0xff] %vm245_vm0, %v291_v33 }
 0x158   : > { %v293_v34 = vld [vmem:[#allocation2] sm:$0xff] }
 0x159   : > { %485 = vmatmul.mubr.msk.bf16.vlgmr.msra.gmra.mrb[0].mxu0 %vm245_vm0, %v293_v34 }
 0x22c   : > { %v348_v35 = vpop.f32.mrb[0].mxu0 }
 0x22d   : > { %v475_v36 = vpack.c.bf16 %v348_v35, %v348_v35  ;;  %v486_v37 = vpop.f32.mrb[1].mxu0 }
 0x22e   : > { %v351_v38 = vpop.f32.mrb[2].mxu0 }
 0x22f   : > { %364 = vst.msk [vmem:[%s236_s9] sm:$0xf] %vm363_vm2, %v475_v36  ;;  %v476_v39 = vpack.c.bf16 %v351_v38, %v351_v38  ;;  %v487_v40 = vpop.f32.mrb[3].mxu0 }
 0x231   : > { %365 = vst.msk [vmem:[%s236_s9 + $0x4] sm:$0xf] %vm363_vm2, %v476_v39 }
 0x232 PF: > { %s14_s17 = sadd.s32 1, %s542_s17   ;;  %s631_s15 = smov %s538_s16 }
 0x233   : > { %p11_p5 = scmp.ge.s32.totalorder %s14_s17, 5   ;;  %s632_s16 = smov %s634_s18 }
 0x235   :  { %13 = sbr.rel (!%p11_p5) target bundleno = 2 (0x2), region = 73 }

// kernel: music_x_transformer_loss.14
= control target key start
LH: loop header
LB: loop body
LE: loop exit
PB: predicated region body
PF: predicated region fallthrough
CT: control target
= control target key end

     0   :  { %s664_s18 = smov 0   ;;  %s666_s19 = smov 0   ;;  %s722_s0 = inlined_call_operand.vmem [shape: f32[48,32], index: 0, kind: input, shape index: {}]   ;;  %s723_s1 = inlined_call_operand.vmem [shape: f32[1,32], index: 1, kind: input, shape index: {}]   ;;  %s724_s2 = inlined_call_operand.vmem [shape: f32[1,32], index: 2, kind: input, shape index: {}]   ;;  %s725_s3 = inlined_call_operand.vmem [shape: bf16[32,128], index: 3, kind: input, shape index: {}]   ;;  %s726_s4 = inlined_call_operand.vmem [shape: f32[1,128], index: 4, kind: input, shape index: {}]   ;;  %s727_s5 = inlined_call_operand.vmem [shape: bf16[48,128], index: 5, kind: output, shape index: {}]  }
   0x1   :  { %s668_s20 = smov 0  }
   0x2 LB: > { %s27_s21 = sadd.s32 1, %s626_s19  ;;  %p539_p0 = scmp.ge.s32.totalorder %s630_s20, 1  ;;  %s630_s20 = sphi %s668_s20, %s15_s20   ;;  %s626_s19 = sphi %s666_s19, %s729_s19   ;;  %s622_s18 = sphi %s664_s18, %s728_s18  }
   0x3   : > { %p29_p1 = scmp.ge.s32.totalorder %s27_s21, 3  ;;  %p219_p2 = scmp.lt.s32.totalorder %s630_s20, 4 }
   0x5   : > { %s731_s21 = smov (%p29_p1, %s27_s21), 0  ;;  %p220_p3 = pnand %p539_p0, %p219_p2 }
   0x6   : > { %s540_s22 = sshll.u32 (!%p220_p3), %s622_s18, 1  ;;  %vm286_vm0 = vcmask (!%p220_p3), 261120   ;;  %v598_v14 = vld [vmem:[%s725_s3] sm:$0xff] (!%p220_p3)   ;;  %v632_v15 = vmov (!%p220_p3), 0.0   ;;  %v599_v16 = vld [vmem:[%s725_s3 + $0x8] sm:$0xff] (!%p220_p3)   ;;  %vm633_vm1 = vmmov (!%p220_p3), 0  }
   0x7   : > { %223 = sbr.rel (%p220_p3) target bundleno = 591 (0x24f), region = 40  ;;  %p258_p4 = scmp.lt.s32.totalorder (!%p220_p3), %s540_s22, 5  ;;  %564 = vmatprep.subr.bf16.mxu0 (!%p220_p3), %v632_v15  ;;  %568 = vmatprep.mubr.msk.bf16.mxu0 (!%p220_p3), %vm633_vm1, %v632_v15  ;;  %v544_v25 = vld [vmem:[%s723_s1] ss:$0 sm:$0xff] (!%p220_p3) }
   0x8   : > { %565 = vmatpush3.bf16.msra.mxu0 (!%p220_p3), %v598_v14  ;;  %v545_v29 = vld [vmem:[%s724_s2] ss:$0 sm:$0xff] (!%p220_p3) }
   0x9   : > { %566 = vmatprep.subr.bf16.mxu0 (!%p220_p3), %v632_v15  ;;  %v546_v35 = vld [vmem:[%s726_s4] ss:$0 sm:$0xff] (!%p220_p3) }
   0xc   : > { %567 = vmatpush3.bf16.msra.mxu0 (!%p220_p3), %v599_v16 }
   0xe   : > { %s733_s22 = smov (!%p258_p4, %s540_s22), 5 }
   0xf   : > { %s541_s23 = sshll.u32 %s733_s22, 3  ;;  %s543_s12 = sshll.u32 %s733_s22, 2 }
  0x10   : > { %s261_s26 = scalar_lea.vmem %s722_s0, %s541_s23  ;;  %s277_s15 = scalar_lea.vmem %s727_s5, %s543_s12 }
  0x11   : > { %v284_v0 = vld [vmem:[%s261_s26] sm:$0xff]  ;;  %v285_v1 = vld [vmem:[%s261_s26 + $0x8] sm:$0xff] }
  0x12   : > { %v287_v2 = vsel %vm286_vm0, %v284_v0, 0.0  ;;  %v290_v3 = vsel %vm286_vm0, %v285_v1, 0.0 }
  0x13   : > { %288 = vadd.xlane.f32.xlu0 %v287_v2 }
  0x17   : > { %291 = vadd.xlane.f32.xlu0 %v290_v3 }
  0xa0   : > { %v289_v4 = vpop.xlane.xlu0 %288 }
  0xa1   : > { %v294_v5 = vmul.f32 0.03125, %v289_v4 }
  0xa3   : > { %v296_v6 = vsub.f32 %v284_v0, %v294_v5 }
  0xa4   : > { %v292_v7 = vpop.xlane.xlu0 %291 }
  0xa5   : > { %v295_v8 = vmul.f32 0.03125, %v292_v7  ;;  %v298_v9 = vmul.f32 %v296_v6, %v296_v6 }
  0xa7   : > { %v297_v10 = vsub.f32 %v285_v1, %v295_v8  ;;  %v300_v11 = vsel %vm286_vm0, %v298_v9, 0.0 }
  0xa8   : > { %301 = vadd.xlane.f32.xlu1 %v300_v11 }
  0xa9   : > { %v299_v12 = vmul.f32 %v297_v10, %v297_v10 }
  0xab   : > { %v303_v13 = vsel %vm286_vm0, %v299_v12, 0.0 }
  0xac   : > { %304 = vadd.xlane.f32.xlu1 %v303_v13 }
 0x135   : > { %v302_v17 = vpop.xlane.xlu1 %301 }
 0x136   : > { %v306_v18 = vmul.f32 0.03125, %v302_v17 }
 0x138   : > { %v308_v19 = vadd.f32 1e-05, %v306_v18 }
 0x139   : > { %v305_v20 = vpop.xlane.xlu1 %304 }
 0x13a   : > { %600 = vrsqrt.f32 %v308_v19  ;;  %v307_v21 = vmul.f32 0.03125, %v305_v20 }
 0x13c   : > { %v309_v22 = vadd.f32 1e-05, %v307_v21 }
 0x13e   : > { %602 = vrsqrt.f32 %v309_v22 }
 0x144   : > { %v601_v23 = vpop.eup %600 }
 0x145   : > { %v312_v24 = vmul.f32 %v601_v23, %v296_v6 }
 0x147   : > { %v321_v27 = vmul.f32 %v544_v25, %v312_v24 }
 0x148   : > { %v603_v26 = vpop.eup %602 }
 0x149   : > { %v313_v28 = vmul.f32 %v603_v26, %v297_v10  ;;  %v330_v31 = vadd.f32 %v545_v29, %v321_v27 }
 0x14b   : > { %v322_v30 = vmul.f32 %v544_v25, %v313_v28 }
 0x14d   : > { %v331_v32 = vadd.f32 %v545_v29, %v322_v30 }
 0x14f   : > { %v332_v33 = vpack.c.bf16 %v331_v32, %v330_v31 }
 0x151   : > { %333 = vst.msk [vmem:[#allocation2] sm:$0xff] %vm286_vm0, %v332_v33 }
 0x158   : > { %v334_v34 = vld [vmem:[#allocation2] sm:$0xff] }
 0x159   : > { %569 = vmatmul.mubr.msk.bf16.vlgmr.msra.gmra.mrb[0].mxu0 %vm286_vm0, %v334_v34 }
 0x22c   : > { %v396_v36 = vpop.f32.mrb[0].mxu0 }
 0x22d   : > { %v397_v37 = vadd.f32 %v546_v35, %v396_v36  ;;  %v570_v38 = vpop.f32.mrb[1].mxu0 }
 0x22e   : > { %v399_v39 = vpop.f32.mrb[2].mxu0 }
 0x22f   : > { %v403_v40 = vmul.f32 %v397_v37, %v397_v37  ;;  %v400_v41 = vadd.f32 %v546_v35, %v399_v39  ;;  %v571_v42 = vpop.f32.mrb[3].mxu0 }
 0x231   : > { %v405_v43 = vmul.f32 %v403_v40, %v397_v37  ;;  %v404_v44 = vmul.f32 %v400_v41, %v400_v41 }
 0x233   : > { %v407_v45 = vmul.f32 0.044715, %v405_v43  ;;  %v406_v46 = vmul.f32 %v404_v44, %v400_v41 }
 0x235   : > { %v409_v47 = vadd.f32 %v407_v45, %v397_v37  ;;  %v408_v48 = vmul.f32 0.044715, %v406_v46 }
 0x237   : > { %v411_v49 = vmul.f32 0.7978846, %v409_v47  ;;  %v410_v50 = vadd.f32 %v408_v48, %v400_v41 }
 0x239   : > { %604 = vtanh.f32 %v411_v49  ;;  %v412_v51 = vmul.f32 0.7978846, %v410_v50 }
 0x23b   : > { %606 = vtanh.f32 %v412_v51 }
 0x243   : > { %v605_v52 = vpop.eup %604 }
 0x244   : > { %v415_v53 = vadd.f32 1.0, %v605_v52 }
 0x245   : > { %v607_v54 = vpop.eup %606 }
 0x246   : > { %v417_v55 = vmul.f32 0.5, %v415_v53  ;;  %v416_v56 = vadd.f32 1.0, %v607_v54 }
 0x248   : > { %v418_v57 = vmul.f32 0.5, %v416_v56  ;;  %v419_v58 = vmul.f32 %v417_v55, %v397_v37 }
 0x24a   : > { %v420_v59 = vmul.f32 %v418_v57, %v400_v41 }
 0x24c   : > { %v559_v60 = vpack.c.bf16 %v420_v59, %v419_v58 }
 0x24e   : > { %560 = vst [vmem:[%s277_s15] sm:$0xff] %v559_v60  }
 0x24f PF: > { %s15_s20 = sadd.s32 1, %s630_s20   ;;  %s728_s18 = smov %s626_s19 }
 0x250   : > { %p12_p5 = scmp.ge.s32.totalorder %s15_s20, 5   ;;  %s729_s19 = smov %s731_s21 }
 0x252   :  { %14 = sbr.rel (!%p12_p5) target bundleno = 2 (0x2), region = 80 }

// kernel: music_x_transformer_loss.12
= control target key start
LH: loop header
LB: loop body
LE: loop exit
PB: predicated region body
PF: predicated region fallthrough
CT: control target
= control target key end

     0   :  { %s1337_s9 = smov 0   ;;  %s1339_s10 = smov 0   ;;  %s1518_s0 = inlined_call_operand.vmem [shape: bf16[6,8,96], index: 0, kind: input, shape index: {}, may-alias: {0,1}]   ;;  %s1519_s1 = inlined_call_operand.vmem [shape: bf16[6,8,96], index: 1, kind: input, shape index: {}, may-alias: {0,1}]   ;;  %s1520_s2 = inlined_call_operand.vmem [shape: bf16[6,8,32], index: 2, kind: output, shape index: {}]  }
   0x1   :  { %s1341_s11 = smov 0  }
   0x2 LB: > { %s24_s12 = sadd.s32 1, %s1271_s10  ;;  %p1013_p0 = scmp.ge.s32.totalorder %s1275_s11, 1  ;;  %s1275_s11 = sphi %s1341_s11, %s12_s11   ;;  %s1271_s10 = sphi %s1339_s10, %s1522_s10   ;;  %s1267_s9 = sphi %s1337_s9, %s1521_s9  }
   0x3   : > { %p26_p1 = scmp.ge.s32.totalorder %s24_s12, 6  ;;  %p139_p2 = scmp.lt.s32.totalorder %s1275_s11, 7 }
   0x5   : > { %s1524_s12 = smov (%p26_p1, %s24_s12), 0  ;;  %p140_p3 = pnand %p1013_p0, %p139_p2 }
   0x6   : > { %p169_p4 = scmp.lt.s32.totalorder (!%p140_p3), %s1267_s9, 5  ;;  %v190_v0 = vlaneseq (!%p140_p3)  ;;  %vm197_vm0 = vcmask (!%p140_p3), 7168   ;;  %v1293_v1 = vmov (!%p140_p3), -1e+30   ;;  %v1294_v2 = vmov (!%p140_p3), 0.0   ;;  %s1383_s23 = smov (!%p140_p3), 0  }
   0x7   : > { %143 = sbr.rel (%p140_p3) target bundleno = 4067 (0xfe3), region = 28  ;;  %198 = vst.msk [vmem:[#allocation2] sm:$0xff] (!%p140_p3), %vm197_vm0, %v1293_v1  ;;  %199 = vst.msk [vmem:[#allocation3] sm:$0xff] (!%p140_p3), %vm197_vm0, %v1294_v2  ;;  %vm200_vm1 = vcmask (!%p140_p3), 64512  }
   0x8   : > { %v1359_v3 = vshrl.u32 (!%p140_p3), %v190_v0, 7  ;;  %v1361_v4 = vand.u32 (!%p140_p3), 127, %v190_v0  ;;  %201 = vst.msk [vmem:[#allocation4] sm:$0xff] (!%p140_p3), %vm200_vm1, %v1294_v2 }
   0xe   : > { %s1526_s9 = smov (!%p169_p4, %s1267_s9), 5 }
   0xf   : > { %s1014_s13 = sshll.u32 %s1526_s9, 2 }
  0x10   : > { %s1368_s16 = scalar_lea.vmem %s1518_s0, %s1014_s13  ;;  %s1373_s19 = scalar_lea.vmem %s1519_s1, %s1014_s13 }
  0x11   : > { %s1378_s22 = scalar_lea.vmem %s1520_s2, %s1014_s13  ;;  %v1381_v5 = vld [vmem:[%s1368_s16] sm:$0xf] }
  0x12 LB: >> { %v1295_v6 = vmov 0.0   ;;  %vm1296_vm2 = vmmov 0   ;;  %s1017_s24 = sshll.u32 %s1279_s23, 3  ;;  %s1297_s28 = smov 96   ;;  %v1298_v18 = vmov 0   ;;  %v269_v19 = vld [vmem:[#allocation2] sm:$0xff]  ;;  %s1279_s23 = sphi %s1383_s23, %s205_s23  }
  0x13   : >> { %1064 = vmatprep.subr.bf16.mxu0 %v1295_v6  ;;  %1066 = vmatprep.mubr.msk.bf16.mxu0 %vm1296_vm2, %v1295_v6  ;;  %s209_s25 = sshra.s32 %s1017_s24, 3  ;;  %v265_v10 = vstv %s1017_s24  ;;  %s1299_s29 = smov 64   ;;  %vm305_vm4 = vcmask 1043456   ;;  %v285_v33 = vld [vmem:[#allocation3] sm:$0xff]  ;;  %v292_v37 = vld [vmem:[#allocation4] sm:$0xff] }
  0x14   : >> { %1070 = vmatprep.subr.bf16.mxu1 %v1295_v6  ;;  %1072 = vmatprep.mubr.msk.bf16.mxu1 %vm1296_vm2, %v1295_v6  ;;  %s1018_s26 = sshll.u32 %s209_s25, 2  ;;  %v266_v11 = vadd.s32 %v265_v10, %v1361_v4  ;;  %s205_s23 = sadd.s32 1, %s1279_s23  }
  0x15   : >> { %s212_s27 = scalar_lea.vmem %s1373_s19, %s1018_s26  ;;  %1197 = vset.pattern.permute.xlu1 %v1298_v18  ;;  %1198 = vset.pattern.permute.xlu0 %v1298_v18  ;;  %p204_p5 = scmp.ge.s32.totalorder %s205_s23, 1 }
  0x16   : >> { %v1199_v7 = vld [vmem:[%s212_s27] ss:$0 sps:$4 sm:$0xff]   ;;  %vm267_vm3 = vcmp.ge.s32.totalorder %v1359_v3, %v266_v11  ;;  %v1300_v46 = vmov (%p204_p5), 0   ;;  %vm362_vm5 = vcmask (%p204_p5), 60416   ;;  %s1416_s30 = smov (%p204_p5), 0  }
  0x17   : >> { %217 = vrot.lane.b32.xlu0 %v1199_v7, %s1297_s28  ;;  %v1413_v49 = vld [vmem:[%s1368_s16] sm:$0xf] (%p204_p5) }
  0x89   : >> { %v218_v8 = vpop.permute.xlu0 %217 }
  0x8a   : >> { %v223_v9 = vsel %vm200_vm1, %v218_v8, 0 }
  0x8b   : >> { %1065 = vmatpush3.bf16.xpose.msra.mxu0 %v223_v9 }
  0x92   : >> { %1067 = vmatmul.mubr.msk.bf16.vlgmr.msra.gmra.mrb[0].mxu0 %vm200_vm1, %v1381_v5 }
 0x165   : >> { %v259_v12 = vpop.f32.mrb[0].mxu0 }
 0x166   : >> { %v268_v13 = vsel %vm267_vm3, %v259_v12, -1e+30  ;;  %v1068_v14 = vpop.f32.mrb[1].mxu0 }
 0x167   : >> { %v262_v15 = vpop.f32.mrb[2].mxu0  ;;  %v270_v16 = vsel %vm200_vm1, %v268_v13, -inf }
 0x168   : >> { %271 = vmax.xlane.f32.xlu0 %v270_v16  ;;  %v1069_v17 = vpop.f32.mrb[3].mxu0 }
 0x1f5   : >> { %v272_v20 = vpop.xlane.xlu0 %271 }
 0x1f6   : >> { %v273_v21 = vmax.f32 %v269_v19, %v272_v20 }
 0x1f8   : >> { %v274_v22 = vsub.f32 %v269_v19, %v273_v21  ;;  %351 = vst.msk [vmem:[#allocation2] sm:$0xff] %vm197_vm0, %v273_v21  ;;  %279 = vperm.xlu1 %1197, %v273_v21  }
 0x1f9   : > { %365 = vst.msk [vmem:[#allocation2] sm:$0xff] (%p204_p5), %vm197_vm0, %v1293_v1 }
 0x1fa   : >> { %v275_v23 = vmul.f32 1.442695, %v274_v22 }
 0x1fc   : >> { %1200 = vpow2.f32 %v275_v23  ;;  %300 = vrot.lane.b32.xlu1 %v1199_v7, %s1299_s29 }
 0x206   : >> { %v1201_v24 = vpop.eup %1200 }
 0x207   : >> { %295 = vperm.xlu0 %1198, %v1201_v24   ;;  %v286_v34 = vmul.f32 %v1201_v24, %v285_v33 }
 0x20b   : > { %1204 = vset.pattern.permute.xlu0 (%p204_p5), %v1300_v46 }
 0x277   : >> { %v280_v25 = vpop.permute.xlu1 %279 }
 0x278   : >> { %v282_v26 = vsub.f32 %v268_v13, %v280_v25 }
 0x27a   : >> { %v283_v27 = vmul.f32 1.442695, %v282_v26 }
 0x27b   : >> { %v301_v28 = vpop.permute.xlu1 %300 }
 0x27c   : >> { %1202 = vpow2.f32 %v283_v27  ;;  %v307_v29 = vsel %vm305_vm4, %v301_v28, 0 }
 0x27d   : >> { %1071 = vmatpush3.bf16.msra.mxu1 %v307_v29 }
 0x286   : >> { %v1203_v30 = vpop.eup %1202  ;;  %v296_v38 = vpop.permute.xlu0 %295 }
 0x287   : >> { %v287_v31 = vsel %vm200_vm1, %v1203_v30, 0.0  ;;  %v299_v32 = vpack.c.bf16 %v1203_v30, %v1203_v30  ;;  %v298_v39 = vmul.f32 %v296_v38, %v292_v37 }
 0x288   : >> { %288 = vadd.xlane.f32.xlu1 %v287_v31 }
 0x289   : >> { %1073 = vmatmul.mubr.msk.bf16.vlgmr.msra.gmra.mrb[0].mxu1 %vm200_vm1, %v299_v32 }
 0x315   : >> { %v289_v35 = vpop.xlane.xlu1 %288 }
 0x316   : >> { %v290_v36 = vadd.f32 %v289_v35, %v286_v34 }
 0x318   : >> { %291 = vst.msk [vmem:[#allocation3] sm:$0xff] %vm197_vm0, %v290_v36 }
 0x31f   : > { %v353_v45 = vld [vmem:[#allocation3] sm:$0xff] (%p204_p5) }
 0x320   : > { %1205 = vrcp.f32 (%p204_p5), %v353_v45  ;;  %366 = vst.msk [vmem:[#allocation3] sm:$0xff] (%p204_p5), %vm197_vm0, %v1294_v2 }
 0x32a   : > { %v1206_v47 = vpop.eup (%p204_p5), %1205 }
 0x32b   : > { %357 = vperm.xlu0 (%p204_p5), %1204, %v1206_v47  }
 0x359   : > { %207 = sbr.rel (!%p204_p5) target bundleno = 18 (0x12), region = 93 }
 0x35c   : >> { %v343_v40 = vpop.f32.mrb[0].mxu1 }
 0x35d   : >> { %v349_v41 = vadd.f32 %v343_v40, %v298_v39  ;;  %v1074_v42 = vpop.f32.mrb[1].mxu1 }
 0x35e   : >> { %v346_v43 = vpop.f32.mrb[2].mxu1 }
 0x35f   : >> { %350 = vst.msk [vmem:[#allocation4] sm:$0xff] %vm200_vm1, %v349_v41  ;;  %v1075_v44 = vpop.f32.mrb[3].mxu1 }
 0x366   : > { %v352_v48 = vld [vmem:[#allocation4] sm:$0xff] }
 0x367   : > { %367 = vst.msk [vmem:[#allocation4] sm:$0xff] %vm200_vm1, %v1294_v2 }
 0x3aa   : > { %v358_v50 = vpop.permute.xlu0 %357 }
 0x3ab   : > { %v360_v51 = vmul.f32 %v358_v50, %v352_v48 }
 0x3ad   : > { %v361_v52 = vpack.c.bf16 %v360_v51, %v360_v51 }
 0x3af   : > { %363 = vst.msk [vmem:[%s1378_s22] sm:$0xf] %vm362_vm5, %v361_v52 }
 0x3b0 LB: >> { %v1301_v53 = vmov 0.0   ;;  %vm1302_vm6 = vmmov 0   ;;  %s1022_s3 = sshll.u32 %s1283_s30, 3  ;;  %s1303_s7 = smov 88   ;;  %v1024_v55 = vcombine.low %v1413_v49, %v1413_v49  ;;  %v1305_v7 = vmov 0   ;;  %v440_v8 = vld [vmem:[#allocation2] sm:$0xff]  ;;  %s1283_s30 = sphi %s1416_s30, %s371_s30  }
 0x3b1   : >> { %1076 = vmatprep.subr.bf16.mxu0 %v1301_v53  ;;  %1078 = vmatprep.mubr.msk.bf16.mxu0 %vm1302_vm6, %v1301_v53  ;;  %s375_s4 = sshra.s32 %s1022_s3, 3  ;;  %s1304_s8 = smov 120   ;;  %v436_v59 = vstv %s1022_s3  ;;  %v456_v22 = vld [vmem:[#allocation3] sm:$0xff]  ;;  %v463_v26 = vld [vmem:[#allocation4] sm:$0xff] }
 0x3b2   : >> { %1082 = vmatprep.subr.bf16.mxu1 %v1301_v53  ;;  %1084 = vmatprep.mubr.msk.bf16.mxu1 %vm1302_vm6, %v1301_v53  ;;  %s1023_s5 = sshll.u32 %s375_s4, 2  ;;  %v437_v60 = vadd.s32 %v436_v59, %v1361_v4  ;;  %s1306_s9 = smov 56  }
 0x3b3   : >> { %s378_s6 = scalar_lea.vmem %s1373_s19, %s1023_s5  ;;  %1207 = vset.pattern.permute.xlu1 %v1305_v7  ;;  %1208 = vset.pattern.permute.xlu0 %v1305_v7  ;;  %s371_s30 = sadd.s32 1, %s1283_s30  }
 0x3b4   : >> { %v1209_v54 = vld [vmem:[%s378_s6] ss:$0 sps:$4 sm:$0xff]   ;;  %vm438_vm7 = vcmp.ge.s32.totalorder %v1359_v3, %v437_v60  ;;  %p370_p6 = scmp.ge.s32.totalorder %s371_s30, 1 }
 0x3b5   : >> { %388 = vrot.lane.b32.xlu0 %v1209_v54, %s1303_s7  ;;  %v1447_v37 = vld [vmem:[%s1368_s16] sm:$0xf] (%p370_p6)  ;;  %s1307_s13 = smov (%p370_p6), 8   ;;  %vm539_vm8 = vcmask (%p370_p6), 126016   ;;  %s1450_s14 = smov (%p370_p6), 0  }
 0x3b6   : > { %1214 = vset.pattern.permute.xlu0 (%p370_p6), %v1300_v46 }
 0x3b9   : >> { %383 = vrot.lane.b32.xlu0 %v1024_v55, %s1304_s8 }
 0x3bd   : >> { %471 = vrot.lane.b32.xlu0 %v1209_v54, %s1306_s9 }
 0x427   : >> { %v389_v56 = vpop.permute.xlu0 %388 }
 0x428   : >> { %v394_v57 = vsel %vm200_vm1, %v389_v56, 0 }
 0x429   : >> { %1077 = vmatpush3.bf16.xpose.msra.mxu0 %v394_v57 }
 0x42b   : >> { %v384_v58 = vpop.permute.xlu0 %383 }
 0x42f   : >> { %v472_v13 = vpop.permute.xlu0 %471 }
 0x430   : >> { %1079 = vmatmul.mubr.msk.bf16.vlgmr.msra.gmra.mrb[0].mxu0 %vm200_vm1, %v384_v58  ;;  %v478_v14 = vsel %vm305_vm4, %v472_v13, 0 }
 0x431   : >> { %1083 = vmatpush3.bf16.msra.mxu1 %v478_v14 }
 0x503   : >> { %v430_v61 = vpop.f32.mrb[0].mxu0 }
 0x504   : >> { %v439_v62 = vsel %vm438_vm7, %v430_v61, -1e+30  ;;  %v1080_v63 = vpop.f32.mrb[1].mxu0 }
 0x505   : >> { %v433_v0 = vpop.f32.mrb[2].mxu0  ;;  %v441_v5 = vsel %vm200_vm1, %v439_v62, -inf }
 0x506   : >> { %442 = vmax.xlane.f32.xlu1 %v441_v5  ;;  %v1081_v6 = vpop.f32.mrb[3].mxu0 }
 0x593   : >> { %v443_v9 = vpop.xlane.xlu1 %442 }
 0x594   : >> { %v444_v10 = vmax.f32 %v440_v8, %v443_v9 }
 0x596   : >> { %v445_v11 = vsub.f32 %v440_v8, %v444_v10  ;;  %522 = vst.msk [vmem:[#allocation2] sm:$0xff] %vm197_vm0, %v444_v10  ;;  %450 = vperm.xlu1 %1207, %v444_v10  }
 0x597   : > { %542 = vst.msk [vmem:[#allocation2] sm:$0xff] (%p370_p6), %vm197_vm0, %v1293_v1 }
 0x598   : >> { %v446_v12 = vmul.f32 1.442695, %v445_v11 }
 0x59a   : >> { %1210 = vpow2.f32 %v446_v12 }
 0x5a4   : >> { %v1211_v15 = vpop.eup %1210 }
 0x5a5   : >> { %466 = vperm.xlu1 %1207, %v1211_v15   ;;  %v457_v23 = vmul.f32 %v1211_v15, %v456_v22 }
 0x615   : >> { %v451_v16 = vpop.permute.xlu1 %450 }
 0x616   : >> { %v453_v17 = vsub.f32 %v439_v62, %v451_v16 }
 0x618   : >> { %v454_v18 = vmul.f32 1.442695, %v453_v17 }
 0x61a   : >> { %1212 = vpow2.f32 %v454_v18 }
 0x624   : >> { %v1213_v19 = vpop.eup %1212  ;;  %v467_v27 = vpop.permute.xlu1 %466 }
 0x625   : >> { %v458_v20 = vsel %vm200_vm1, %v1213_v19, 0.0  ;;  %v470_v21 = vpack.c.bf16 %v1213_v19, %v1213_v19  ;;  %v469_v28 = vmul.f32 %v467_v27, %v463_v26 }
 0x626   : >> { %459 = vadd.xlane.f32.xlu0 %v458_v20 }
 0x627   : >> { %1085 = vmatmul.mubr.msk.bf16.vlgmr.msra.gmra.mrb[0].mxu1 %vm200_vm1, %v470_v21 }
 0x6b3   : >> { %v460_v24 = vpop.xlane.xlu0 %459 }
 0x6b4   : >> { %v461_v25 = vadd.f32 %v460_v24, %v457_v23 }
 0x6b6   : >> { %462 = vst.msk [vmem:[#allocation3] sm:$0xff] %vm197_vm0, %v461_v25 }
 0x6bd   : > { %v524_v34 = vld [vmem:[#allocation3] sm:$0xff] (%p370_p6) }
 0x6be   : > { %1215 = vrcp.f32 (%p370_p6), %v524_v34  ;;  %543 = vst.msk [vmem:[#allocation3] sm:$0xff] (%p370_p6), %vm197_vm0, %v1294_v2 }
 0x6c8   : > { %v1216_v35 = vpop.eup (%p370_p6), %1215 }
 0x6c9   : > { %528 = vperm.xlu0 (%p370_p6), %1214, %v1216_v35  }
 0x6f7   : > { %373 = sbr.rel (!%p370_p6) target bundleno = 944 (0x3b0), region = 104 }
 0x6fa   : >> { %v514_v29 = vpop.f32.mrb[0].mxu1 }
 0x6fb   : >> { %v520_v30 = vadd.f32 %v514_v29, %v469_v28  ;;  %v1086_v31 = vpop.f32.mrb[1].mxu1 }
 0x6fc   : >> { %v517_v32 = vpop.f32.mrb[2].mxu1 }
 0x6fd   : >> { %521 = vst.msk [vmem:[#allocation4] sm:$0xff] %vm200_vm1, %v520_v30  ;;  %v1087_v33 = vpop.f32.mrb[3].mxu1 }
 0x704   : > { %v523_v36 = vld [vmem:[#allocation4] sm:$0xff] }
 0x705   : > { %544 = vst.msk [vmem:[#allocation4] sm:$0xff] %vm200_vm1, %v1294_v2 }
 0x748   : > { %v529_v38 = vpop.permute.xlu0 %528 }
 0x749   : > { %v531_v39 = vmul.f32 %v529_v38, %v523_v36 }
 0x74b   : > { %v1045_v40 = vpack.c.bf16 %v531_v39, %v531_v39 }
 0x74d   : > { %536 = vrot.lane.b32.xlu0 %v1045_v40, %s1307_s13 }
 0x7bf   : > { %v537_v41 = vpop.permute.xlu0 %536 }
 0x7c0   : > { %540 = vst.msk [vmem:[%s1378_s22] sm:$0xf] %vm539_vm8, %v537_v41 }
 0x7c1 LB: >> { %v1308_v42 = vmov 0.0   ;;  %vm1309_vm9 = vmmov 0   ;;  %s1029_s15 = sshll.u32 %s1287_s14, 3  ;;  %s1310_s21 = smov 80   ;;  %v1031_v44 = vcombine.low %v1447_v37, %v1447_v37  ;;  %v1312_v57 = vmov 0   ;;  %v617_v58 = vld [vmem:[#allocation2] sm:$0xff]  ;;  %s1287_s14 = sphi %s1450_s14, %s548_s14  }
 0x7c2   : >> { %1088 = vmatprep.subr.bf16.mxu0 %v1308_v42  ;;  %1090 = vmatprep.mubr.msk.bf16.mxu0 %vm1309_vm9, %v1308_v42  ;;  %s552_s17 = sshra.s32 %s1029_s15, 3  ;;  %s1311_s23 = smov 112   ;;  %v613_v49 = vstv %s1029_s15  ;;  %v633_v12 = vld [vmem:[#allocation3] sm:$0xff]  ;;  %v640_v16 = vld [vmem:[#allocation4] sm:$0xff] }
 0x7c3   : >> { %1094 = vmatprep.subr.bf16.mxu1 %v1308_v42  ;;  %1096 = vmatprep.mubr.msk.bf16.mxu1 %vm1309_vm9, %v1308_v42  ;;  %s1030_s18 = sshll.u32 %s552_s17, 2  ;;  %v614_v50 = vadd.s32 %v613_v49, %v1361_v4  ;;  %s1313_s24 = smov 48  }
 0x7c4   : >> { %s555_s20 = scalar_lea.vmem %s1373_s19, %s1030_s18  ;;  %1217 = vset.pattern.permute.xlu1 %v1312_v57  ;;  %1218 = vset.pattern.permute.xlu0 %v1312_v57  ;;  %s548_s14 = sadd.s32 1, %s1287_s14  }
 0x7c5   : >> { %v1219_v43 = vld [vmem:[%s555_s20] ss:$0 sps:$4 sm:$0xff]   ;;  %vm615_vm10 = vcmp.ge.s32.totalorder %v1359_v3, %v614_v50  ;;  %p547_p7 = scmp.ge.s32.totalorder %s548_s14, 1 }
 0x7c6   : >> { %565 = vrot.lane.b32.xlu0 %v1219_v43, %s1310_s21  ;;  %v1481_v27 = vld [vmem:[%s1368_s16] sm:$0xf] (%p547_p7)  ;;  %s1314_s25 = smov (%p547_p7), 16   ;;  %vm716_vm11 = vcmask (%p547_p7), 191616   ;;  %s1484_s26 = smov (%p547_p7), 0  }
 0x7c7   : > { %1224 = vset.pattern.permute.xlu0 (%p547_p7), %v1300_v46 }
 0x7ca   : >> { %560 = vrot.lane.b32.xlu0 %v1031_v44, %s1311_s23 }
 0x7ce   : >> { %648 = vrot.lane.b32.xlu0 %v1219_v43, %s1313_s24 }
 0x838   : >> { %v566_v45 = vpop.permute.xlu0 %565 }
 0x839   : >> { %v571_v47 = vsel %vm200_vm1, %v566_v45, 0 }
 0x83a   : >> { %1089 = vmatpush3.bf16.xpose.msra.mxu0 %v571_v47 }
 0x83c   : >> { %v561_v48 = vpop.permute.xlu0 %560 }
 0x840   : >> { %v649_v63 = vpop.permute.xlu0 %648 }
 0x841   : >> { %1091 = vmatmul.mubr.msk.bf16.vlgmr.msra.gmra.mrb[0].mxu0 %vm200_vm1, %v561_v48  ;;  %v655_v0 = vsel %vm305_vm4, %v649_v63, 0 }
 0x842   : >> { %1095 = vmatpush3.bf16.msra.mxu1 %v655_v0 }
 0x914   : >> { %v607_v51 = vpop.f32.mrb[0].mxu0 }
 0x915   : >> { %v616_v52 = vsel %vm615_vm10, %v607_v51, -1e+30  ;;  %v1092_v53 = vpop.f32.mrb[1].mxu0 }
 0x916   : >> { %v610_v54 = vpop.f32.mrb[2].mxu0  ;;  %v618_v55 = vsel %vm200_vm1, %v616_v52, -inf }
 0x917   : >> { %619 = vmax.xlane.f32.xlu1 %v618_v55  ;;  %v1093_v56 = vpop.f32.mrb[3].mxu0 }
 0x9a4   : >> { %v620_v59 = vpop.xlane.xlu1 %619 }
 0x9a5   : >> { %v621_v60 = vmax.f32 %v617_v58, %v620_v59 }
 0x9a7   : >> { %v622_v61 = vsub.f32 %v617_v58, %v621_v60  ;;  %699 = vst.msk [vmem:[#allocation2] sm:$0xff] %vm197_vm0, %v621_v60  ;;  %627 = vperm.xlu1 %1217, %v621_v60  }
 0x9a8   : > { %719 = vst.msk [vmem:[#allocation2] sm:$0xff] (%p547_p7), %vm197_vm0, %v1293_v1 }
 0x9a9   : >> { %v623_v62 = vmul.f32 1.442695, %v622_v61 }
 0x9ab   : >> { %1220 = vpow2.f32 %v623_v62 }
 0x9b5   : >> { %v1221_v5 = vpop.eup %1220 }
 0x9b6   : >> { %643 = vperm.xlu1 %1217, %v1221_v5   ;;  %v634_v13 = vmul.f32 %v1221_v5, %v633_v12 }
 0xa26   : >> { %v628_v6 = vpop.permute.xlu1 %627 }
 0xa27   : >> { %v630_v7 = vsub.f32 %v616_v52, %v628_v6 }
 0xa29   : >> { %v631_v8 = vmul.f32 1.442695, %v630_v7 }
 0xa2b   : >> { %1222 = vpow2.f32 %v631_v8 }
 0xa35   : >> { %v1223_v9 = vpop.eup %1222  ;;  %v644_v17 = vpop.permute.xlu1 %643 }
 0xa36   : >> { %v635_v10 = vsel %vm200_vm1, %v1223_v9, 0.0  ;;  %v647_v11 = vpack.c.bf16 %v1223_v9, %v1223_v9  ;;  %v646_v18 = vmul.f32 %v644_v17, %v640_v16 }
 0xa37   : >> { %636 = vadd.xlane.f32.xlu0 %v635_v10 }
 0xa38   : >> { %1097 = vmatmul.mubr.msk.bf16.vlgmr.msra.gmra.mrb[0].mxu1 %vm200_vm1, %v647_v11 }
 0xac4   : >> { %v637_v14 = vpop.xlane.xlu0 %636 }
 0xac5   : >> { %v638_v15 = vadd.f32 %v637_v14, %v634_v13 }
 0xac7   : >> { %639 = vst.msk [vmem:[#allocation3] sm:$0xff] %vm197_vm0, %v638_v15 }
 0xace   : > { %v701_v24 = vld [vmem:[#allocation3] sm:$0xff] (%p547_p7) }
 0xacf   : > { %1225 = vrcp.f32 (%p547_p7), %v701_v24  ;;  %720 = vst.msk [vmem:[#allocation3] sm:$0xff] (%p547_p7), %vm197_vm0, %v1294_v2 }
 0xad9   : > { %v1226_v25 = vpop.eup (%p547_p7), %1225 }
 0xada   : > { %705 = vperm.xlu0 (%p547_p7), %1224, %v1226_v25  }
 0xb08   : > { %550 = sbr.rel (!%p547_p7) target bundleno = 1985 (0x7c1), region = 115 }
 0xb0b   : >> { %v691_v19 = vpop.f32.mrb[0].mxu1 }
 0xb0c   : >> { %v697_v20 = vadd.f32 %v691_v19, %v646_v18  ;;  %v1098_v21 = vpop.f32.mrb[1].mxu1 }
 0xb0d   : >> { %v694_v22 = vpop.f32.mrb[2].mxu1 }
 0xb0e   : >> { %698 = vst.msk [vmem:[#allocation4] sm:$0xff] %vm200_vm1, %v697_v20  ;;  %v1099_v23 = vpop.f32.mrb[3].mxu1 }
 0xb15   : > { %v700_v26 = vld [vmem:[#allocation4] sm:$0xff] }
 0xb16   : > { %721 = vst.msk [vmem:[#allocation4] sm:$0xff] %vm200_vm1, %v1294_v2 }
 0xb59   : > { %v706_v28 = vpop.permute.xlu0 %705 }
 0xb5a   : > { %v708_v29 = vmul.f32 %v706_v28, %v700_v26 }
 0xb5c   : > { %v1046_v30 = vpack.c.bf16 %v708_v29, %v708_v29 }
 0xb5e   : > { %713 = vrot.lane.b32.xlu0 %v1046_v30, %s1314_s25 }
 0xbd0   : > { %v714_v31 = vpop.permute.xlu0 %713 }
 0xbd1   : > { %717 = vst.msk [vmem:[%s1378_s22] sm:$0xf] %vm716_vm11, %v714_v31 }
 0xbd2 LB: >> { %v1315_v1 = vmov 0.0   ;;  %vm1316_vm12 = vmmov 0   ;;  %s1036_s16 = sshll.u32 %s1291_s26, 3  ;;  %s1317_s30 = smov 72   ;;  %v1038_v32 = vcombine.low %v1481_v27, %v1481_v27  ;;  %v1319_v44 = vmov 0   ;;  %v794_v45 = vld [vmem:[#allocation2] sm:$0xff]  ;;  %s1291_s26 = sphi %s1484_s26, %s725_s26  }
 0xbd3   : >> { %1100 = vmatprep.subr.bf16.mxu0 %v1315_v1  ;;  %1102 = vmatprep.mubr.msk.bf16.mxu0 %vm1316_vm12, %v1315_v1  ;;  %s729_s27 = sshra.s32 %s1036_s16, 3  ;;  %s1318_s3 = smov 104   ;;  %v790_v36 = vstv %s1036_s16  ;;  %v810_v60 = vld [vmem:[#allocation3] sm:$0xff]  ;;  %v817_v0 = vld [vmem:[#allocation4] sm:$0xff] }
 0xbd4   : >> { %1106 = vmatprep.subr.bf16.mxu1 %v1315_v1  ;;  %1108 = vmatprep.mubr.msk.bf16.mxu1 %vm1316_vm12, %v1315_v1  ;;  %s1037_s28 = sshll.u32 %s729_s27, 2  ;;  %v791_v37 = vadd.s32 %v790_v36, %v1361_v4  ;;  %s1320_s4 = smov 40  }
 0xbd5   : >> { %s732_s29 = scalar_lea.vmem %s1373_s19, %s1037_s28  ;;  %1227 = vset.pattern.permute.xlu1 %v1319_v44  ;;  %1228 = vset.pattern.permute.xlu0 %v1319_v44  ;;  %s725_s26 = sadd.s32 1, %s1291_s26  }
 0xbd6   : >> { %v1229_v2 = vld [vmem:[%s732_s29] ss:$0 sps:$4 sm:$0xff]   ;;  %vm792_vm13 = vcmp.ge.s32.totalorder %v1359_v3, %v791_v37  ;;  %p724_p8 = scmp.ge.s32.totalorder %s725_s26, 1 }
 0xbd7   : >> { %742 = vrot.lane.b32.xlu0 %v1229_v2, %s1317_s30  ;;  %s1321_s5 = smov (%p724_p8), 24   ;;  %vm893_vm14 = vcmask (%p724_p8), 257216  }
 0xbd8   : > { %1234 = vset.pattern.permute.xlu0 (%p724_p8), %v1300_v46 }
 0xbdb   : >> { %737 = vrot.lane.b32.xlu0 %v1038_v32, %s1318_s3 }
 0xbdf   : >> { %825 = vrot.lane.b32.xlu0 %v1229_v2, %s1320_s4 }
 0xc49   : >> { %v743_v33 = vpop.permute.xlu0 %742 }
 0xc4a   : >> { %v748_v34 = vsel %vm200_vm1, %v743_v33, 0 }
 0xc4b   : >> { %1101 = vmatpush3.bf16.xpose.msra.mxu0 %v748_v34 }
 0xc4d   : >> { %v738_v35 = vpop.permute.xlu0 %737 }
 0xc51   : >> { %v826_v51 = vpop.permute.xlu0 %825 }
 0xc52   : >> { %1103 = vmatmul.mubr.msk.bf16.vlgmr.msra.gmra.mrb[0].mxu0 %vm200_vm1, %v738_v35  ;;  %v832_v52 = vsel %vm305_vm4, %v826_v51, 0 }
 0xc53   : >> { %1107 = vmatpush3.bf16.msra.mxu1 %v832_v52 }
 0xd25   : >> { %v784_v38 = vpop.f32.mrb[0].mxu0 }
 0xd26   : >> { %v793_v39 = vsel %vm792_vm13, %v784_v38, -1e+30  ;;  %v1104_v40 = vpop.f32.mrb[1].mxu0 }
 0xd27   : >> { %v787_v41 = vpop.f32.mrb[2].mxu0  ;;  %v795_v42 = vsel %vm200_vm1, %v793_v39, -inf }
 0xd28   : >> { %796 = vmax.xlane.f32.xlu1 %v795_v42  ;;  %v1105_v43 = vpop.f32.mrb[3].mxu0 }
 0xdb5   : >> { %v797_v47 = vpop.xlane.xlu1 %796 }
 0xdb6   : >> { %v798_v48 = vmax.f32 %v794_v45, %v797_v47 }
 0xdb8   : >> { %v799_v49 = vsub.f32 %v794_v45, %v798_v48  ;;  %876 = vst.msk [vmem:[#allocation2] sm:$0xff] %vm197_vm0, %v798_v48  ;;  %804 = vperm.xlu1 %1227, %v798_v48  }
 0xdba   : >> { %v800_v50 = vmul.f32 1.442695, %v799_v49 }
 0xdbc   : >> { %1230 = vpow2.f32 %v800_v50 }
 0xdc6   : >> { %v1231_v53 = vpop.eup %1230 }
 0xdc7   : >> { %820 = vperm.xlu1 %1227, %v1231_v53   ;;  %v811_v61 = vmul.f32 %v1231_v53, %v810_v60 }
 0xe37   : >> { %v805_v54 = vpop.permute.xlu1 %804 }
 0xe38   : >> { %v807_v55 = vsub.f32 %v793_v39, %v805_v54 }
 0xe3a   : >> { %v808_v56 = vmul.f32 1.442695, %v807_v55 }
 0xe3c   : >> { %1232 = vpow2.f32 %v808_v56 }
 0xe46   : >> { %v1233_v57 = vpop.eup %1232  ;;  %v821_v5 = vpop.permute.xlu1 %820 }
 0xe47   : >> { %v812_v58 = vsel %vm200_vm1, %v1233_v57, 0.0  ;;  %v824_v59 = vpack.c.bf16 %v1233_v57, %v1233_v57  ;;  %v823_v6 = vmul.f32 %v821_v5, %v817_v0 }
 0xe48   : >> { %813 = vadd.xlane.f32.xlu0 %v812_v58 }
 0xe49   : >> { %1109 = vmatmul.mubr.msk.bf16.vlgmr.msra.gmra.mrb[0].mxu1 %vm200_vm1, %v824_v59 }
 0xed5   : >> { %v814_v62 = vpop.xlane.xlu0 %813 }
 0xed6   : >> { %v815_v63 = vadd.f32 %v814_v62, %v811_v61 }
 0xed8   : >> { %816 = vst.msk [vmem:[#allocation3] sm:$0xff] %vm197_vm0, %v815_v63 }
 0xedf   : > { %v878_v12 = vld [vmem:[#allocation3] sm:$0xff] (%p724_p8) }
 0xee0   : > { %1235 = vrcp.f32 (%p724_p8), %v878_v12 }
 0xeea   : > { %v1236_v13 = vpop.eup (%p724_p8), %1235 }
 0xeeb   : > { %882 = vperm.xlu0 (%p724_p8), %1234, %v1236_v13  }
 0xf19   : > { %727 = sbr.rel (!%p724_p8) target bundleno = 3026 (0xbd2), region = 126 }
 0xf1c   : >> { %v868_v7 = vpop.f32.mrb[0].mxu1 }
 0xf1d   : >> { %v874_v8 = vadd.f32 %v868_v7, %v823_v6  ;;  %v1110_v9 = vpop.f32.mrb[1].mxu1 }
 0xf1e   : >> { %v871_v10 = vpop.f32.mrb[2].mxu1 }
 0xf1f   : >> { %875 = vst.msk [vmem:[#allocation4] sm:$0xff] %vm200_vm1, %v874_v8  ;;  %v1111_v11 = vpop.f32.mrb[3].mxu1 }
 0xf26   : > { %v877_v14 = vld [vmem:[#allocation4] sm:$0xff] }
 0xf6a   : > { %v883_v15 = vpop.permute.xlu0 %882 }
 0xf6b   : > { %v885_v16 = vmul.f32 %v883_v15, %v877_v14 }
 0xf6d   : > { %v1047_v17 = vpack.c.bf16 %v885_v16, %v885_v16 }
 0xf6f   : > { %890 = vrot.lane.b32.xlu0 %v1047_v17, %s1321_s5 }
 0xfe1   : > { %v891_v18 = vpop.permute.xlu0 %890 }
 0xfe2   : > { %894 = vst.msk [vmem:[%s1378_s22] sm:$0xf] %vm893_vm14, %v891_v18 }
 0xfe3 PF: > { %s12_s11 = sadd.s32 1, %s1275_s11   ;;  %s1521_s9 = smov %s1271_s10 }
 0xfe4   : > { %p9_p9 = scmp.ge.s32.totalorder %s12_s11, 8   ;;  %s1522_s10 = smov %s1524_s12 }
 0xfe6   :  { %11 = sbr.rel (!%p9_p9) target bundleno = 2 (0x2), region = 137 }

// kernel: music_x_transformer_loss.15
= control target key start
LH: loop header
LB: loop body
LE: loop exit
PB: predicated region body
PF: predicated region fallthrough
CT: control target
= control target key end

     0   :  { %s733_s15 = smov 0   ;;  %s735_s16 = smov 0   ;;  %s822_s0 = inlined_call_operand.vmem [shape: bf16[48,128], index: 0, kind: input, shape index: {}]   ;;  %s823_s1 = inlined_call_operand.vmem [shape: bf16[128,32], index: 1, kind: input, shape index: {}]   ;;  %s824_s2 = inlined_call_operand.vmem [shape: f32[1,32], index: 2, kind: input, shape index: {}]   ;;  %s825_s3 = inlined_call_operand.vmem [shape: f32[48,32], index: 3, kind: input, shape index: {}]   ;;  %s826_s4 = inlined_call_operand.vmem [shape: f32[48,32], index: 4, kind: output, shape index: {}]  }
   0x1   :  { %s737_s17 = smov 0  }
   0x2 LB: > { %s33_s18 = sadd.s32 1, %s700_s16  ;;  %p599_p0 = scmp.ge.s32.totalorder %s704_s17, 1  ;;  %s704_s17 = sphi %s737_s17, %s14_s17   ;;  %s700_s16 = sphi %s735_s16, %s828_s16   ;;  %s696_s15 = sphi %s733_s15, %s827_s15  }
   0x3   : > { %p35_p1 = scmp.ge.s32.totalorder %s33_s18, 3  ;;  %p229_p2 = scmp.lt.s32.totalorder %s704_s17, 4 }
   0x5   : > { %s830_s18 = smov (%p35_p1, %s33_s18), 0  ;;  %p230_p3 = pnand %p599_p0, %p229_p2 }
   0x6   : > { %v673_v0 = vld [vmem:[%s823_s1] sm:$0xff] (!%p230_p3)   ;;  %v706_v1 = vmov (!%p230_p3), 0.0   ;;  %v674_v2 = vld [vmem:[%s823_s1 + $0x8] sm:$0xff] (!%p230_p3)   ;;  %vm707_vm0 = vmmov (!%p230_p3), 0   ;;  %s600_s23 = sshll.u32 (!%p230_p3), %s696_s15, 1  ;;  %v675_v3 = vld [vmem:[%s823_s1 + $0x10] sm:$0xff] (!%p230_p3)  }
   0x7   : > { %233 = sbr.rel (%p230_p3) target bundleno = 268 (0x10c), region = 36  ;;  %627 = vmatprep.subr.bf16.mxu0 (!%p230_p3), %v706_v1  ;;  %643 = vmatprep.mubr.msk.bf16.mxu0 (!%p230_p3), %vm707_vm0, %v706_v1  ;;  %p281_p4 = scmp.lt.s32.totalorder (!%p230_p3), %s600_s23, 5  ;;  %vm324_vm1 = vcmask (!%p230_p3), 261120   ;;  %v676_v4 = vld [vmem:[%s823_s1 + $0x18] sm:$0xff] (!%p230_p3)   ;;  %v677_v5 = vld [vmem:[%s823_s1 + $0x20] sm:$0xff] (!%p230_p3)   ;;  %v678_v6 = vld [vmem:[%s823_s1 + $0x28] sm:$0xff] (!%p230_p3)  }
   0x8   : > { %628 = vmatpush3.bf16.msra.mxu0 (!%p230_p3), %v673_v0  ;;  %v679_v7 = vld [vmem:[%s823_s1 + $0x30] sm:$0xff] (!%p230_p3)   ;;  %v680_v8 = vld [vmem:[%s823_s1 + $0x38] sm:$0xff] (!%p230_p3)   ;;  %v615_v18 = vld [vmem:[%s824_s2] ss:$0 sm:$0xff] (!%p230_p3) }
   0x9   : > { %629 = vmatprep.subr.bf16.mxu0 (!%p230_p3), %v706_v1 }
   0xc   : > { %630 = vmatpush3.bf16.msra.mxu0 (!%p230_p3), %v674_v2 }
   0xd   : > { %631 = vmatprep.subr.bf16.mxu0 (!%p230_p3), %v706_v1 }
   0xe   : > { %s832_s23 = smov (!%p281_p4, %s600_s23), 5 }
   0xf   : > { %s601_s26 = sshll.u32 %s832_s23, 2  ;;  %s603_s30 = sshll.u32 %s832_s23, 3 }
  0x10   : > { %s287_s29 = scalar_lea.vmem %s822_s0, %s601_s26  ;;  %s772_s7 = scalar_lea.vmem %s826_s4, %s603_s30  ;;  %632 = vmatpush3.bf16.msra.mxu0 %v675_v3 }
  0x11   : > { %325 = vst.msk [vmem:[%s772_s7] sm:$0xff] %vm324_vm1, %v706_v1  ;;  %633 = vmatprep.subr.bf16.mxu0 %v706_v1  ;;  %326 = vst.msk [vmem:[%s772_s7 + $0x8] sm:$0xff] %vm324_vm1, %v706_v1  ;;  %v681_v9 = vld [vmem:[%s287_s29] sm:$0xff]   ;;  %s308_s24 = scalar_lea.vmem %s825_s3, %s603_s30 }
  0x12   : > { %v461_v19 = vld [vmem:[%s308_s24] sm:$0xff]  ;;  %v462_v20 = vld [vmem:[%s308_s24 + $0x8] sm:$0xff] }
  0x14   : > { %634 = vmatpush3.bf16.msra.mxu0 %v676_v4 }
  0x15   : > { %635 = vmatprep.subr.bf16.mxu0 %v706_v1 }
  0x18   : > { %636 = vmatpush3.bf16.msra.mxu0 %v677_v5  ;;  %v327_v10 = vld [vmem:[%s772_s7] sm:$0xff]  ;;  %v328_v12 = vld [vmem:[%s772_s7 + $0x8] sm:$0xff] }
  0x19   : > { %637 = vmatprep.subr.bf16.mxu0 %v706_v1 }
  0x1c   : > { %638 = vmatpush3.bf16.msra.mxu0 %v678_v6 }
  0x1d   : > { %639 = vmatprep.subr.bf16.mxu0 %v706_v1 }
  0x20   : > { %640 = vmatpush3.bf16.msra.mxu0 %v679_v7 }
  0x21   : > { %641 = vmatprep.subr.bf16.mxu0 %v706_v1 }
  0x24   : > { %642 = vmatpush3.bf16.msra.mxu0 %v680_v8 }
  0x27   : > { %644 = vmatmul.mubr.bf16.vlgmr.msra.gmra.mrb[0].mxu0 %v681_v9 }
  0xfa   : > { %v435_v11 = vpop.f32.mrb[0].mxu0 }
  0xfb   : > { %v442_v13 = vadd.f32 %v435_v11, %v327_v10  ;;  %v645_v14 = vpop.f32.mrb[1].mxu0 }
  0xfc   : > { %v438_v15 = vpop.f32.mrb[2].mxu0 }
  0xfd   : > { %v443_v16 = vadd.f32 %v438_v15, %v328_v12  ;;  %445 = vst.msk [vmem:[%s772_s7] sm:$0xff] %vm324_vm1, %v442_v13  ;;  %v646_v17 = vpop.f32.mrb[3].mxu0 }
  0xff   : > { %446 = vst.msk [vmem:[%s772_s7 + $0x8] sm:$0xff] %vm324_vm1, %v443_v16 }
 0x104   : > { %v450_v21 = vld [vmem:[%s772_s7] sm:$0xff] }
 0x105   : > { %v459_v23 = vadd.f32 %v615_v18, %v450_v21 }
 0x106   : > { %v451_v22 = vld [vmem:[%s772_s7 + $0x8] sm:$0xff] }
 0x107   : > { %v460_v24 = vadd.f32 %v615_v18, %v451_v22  ;;  %v463_v25 = vadd.f32 %v461_v19, %v459_v23 }
 0x109   : > { %v464_v26 = vadd.f32 %v462_v20, %v460_v24  ;;  %465 = vst.msk [vmem:[%s772_s7] sm:$0xff] %vm324_vm1, %v463_v25 }
 0x10b   : > { %466 = vst.msk [vmem:[%s772_s7 + $0x8] sm:$0xff] %vm324_vm1, %v464_v26 }
 0x10c PF: > { %s14_s17 = sadd.s32 1, %s704_s17   ;;  %s827_s15 = smov %s700_s16 }
 0x10d   : > { %p11_p5 = scmp.ge.s32.totalorder %s14_s17, 5   ;;  %s828_s16 = smov %s830_s18 }
 0x10f   :  { %13 = sbr.rel (!%p11_p5) target bundleno = 2 (0x2), region = 83 }

// kernel: music_x_transformer_loss.21
= control target key start
LH: loop header
LB: loop body
LE: loop exit
PB: predicated region body
PF: predicated region fallthrough
CT: control target
= control target key end

     0   :  { %vm92_vm0 = vcmask 261120   ;;  %v1113_v43 = vmov 0.0   ;;  %vm1114_vm1 = vmmov 0   ;;  %vm707_vm2 = vcmask 1042432   ;;  %s1424_s0 = inlined_call_operand.vmem [shape: f32[48,32], index: 0, kind: input, shape index: {}, may-alias: {0,1,2}]   ;;  %s1425_s1 = inlined_call_operand.vmem [shape: f32[48,32], index: 1, kind: input, shape index: {}, may-alias: {0,1,2}]   ;;  %s1426_s2 = inlined_call_operand.vmem [shape: f32[48,32], index: 2, kind: input, shape index: {}, may-alias: {0,1,2}]   ;;  %s1427_s5 = inlined_call_operand.vmem [shape: bf16[32,128], index: 5, kind: input, shape index: {}]   ;;  %s1428_s7 = inlined_call_operand.vmem [shape: bf16[128,6], index: 7, kind: input, shape index: {}]   ;;  %s1429_s8 = inlined_call_operand.vmem [shape: bf16[128,6], index: 8, kind: input, shape index: {}]   ;;  %s1430_s3 = inlined_call_operand.vmem [shape: f32[1,32], index: 3, kind: input, shape index: {}]   ;;  %s1431_s4 = inlined_call_operand.vmem [shape: f32[1,32], index: 4, kind: input, shape index: {}]   ;;  %s1432_s9 = inlined_call_operand.vmem [shape: bf16[128,6], index: 9, kind: input, shape index: {}]   ;;  %s1433_s6 = inlined_call_operand.vmem [shape: f32[1,128], index: 6, kind: input, shape index: {}]   ;;  %s1434_s10 = inlined_call_operand.vmem [shape: bf16[6,128], index: 10, kind: input, shape index: {}]   ;;  %s1435_s11 = inlined_call_operand.vmem [shape: f32[16,128], index: 11, kind: output, shape index: {}]  }
   0x1   :  { %v90_v0 = vld [vmem:[%s1424_s0] sm:$0xff]  ;;  %v880_v1 = vld [vmem:[%s1425_s1 + $0x10] sm:$0xff]  ;;  %v91_v2 = vld [vmem:[%s1424_s0 + $0x8] sm:$0xff]  ;;  %955 = vmatprep.subr.bf16.mxu0 %v1113_v43  ;;  %963 = vmatprep.subr.bf16.mxu1 %v1113_v43  ;;  %vm703_vm3 = vcmask 48128  }
   0x2   :  { %v93_v3 = vsel %vm92_vm0, %v90_v0, 0.0  ;;  %v201_v4 = vsel %vm92_vm0, %v880_v1, 0.0  ;;  %v881_v5 = vld [vmem:[%s1425_s1 + $0x18] sm:$0xff]  ;;  %v96_v6 = vsel %vm92_vm0, %v91_v2, 0.0  ;;  %v883_v8 = vld [vmem:[%s1426_s2 + $0x20] sm:$0xff]  ;;  %v884_v9 = vld [vmem:[%s1426_s2 + $0x28] sm:$0xff]  ;;  %959 = vmatprep.mubr.msk.bf16.mxu0 %vm1114_vm1, %v1113_v43  ;;  %967 = vmatprep.mubr.msk.bf16.mxu1 %vm1114_vm1, %v1113_v43 }
   0x3   :  { %94 = vadd.xlane.f32.xlu0 %v93_v3  ;;  %202 = vadd.xlane.f32.xlu1 %v201_v4  ;;  %v204_v7 = vsel %vm92_vm0, %v881_v5, 0.0  ;;  %v278_v10 = vsel %vm92_vm0, %v883_v8, 0.0  ;;  %v281_v11 = vsel %vm92_vm0, %v884_v9, 0.0  ;;  %v1232_v42 = vld [vmem:[%s1427_s5] sm:$0xff]   ;;  %v1243_v44 = vld [vmem:[%s1427_s5 + $0x8] sm:$0xff]  }
   0x4   :  { %956 = vmatpush3.bf16.msra.mxu0 %v1232_v42  ;;  %964 = vmatpush3.bf16.msra.mxu1 %v1232_v42 }
   0x5   :  { %957 = vmatprep.subr.bf16.mxu0 %v1113_v43  ;;  %965 = vmatprep.subr.bf16.mxu1 %v1113_v43 }
   0x7   :  { %97 = vadd.xlane.f32.xlu0 %v96_v6  ;;  %205 = vadd.xlane.f32.xlu1 %v204_v7  ;;  %v875_v7 = vld [vmem:[%s1431_s4] ss:$0 sm:$0xff] }
   0x8   :  { %958 = vmatpush3.bf16.msra.mxu0 %v1243_v44  ;;  %966 = vmatpush3.bf16.msra.mxu1 %v1243_v44 }
   0x9   :  { %971 = vmatprep.subr.bf16.mxu0 %v1113_v43  ;;  %979 = vmatprep.subr.bf16.mxu1 %v1113_v43 }
   0xb   :  { %279 = vadd.xlane.f32.xlu0 %v278_v10  ;;  %282 = vadd.xlane.f32.xlu1 %v281_v11 }
  0x90   :  { %v95_v12 = vpop.xlane.xlu0 %94  ;;  %v203_v13 = vpop.xlane.xlu1 %202 }
  0x91   :  { %v100_v14 = vmul.f32 0.03125, %v95_v12  ;;  %v207_v15 = vmul.f32 0.03125, %v203_v13 }
  0x93   :  { %v1199_v16 = vsub.f32 %v90_v0, %v100_v14  ;;  %v1201_v17 = vsub.f32 %v880_v1, %v207_v15  ;;  %v874_v1 = vld [vmem:[%s1430_s3] ss:$0 sm:$0xff] }
  0x94   :  { %v98_v18 = vpop.xlane.xlu0 %97  ;;  %v206_v19 = vpop.xlane.xlu1 %205 }
  0x95   :  { %v101_v20 = vmul.f32 0.03125, %v98_v18  ;;  %v208_v21 = vmul.f32 0.03125, %v206_v19  ;;  %v104_v22 = vmul.f32 %v1199_v16, %v1199_v16  ;;  %v211_v23 = vmul.f32 %v1201_v17, %v1201_v17 }
  0x97   :  { %v1207_v24 = vsub.f32 %v91_v2, %v101_v20  ;;  %v1209_v25 = vsub.f32 %v881_v5, %v208_v21  ;;  %v106_v26 = vsel %vm92_vm0, %v104_v22, 0.0  ;;  %v213_v29 = vsel %vm92_vm0, %v211_v23, 0.0  ;;  %v1061_v23 = vld [vmem:[%s1428_s7] sm:$0xff]  }
  0x98   :  { %107 = vadd.xlane.f32.xlu0 %v106_v26  ;;  %v280_v27 = vpop.xlane.xlu0 %279  ;;  %v283_v28 = vpop.xlane.xlu1 %282 }
  0x99   :  { %v284_v30 = vmul.f32 0.03125, %v280_v27  ;;  %v285_v31 = vmul.f32 0.03125, %v283_v28  ;;  %v105_v32 = vmul.f32 %v1207_v24, %v1207_v24  ;;  %v212_v33 = vmul.f32 %v1209_v25, %v1209_v25  ;;  %v1062_v28 = vld [vmem:[%s1428_s7 + $0x8] sm:$0xff]  }
  0x9b   :  { %v1217_v34 = vsub.f32 %v883_v8, %v284_v30  ;;  %v1219_v35 = vsub.f32 %v884_v9, %v285_v31  ;;  %v109_v36 = vsel %vm92_vm0, %v105_v32, 0.0  ;;  %v216_v37 = vsel %vm92_vm0, %v212_v33, 0.0  ;;  %v1064_v31 = vld [vmem:[%s1428_s7 + $0x10] sm:$0xff]   ;;  %v1065_v32 = vld [vmem:[%s1429_s8 + $0x8] sm:$0xff]   ;;  %v1066_v33 = vld [vmem:[%s1428_s7 + $0x18] sm:$0xff]  }
  0x9c   :  { %214 = vadd.xlane.f32.xlu0 %v213_v29  ;;  %110 = vadd.xlane.f32.xlu1 %v109_v36  ;;  %v1063_v29 = vld [vmem:[%s1429_s8] sm:$0xff]   ;;  %v1069_v36 = vld [vmem:[%s1429_s8 + $0x18] sm:$0xff]  }
  0x9d   :  { %v288_v38 = vmul.f32 %v1217_v34, %v1217_v34  ;;  %v289_v39 = vmul.f32 %v1219_v35, %v1219_v35 }
  0x9f   :  { %v290_v40 = vsel %vm92_vm0, %v288_v38, 0.0  ;;  %v293_v41 = vsel %vm92_vm0, %v289_v39, 0.0  ;;  %v1071_v38 = vld [vmem:[%s1429_s8 + $0x20] sm:$0xff]   ;;  %v1072_v39 = vld [vmem:[%s1428_s7 + $0x30] sm:$0xff]  }
  0xa0   :  { %217 = vadd.xlane.f32.xlu1 %v216_v37  ;;  %291 = vadd.xlane.f32.xlu0 %v290_v40  ;;  %v1070_v37 = vld [vmem:[%s1428_s7 + $0x28] sm:$0xff]  }
  0xa1   :  { %v1073_v40 = vld [vmem:[%s1429_s8 + $0x28] sm:$0xff]  }
  0xa4   :  { %294 = vadd.xlane.f32.xlu1 %v293_v41  ;;  %v1074_v41 = vld [vmem:[%s1428_s7 + $0x38] sm:$0xff]  }
 0x125   :  { %v108_v45 = vpop.xlane.xlu0 %107 }
 0x126   :  { %v112_v46 = vmul.f32 0.03125, %v108_v45  ;;  %v876_v45 = vld [vmem:[%s1433_s6] ss:$0 sm:$0xff] }
 0x128   :  { %v114_v47 = vadd.f32 1e-05, %v112_v46 }
 0x129   :  { %v111_v48 = vpop.xlane.xlu1 %110  ;;  %v215_v49 = vpop.xlane.xlu0 %214 }
 0x12a   :  { %1085 = vrsqrt.f32 %v114_v47  ;;  %v113_v50 = vmul.f32 0.03125, %v111_v48  ;;  %v219_v51 = vmul.f32 0.03125, %v215_v49 }
 0x12c   :  { %v115_v52 = vadd.f32 1e-05, %v113_v50  ;;  %v221_v53 = vadd.f32 1e-05, %v219_v51 }
 0x12d   :  { %v218_v54 = vpop.xlane.xlu1 %217  ;;  %v292_v55 = vpop.xlane.xlu0 %291 }
 0x12e   :  { %1087 = vrsqrt.f32 %v115_v52  ;;  %v220_v56 = vmul.f32 0.03125, %v218_v54  ;;  %v296_v57 = vmul.f32 0.03125, %v292_v55 }
 0x12f   :  { %1089 = vrsqrt.f32 %v221_v53  ;;  %v1076_v53 = vld [vmem:[%s1432_s9] sm:$0xff]  }
 0x130   :  { %v222_v58 = vadd.f32 1e-05, %v220_v56  ;;  %v298_v59 = vadd.f32 1e-05, %v296_v57 }
 0x131   :  { %v295_v60 = vpop.xlane.xlu1 %294 }
 0x132   :  { %1091 = vrsqrt.f32 %v222_v58  ;;  %v297_v61 = vmul.f32 0.03125, %v295_v60 }
 0x133   :  { %1093 = vrsqrt.f32 %v298_v59 }
 0x134   :  { %v1086_v62 = vpop.eup %1085  ;;  %v299_v63 = vadd.f32 1e-05, %v297_v61  ;;  %v1078_v61 = vld [vmem:[%s1432_s9 + $0x8] sm:$0xff]  }
 0x135   :  { %v118_v0 = vmul.f32 %v1086_v62, %v1199_v16 }
 0x136   :  { %1095 = vrsqrt.f32 %v299_v63 }
 0x137   :  { %v126_v5 = vmul.f32 %v874_v1, %v118_v0 }
 0x138   :  { %v1088_v2 = vpop.eup %1087 }
 0x139   :  { %v1090_v3 = vpop.eup %1089  ;;  %v119_v4 = vmul.f32 %v1088_v2, %v1207_v24  ;;  %v134_v12 = vadd.f32 %v875_v7, %v126_v5  ;;  %v1079_v2 = vld [vmem:[%s1432_s9 + $0x10] sm:$0xff]   ;;  %v1082_v5 = vld [vmem:[%s1432_s9 + $0x28] sm:$0xff]  }
 0x13a   :  { %v225_v6 = vmul.f32 %v1090_v3, %v1201_v17  ;;  %v1080_v3 = vld [vmem:[%s1432_s9 + $0x18] sm:$0xff]  }
 0x13b   :  { %v127_v8 = vmul.f32 %v874_v1, %v119_v4  ;;  %v1081_v4 = vld [vmem:[%s1432_s9 + $0x20] sm:$0xff]  }
 0x13c   :  { %v1092_v9 = vpop.eup %1091  ;;  %v227_v14 = vmul.f32 %v874_v1, %v225_v6  ;;  %v1083_v6 = vld [vmem:[%s1432_s9 + $0x30] sm:$0xff]  }
 0x13d   :  { %v1094_v10 = vpop.eup %1093  ;;  %v226_v11 = vmul.f32 %v1092_v9, %v1209_v25  ;;  %v135_v13 = vadd.f32 %v875_v7, %v127_v8 }
 0x13e   :  { %v302_v15 = vmul.f32 %v1094_v10, %v1217_v34  ;;  %v229_v21 = vadd.f32 %v875_v7, %v227_v14  ;;  %v1067_v34 = vld [vmem:[%s1429_s8 + $0x10] sm:$0xff]  }
 0x13f   :  { %v136_v16 = vpack.c.bf16 %v135_v13, %v134_v12  ;;  %v228_v18 = vmul.f32 %v874_v1, %v226_v11  ;;  %v699_v11 = vld [vmem:[%s1434_s10] sm:$0x7] }
 0x140   :  { %v1096_v19 = vpop.eup %1095  ;;  %v304_v20 = vmul.f32 %v874_v1, %v302_v15  ;;  %v1401_v12 = vsel %vm707_vm2, %v699_v11, 0 }
 0x141   :  { %v303_v17 = vmul.f32 %v1096_v19, %v1219_v35  ;;  %960 = vmatmul.mubr.msk.bf16.vlgmr.msra.gmra.mrb[0].mxu0 %vm92_vm0, %v136_v16  ;;  %v230_v22 = vadd.f32 %v875_v7, %v228_v18  ;;  %v1068_v35 = vld [vmem:[%s1428_s7 + $0x20] sm:$0xff]  }
 0x142   :  { %972 = vmatpush3.bf16.msra.mxu0 %v1232_v42  ;;  %975 = vmatprep.mubr.msk.bf16.mxu0 %vm1114_vm1, %v1113_v43  ;;  %v306_v26 = vadd.f32 %v875_v7, %v304_v20  ;;  %v1075_v42 = vld [vmem:[%s1429_s8 + $0x30] sm:$0xff]  }
 0x143   :  { %v305_v24 = vmul.f32 %v874_v1, %v303_v17  ;;  %v231_v25 = vpack.c.bf16 %v230_v22, %v229_v21  ;;  %973 = vmatprep.subr.bf16.mxu0 %v1113_v43 }
 0x145   :  { %968 = vmatmul.mubr.msk.bf16.vlgmr.msra.gmra.mrb[0].mxu1 %vm92_vm0, %v231_v25  ;;  %v307_v27 = vadd.f32 %v875_v7, %v305_v24  ;;  %v1084_v7 = vld [vmem:[%s1432_s9 + $0x38] sm:$0xff]  }
 0x146   :  { %974 = vmatpush3.bf16.msra.mxu0 %v1243_v44  ;;  %980 = vmatpush3.bf16.msra.mxu1 %v1061_v23  ;;  %v1077_v44 = vld [vmem:[%s1429_s8 + $0x38] sm:$0xff]  }
 0x147   :  { %v308_v30 = vpack.c.bf16 %v307_v27, %v306_v26  ;;  %981 = vmatprep.subr.bf16.mxu1 %v1113_v43  ;;  %999 = vmatprep.subr.bf16.mxu0 %v1113_v43 }
 0x148   :  { %995 = vmatprep.mubr.msk.bf16.mxu1 %vm1114_vm1, %v1113_v43 }
 0x149   :  { %976 = vmatmul.mubr.msk.bf16.vlgmr.msra.gmra.mrb[4].mxu0 %vm92_vm0, %v308_v30 }
 0x14a   :  { %982 = vmatpush3.bf16.msra.mxu1 %v1062_v28  ;;  %1000 = vmatpush3.bf16.msra.mxu0 %v1063_v29 }
 0x14b   :  { %983 = vmatprep.subr.bf16.mxu1 %v1113_v43  ;;  %1001 = vmatprep.subr.bf16.mxu0 %v1113_v43 }
 0x14c   :  { %1015 = vmatprep.mubr.msk.bf16.mxu0 %vm1114_vm1, %v1113_v43 }
 0x14e   :  { %984 = vmatpush3.bf16.msra.mxu1 %v1064_v31  ;;  %1002 = vmatpush3.bf16.msra.mxu0 %v1065_v32 }
 0x14f   :  { %985 = vmatprep.subr.bf16.mxu1 %v1113_v43  ;;  %1003 = vmatprep.subr.bf16.mxu0 %v1113_v43 }
 0x152   :  { %986 = vmatpush3.bf16.msra.mxu1 %v1066_v33  ;;  %1004 = vmatpush3.bf16.msra.mxu0 %v1067_v34 }
 0x153   :  { %987 = vmatprep.subr.bf16.mxu1 %v1113_v43  ;;  %1005 = vmatprep.subr.bf16.mxu0 %v1113_v43 }
 0x156   :  { %988 = vmatpush3.bf16.msra.mxu1 %v1068_v35  ;;  %1006 = vmatpush3.bf16.msra.mxu0 %v1069_v36 }
 0x157   :  { %989 = vmatprep.subr.bf16.mxu1 %v1113_v43  ;;  %1007 = vmatprep.subr.bf16.mxu0 %v1113_v43 }
 0x15a   :  { %990 = vmatpush3.bf16.msra.mxu1 %v1070_v37  ;;  %1008 = vmatpush3.bf16.msra.mxu0 %v1071_v38 }
 0x15b   :  { %991 = vmatprep.subr.bf16.mxu1 %v1113_v43  ;;  %1009 = vmatprep.subr.bf16.mxu0 %v1113_v43 }
 0x15e   :  { %992 = vmatpush3.bf16.msra.mxu1 %v1072_v39  ;;  %1010 = vmatpush3.bf16.msra.mxu0 %v1073_v40 }
 0x15f   :  { %993 = vmatprep.subr.bf16.mxu1 %v1113_v43  ;;  %1011 = vmatprep.subr.bf16.mxu0 %v1113_v43 }
 0x162   :  { %994 = vmatpush3.bf16.msra.mxu1 %v1074_v41  ;;  %1012 = vmatpush3.bf16.msra.mxu0 %v1075_v42 }
 0x163   :  { %1019 = vmatprep.subr.bf16.mxu1 %v1113_v43  ;;  %1013 = vmatprep.subr.bf16.mxu0 %v1113_v43 }
 0x166   :  { %1014 = vmatpush3.bf16.msra.mxu0 %v1077_v44 }
 0x167   :  { %1039 = vmatprep.subr.bf16.mxu0 %v1113_v43 }
 0x214   :  { %v192_v46 = vpop.f32.mrb[0].mxu0 }
 0x215   :  { %v961_v47 = vpop.f32.mrb[1].mxu0  ;;  %v1345_v49 = vadd.f32 %v876_v45, %v192_v46 }
 0x216   :  { %v195_v48 = vpop.f32.mrb[2].mxu0 }
 0x217   :  { %v1347_v50 = vadd.f32 %v876_v45, %v195_v48  ;;  %v962_v51 = vpop.f32.mrb[3].mxu0 }
 0x218   :  { %v269_v52 = vpop.f32.mrb[0].mxu1 }
 0x219   :  { %v353_v54 = vpack.c.bf16 %v1347_v50, %v1345_v49  ;;  %v969_v55 = vpop.f32.mrb[1].mxu1  ;;  %v1354_v57 = vadd.f32 %v876_v45, %v269_v52 }
 0x21a   :  { %v272_v56 = vpop.f32.mrb[2].mxu1 }
 0x21b   :  { %v1356_v58 = vadd.f32 %v876_v45, %v272_v56  ;;  %v970_v59 = vpop.f32.mrb[3].mxu1  ;;  %996 = vmatmul.mubr.bf16.vlgmr.msra.gmra.mrb[4].mxu1 %v353_v54 }
 0x21c   :  { %1020 = vmatpush3.bf16.msra.mxu1 %v1076_v53  ;;  %v346_v60 = vpop.f32.mrb[4].mxu0  ;;  %1035 = vmatprep.mubr.msk.bf16.mxu1 %vm1114_vm1, %v1113_v43 }
 0x21d   :  { %v459_v62 = vpack.c.bf16 %v1356_v58, %v1354_v57  ;;  %v977_v63 = vpop.f32.mrb[5].mxu0  ;;  %1021 = vmatprep.subr.bf16.mxu1 %v1113_v43  ;;  %v1394_v9 = vadd.f32 %v876_v45, %v346_v60 }
 0x21e   :  { %v349_v0 = vpop.f32.mrb[6].mxu0 }
 0x21f   :  { %v978_v1 = vpop.f32.mrb[7].mxu0  ;;  %1016 = vmatmul.mubr.bf16.vlgmr.msra.gmra.mrb[8].mxu0 %v459_v62  ;;  %v1391_v8 = vadd.f32 %v876_v45, %v349_v0 }
 0x220   :  { %1022 = vmatpush3.bf16.msra.mxu1 %v1078_v61  ;;  %1041 = vmatprep.mubr.msk.bf16.mxu0 %vm1114_vm1, %v1113_v43 }
 0x221   :  { %1023 = vmatprep.subr.bf16.mxu1 %v1113_v43  ;;  %v565_v10 = vpack.c.bf16 %v1391_v8, %v1394_v9  ;;  %1040 = vmatpush3.bf16.msra.mxu0 %v1401_v12 }
 0x222   :  { %1045 = vmatprep.subr.bf16.mxu0 %v1113_v43 }
 0x224   :  { %1024 = vmatpush3.bf16.msra.mxu1 %v1079_v2 }
 0x225   :  { %1025 = vmatprep.subr.bf16.mxu1 %v1113_v43 }
 0x228   :  { %1026 = vmatpush3.bf16.msra.mxu1 %v1080_v3 }
 0x229   :  { %1027 = vmatprep.subr.bf16.mxu1 %v1113_v43 }
 0x22c   :  { %1028 = vmatpush3.bf16.msra.mxu1 %v1081_v4 }
 0x22d   :  { %1029 = vmatprep.subr.bf16.mxu1 %v1113_v43 }
 0x230   :  { %1030 = vmatpush3.bf16.msra.mxu1 %v1082_v5 }
 0x231   :  { %1031 = vmatprep.subr.bf16.mxu1 %v1113_v43 }
 0x234   :  { %1032 = vmatpush3.bf16.msra.mxu1 %v1083_v6 }
 0x235   :  { %1033 = vmatprep.subr.bf16.mxu1 %v1113_v43 }
 0x238   :  { %1034 = vmatpush3.bf16.msra.mxu1 %v1084_v7 }
 0x23b   :  { %1036 = vmatmul.mubr.bf16.vlgmr.msra.gmra.mrb[8].mxu1 %v565_v10 }
 0x2ee   :  { %v452_v13 = vpop.f32.mrb[4].mxu1 }
 0x2ef   :  { %v997_v14 = vpop.f32.mrb[5].mxu1 }
 0x2f0   :  { %v455_v15 = vpop.f32.mrb[6].mxu1 }
 0x2f1   :  { %v998_v16 = vpop.f32.mrb[7].mxu1 }
 0x2f2   :  { %v558_v18 = vpop.f32.mrb[8].mxu0 }
 0x2f3   :  { %v671_v19 = vmax.f32 %v452_v13, %v558_v18  ;;  %v1017_v20 = vpop.f32.mrb[9].mxu0 }
 0x2f4   :  { %v561_v17 = vpop.f32.mrb[10].mxu0 }
 0x2f5   :  { %v672_v21 = vmax.f32 %v455_v15, %v561_v17  ;;  %v1018_v22 = vpop.f32.mrb[11].mxu0 }
 0x30e   :  { %v664_v23 = vpop.f32.mrb[8].mxu1 }
 0x30f   :  { %v673_v24 = vmax.f32 %v671_v19, %v664_v23  ;;  %v1037_v25 = vpop.f32.mrb[9].mxu1 }
 0x310   :  { %v667_v26 = vpop.f32.mrb[10].mxu1 }
 0x311   :  { %v675_v27 = vsub.f32 %v452_v13, %v673_v24  ;;  %v681_v28 = vsub.f32 %v558_v18, %v673_v24  ;;  %v687_v29 = vsub.f32 %v664_v23, %v673_v24  ;;  %v674_v30 = vmax.f32 %v672_v21, %v667_v26  ;;  %v1038_v31 = vpop.f32.mrb[11].mxu1 }
 0x313   :  { %v677_v32 = vmul.f32 1.442695, %v675_v27  ;;  %v683_v33 = vmul.f32 1.442695, %v681_v28  ;;  %v689_v34 = vmul.f32 1.442695, %v687_v29  ;;  %v676_v35 = vsub.f32 %v455_v15, %v674_v30 }
 0x314   :  { %v682_v36 = vsub.f32 %v561_v17, %v674_v30  ;;  %v688_v37 = vsub.f32 %v667_v26, %v674_v30 }
 0x315   :  { %1097 = vpow2.f32 %v677_v32  ;;  %v679_v38 = vmul.f32 1.442695, %v676_v35 }
 0x316   :  { %1099 = vpow2.f32 %v683_v33  ;;  %v685_v39 = vmul.f32 1.442695, %v682_v36  ;;  %v691_v40 = vmul.f32 1.442695, %v688_v37 }
 0x317   :  { %1101 = vpow2.f32 %v689_v34 }
 0x318   :  { %1103 = vpow2.f32 %v679_v38 }
 0x319   :  { %1105 = vpow2.f32 %v685_v39 }
 0x31a   :  { %1107 = vpow2.f32 %v691_v40 }
 0x31f   :  { %v1098_v41 = vpop.eup %1097 }
 0x320   :  { %v1100_v42 = vpop.eup %1099 }
 0x321   :  { %v1102_v44 = vpop.eup %1101  ;;  %v693_v45 = vadd.f32 %v1100_v42, %v1098_v41 }
 0x322   :  { %v1104_v46 = vpop.eup %1103 }
 0x323   :  { %v1106_v47 = vpop.eup %1105  ;;  %v695_v48 = vadd.f32 %v1102_v44, %v693_v45 }
 0x324   :  { %v694_v51 = vadd.f32 %v1106_v47, %v1104_v46  ;;  %v1108_v52 = vpop.eup %1107 }
 0x325   :  { %1109 = vrcp.f32 %v695_v48 }
 0x326   :  { %v696_v53 = vadd.f32 %v1108_v52, %v694_v51 }
 0x328   :  { %1111 = vrcp.f32 %v696_v53 }
 0x32f   :  { %v1110_v54 = vpop.eup %1109 }
 0x330   :  { %v799_v55 = vmul.f32 %v1110_v54, %v1102_v44  ;;  %v700_v56 = vmul.f32 %v1110_v54, %v1098_v41  ;;  %v752_v59 = vmul.f32 %v1110_v54, %v1100_v42 }
 0x332   :  { %v1112_v60 = vpop.eup %1111 }
 0x333   :  { %v800_v61 = vmul.f32 %v1112_v60, %v1108_v52  ;;  %v701_v62 = vmul.f32 %v1112_v60, %v1104_v46  ;;  %v753_v63 = vmul.f32 %v1112_v60, %v1106_v47 }
 0x335   :  { %v702_v0 = vpack.c.bf16 %v701_v62, %v700_v56  ;;  %v754_v1 = vpack.c.bf16 %v753_v63, %v752_v59  ;;  %v801_v2 = vpack.c.bf16 %v800_v61, %v799_v55 }
 0x337   :  { %1042 = vmatmul.mubr.msk.bf16.vlgmr.msra.gmra.mrb[12].mxu0 %vm703_vm3, %v702_v0 }
 0x338   :  { %1046 = vmatpush3.bf16.msra.mxu0 %v1401_v12  ;;  %1047 = vmatprep.mubr.msk.bf16.mxu0 %vm1114_vm1, %v1113_v43 }
 0x339   :  { %1051 = vmatprep.subr.bf16.mxu0 %v1113_v43 }
 0x33f   :  { %1048 = vmatmul.mubr.msk.bf16.vlgmr.msra.gmra.mrb[16].mxu0 %vm703_vm3, %v754_v1 }
 0x340   :  { %1052 = vmatpush3.bf16.msra.mxu0 %v1401_v12  ;;  %1053 = vmatprep.mubr.msk.bf16.mxu0 %vm1114_vm1, %v1113_v43 }
 0x347   :  { %1054 = vmatmul.mubr.msk.bf16.vlgmr.msra.gmra.mrb[20].mxu0 %vm703_vm3, %v801_v2 }
 0x40a   :  { %v745_v3 = vpop.f32.mrb[12].mxu0 }
 0x40b   :  { %v1043_v4 = vpop.f32.mrb[13].mxu0  ;;  %v846_v10 = vmul.f32 %v745_v3, %v1345_v49 }
 0x40c   :  { %v748_v5 = vpop.f32.mrb[14].mxu0 }
 0x40d   :  { %v1044_v6 = vpop.f32.mrb[15].mxu0  ;;  %v847_v15 = vmul.f32 %v748_v5, %v1347_v50 }
 0x412   :  { %v792_v7 = vpop.f32.mrb[16].mxu0 }
 0x413   :  { %v848_v11 = vmul.f32 %v792_v7, %v1354_v57  ;;  %v1049_v13 = vpop.f32.mrb[17].mxu0 }
 0x414   :  { %v795_v14 = vpop.f32.mrb[18].mxu0 }
 0x415   :  { %v850_v16 = vadd.f32 %v848_v11, %v846_v10  ;;  %v849_v12 = vmul.f32 %v795_v14, %v1356_v58  ;;  %v1050_v18 = vpop.f32.mrb[19].mxu0 }
 0x417   :  { %v851_v19 = vadd.f32 %v849_v12, %v847_v15 }
 0x41a   :  { %v839_v43 = vpop.f32.mrb[20].mxu0 }
 0x41b   :  { %v852_v20 = vmul.f32 %v839_v43, %v1394_v9  ;;  %v1055_v17 = vpop.f32.mrb[21].mxu0 }
 0x41c   :  { %v842_v21 = vpop.f32.mrb[22].mxu0 }
 0x41d   :  { %v854_v22 = vadd.f32 %v852_v20, %v850_v16  ;;  %v853_v23 = vmul.f32 %v842_v21, %v1391_v8  ;;  %v1056_v49 = vpop.f32.mrb[23].mxu0 }
 0x41f   :  { %856 = vst [vmem:[%s1435_s11] sm:$0xff] %v854_v22  ;;  %v855_v57 = vadd.f32 %v853_v23, %v851_v19 }
 0x421   :  { %857 = vst [vmem:[%s1435_s11 + $0x8] sm:$0xff] %v855_v57 }

</bundles_post_ra>
